<compile_context>
chip_gen: v7x
topology: tpu7x:2x2x1
jax: 0.10.0
libtpu: 0.0.40
codegen_flags: <defaults>
</compile_context>

<pallas_src>
import functools

import jax
import jax.numpy as jnp
from jax import lax
from jax.experimental import pallas as pl
from jax.experimental.pallas import tpu as pltpu

LANE = 128                    # pad channel dims to a multiple of the 128-lane axis
_BN_EPS = 1e-5
_MXU_DTYPE = jnp.bfloat16     # MXU-native inputs; accumulation stays f32


def _round_up(x, m):
    return (x + m - 1) // m * m


# ---------------------------------------------------------------------------
# Kernel 1: conv (taps matmuls over im2col columns) + per-image BN partial stats
# ---------------------------------------------------------------------------
def _conv_stats_kernel(xc_ref, w_ref, y_ref, stats_ref, acc_ref, *,
                       taps, row_shift, out_rows):
    """One image per grid step.

    xc_ref   : (1, out_rows + (taps-1)*row_shift, K) bf16 im2col columns
    w_ref    : (taps, K, Cp)                         bf16 weight slab per kh tap
    y_ref    : (1, out_rows, Cp)                     f32 conv output (pre-BN)
    stats_ref: (1, 2, Cp)                            f32 [col sum ; col sum-of-squares]
    acc_ref  : (out_rows, Cp) VMEM scratch           f32 accumulator
    """
    acc_ref[...] = jnp.dot(xc_ref[0, 0:out_rows, :], w_ref[0],
                           preferred_element_type=jnp.float32)
    for kh in range(1, taps):                     # static unroll (taps is 1 or 3)
        lo = kh * row_shift                       # contiguous row range -> no relayout
        acc_ref[...] += jnp.dot(xc_ref[0, lo:lo + out_rows, :], w_ref[kh],
                                preferred_element_type=jnp.float32)

    acc = acc_ref[...]
    y_ref[0] = acc
    col_sum = jnp.sum(acc, axis=0, keepdims=True)           # (1, Cp)
    col_sq = jnp.sum(acc * acc, axis=0, keepdims=True)      # (1, Cp)
    stats_ref[0] = jnp.concatenate([col_sum, col_sq], axis=0)


def _conv_with_stats(xc, w_taps, *, out_rows, row_shift):
    n, in_rows, k = xc.shape
    taps, k2, cp = w_taps.shape
    assert k2 == k
    kernel = functools.partial(_conv_stats_kernel, taps=taps,
                               row_shift=row_shift, out_rows=out_rows)
    flops = 2 * n * out_rows * taps * k * cp
    bytes_accessed = (xc.size * xc.dtype.itemsize
                      + w_taps.size * w_taps.dtype.itemsize
                      + n * out_rows * cp * 4 + n * 2 * cp * 4)
    y, stats = pl.pallas_call(
        kernel,
        grid=(n,),
        in_specs=[
            pl.BlockSpec((1, in_rows, k), lambda i: (i, 0, 0)),
            pl.BlockSpec((taps, k, cp), lambda i: (0, 0, 0)),
        ],
        out_specs=[
            pl.BlockSpec((1, out_rows, cp), lambda i: (i, 0, 0)),
            pl.BlockSpec((1, 2, cp), lambda i: (i, 0, 0)),
        ],
        out_shape=[
            jax.ShapeDtypeStruct((n, out_rows, cp), jnp.float32),
            jax.ShapeDtypeStruct((n, 2, cp), jnp.float32),
        ],
        scratch_shapes=[pltpu.VMEM((out_rows, cp), jnp.float32)],
        compiler_params=pltpu.CompilerParams(
            dimension_semantics=("parallel",),
            vmem_limit_bytes=64 * 1024 * 1024,
        ),
        cost_estimate=pl.CostEstimate(flops=flops, transcendentals=0,
                                      bytes_accessed=bytes_accessed),
    )(xc, w_taps)
    return y, stats


# ---------------------------------------------------------------------------
# Kernel 2: per-channel affine (folded BN1 * gate1) + ReLU
# ---------------------------------------------------------------------------
def _affine_relu_kernel(y_ref, a_ref, b_ref, o_ref):
    o_ref[0] = jnp.maximum(y_ref[0] * a_ref[...] + b_ref[...], 0.0).astype(o_ref.dtype)


def _affine_relu(y, a, b, out_dtype):
    n, rows, cp = y.shape
    return pl.pallas_call(
        _affine_relu_kernel,
        grid=(n,),
        in_specs=[pl.BlockSpec((1, rows, cp), lambda i: (i, 0, 0)),
                  pl.BlockSpec((1, cp), lambda i: (0, 0)),
                  pl.BlockSpec((1, cp), lambda i: (0, 0))],
        out_specs=pl.BlockSpec((1, rows, cp), lambda i: (i, 0, 0)),
        out_shape=jax.ShapeDtypeStruct((n, rows, cp), out_dtype),
        compiler_params=pltpu.CompilerParams(
            dimension_semantics=("parallel",),
            vmem_limit_bytes=64 * 1024 * 1024),
    )(y, a, b)


# ---------------------------------------------------------------------------
# Kernel 3: fused (BN2*gate2) + shortcut-BN + residual add + final gate2 multiply
#           out = y2 * A2 + ys * AS + B   (A2/AS/B are per-channel, built in wrapper)
# ---------------------------------------------------------------------------
def _residual_fuse_kernel(y2_ref, ys_ref, a2_ref, as_ref, b_ref, o_ref):
    o_ref[0] = (y2_ref[0] * a2_ref[...] + ys_ref[0] * as_ref[...]
                + b_ref[...]).astype(o_ref.dtype)


def _residual_fuse(y2, ys, a2, a_s, b):
    n, rows, cp = y2.shape
    return pl.pallas_call(
        _residual_fuse_kernel,
        grid=(n,),
        in_specs=[pl.BlockSpec((1, rows, cp), lambda i: (i, 0, 0)),
                  pl.BlockSpec((1, rows, cp), lambda i: (i, 0, 0)),
                  pl.BlockSpec((1, cp), lambda i: (0, 0)),
                  pl.BlockSpec((1, cp), lambda i: (0, 0)),
                  pl.BlockSpec((1, cp), lambda i: (0, 0))],
        out_specs=pl.BlockSpec((1, rows, cp), lambda i: (i, 0, 0)),
        out_shape=jax.ShapeDtypeStruct((n, rows, cp), jnp.float32),
        compiler_params=pltpu.CompilerParams(
            dimension_semantics=("parallel",),
            vmem_limit_bytes=64 * 1024 * 1024),
    )(y2, ys, a2, a_s, b)


# ---------------------------------------------------------------------------
# Wrapper-side glue (layout / im2col / tiny per-channel BN math)
# ---------------------------------------------------------------------------
def _pad_channels(v, cp):
    return jnp.pad(v, (0, cp - v.shape[0])).astype(jnp.float32)


def _im2col_width(x_nhwc):
    """(N,H,W,C) -> (N,(H+2)*W, 3*C): spatial zero-pad + 3 kw-shifts on channels."""
    n, h, w, c = x_nhwc.shape
    xp = jnp.pad(x_nhwc, ((0, 0), (1, 1), (1, 1), (0, 0)))
    cols = jnp.concatenate([xp[:, :, kw:kw + w, :] for kw in range(3)], axis=-1)
    return cols.reshape(n, (h + 2) * w, 3 * c)


def _conv3x3_taps(w_oihw, cin_pad, cout_pad):
    """(Cout,Cin,3,3) -> (3, 3*cin_pad, cout_pad); K layout = (kw, cin) kw-major."""
    cout, cin = w_oihw.shape[0], w_oihw.shape[1]
    w = jnp.transpose(w_oihw, (2, 3, 1, 0))                      # (kh, kw, Cin, Cout)
    w = jnp.pad(w, ((0, 0), (0, 0), (0, cin_pad - cin), (0, cout_pad - cout)))
    return w.reshape(3, 3 * cin_pad, cout_pad)


def _bn_scale_shift(stats, count, gamma_p, beta_p):
    """stats: (N, 2, Cp) per-image [sum, sumsq] -> per-channel (scale, shift)."""
    total = jnp.sum(stats, axis=0)                               # (2, Cp)
    mean = total[0] / count
    var = jnp.maximum(total[1] / count - mean * mean, 0.0)       # biased (training-mode)
    scale = gamma_p * lax.rsqrt(var + _BN_EPS)
    shift = beta_p - mean * scale
    return scale, shift


@jax.jit
def basic_block_forward(x, params):
    """x: (N, Cin, H, W) f32 NCHW.  Returns (N, Cout, H, W) f32 (PyTorch layout)."""
    w1, gamma1, beta1, gate1 = params["conv1"], params["bn1_w"], params["bn1_b"], params["gate1"]
    w2, gamma2, beta2, gate2 = params["conv2"], params["bn2_w"], params["bn2_b"], params["gate2"]
    ws, gammas, betas = params["ds_conv"], params["ds_bn_w"], params["ds_bn_b"]

    n, cin, h, w = x.shape
    cout = w1.shape[0]
    cp = _round_up(cout, LANE)
    rows = h * w
    count = jnp.float32(n * rows)

    # TODO(synk): only stride=1 (the module default) is implemented; stride>1 would
    # subsample the im2col columns/rows in this wrapper glue.

    x_nhwc = jnp.transpose(x, (0, 2, 3, 1)).astype(_MXU_DTYPE)

    # --- conv1 (3x3) + BN1 partial stats -------------------------------------
    xc1 = _im2col_width(x_nhwc)                                  # (N,(H+2)W,3Cin) bf16
    w1_taps = _conv3x3_taps(w1, cin, cp).astype(_MXU_DTYPE)
    y1, stats1 = _conv_with_stats(xc1, w1_taps, out_rows=rows, row_shift=w)

    # --- shortcut: 1x1 conv + BN partial stats --------------------------------
    xs = x_nhwc.reshape(n, rows, cin)
    ws_mat = jnp.pad(jnp.transpose(ws.reshape(cout, cin), (1, 0)),
                     ((0, 0), (0, cp - cout)))[None].astype(_MXU_DTYPE)   # (1,Cin,Cp)
    ys, stats_s = _conv_with_stats(xs, ws_mat, out_rows=rows, row_shift=0)

    # --- BN1 + gate1 + ReLU (global stats folded into one per-channel affine) --
    g1 = _pad_channels(gate1, cp)
    s1, t1 = _bn_scale_shift(stats1, count, _pad_channels(gamma1, cp),
                             _pad_channels(beta1, cp))
    z1 = _affine_relu(y1, (g1 * s1)[None], (g1 * t1)[None], _MXU_DTYPE)

    # --- conv2 (3x3) on z1 + BN2 partial stats ---------------------------------
    xc2 = _im2col_width(z1.reshape(n, h, w, cp))                 # (N,(H+2)W,3Cp) bf16
    w2_taps = _conv3x3_taps(w2, cp, cp).astype(_MXU_DTYPE)
    y2, stats2 = _conv_with_stats(xc2, w2_taps, out_rows=rows, row_shift=w)

    # --- fold BN2*gate2, shortcut BN, residual add, final gate2 multiply --------
    # out = g2 * ( g2*(y2*s2+t2) + (ys*ss+ts) ) = y2*A2 + ys*AS + B
    g2 = _pad_channels(gate2, cp)
    s2, t2 = _bn_scale_shift(stats2, count, _pad_channels(gamma2, cp),
                             _pad_channels(beta2, cp))
    ss, ts = _bn_scale_shift(stats_s, count, _pad_channels(gammas, cp),
                             _pad_channels(betas, cp))
    a2 = g2 * g2 * s2
    a_s = g2 * ss
    b = g2 * g2 * t2 + g2 * ts
    out = _residual_fuse(y2, ys, a2[None], a_s[None], b[None])   # (N, rows, Cp) f32

    out = out.reshape(n, h, w, cp)[:, :, :, :cout]               # drop padded channels
    return jnp.transpose(out, (0, 3, 1, 2))


# ---------------------------------------------------------------------------
# Pure-JAX reference matching the PyTorch BasicBlock.forward (training-mode BN)
# ---------------------------------------------------------------------------
def _reference(x, params):
    w1, gamma1, beta1, gate1 = params["conv1"], params["bn1_w"], params["bn1_b"], params["gate1"]
    w2, gamma2, beta2, gate2 = params["conv2"], params["bn2_w"], params["bn2_b"], params["gate2"]
    ws, gammas, betas = params["ds_conv"], params["ds_bn_w"], params["ds_bn_b"]

    def conv(v, wgt, pad):
        return lax.conv_general_dilated(
            v, wgt, window_strides=(1, 1), padding=((pad, pad), (pad, pad)),
            dimension_numbers=("NCHW", "OIHW", "NCHW"),
            precision=lax.Precision.HIGHEST)

    def bn(v, gamma, beta):
        mean = jnp.mean(v, axis=(0, 2, 3), keepdims=True)
        var = jnp.mean((v - mean) ** 2, axis=(0, 2, 3), keepdims=True)
        return ((v - mean) * lax.rsqrt(var + _BN_EPS) * gamma[None, :, None, None]
                + beta[None, :, None, None])

    res = bn(conv(x, ws, 0), gammas, betas)
    hid = bn(conv(x, w1, 1), gamma1, beta1) * gate1[None, :, None, None]
    hid = jnp.maximum(hid, 0.0)
    hid = bn(conv(hid, w2, 1), gamma2, beta2) * gate2[None, :, None, None]
    hid = hid + res
    return hid * gate2[None, :, None, None]


if __name__ == "__main__":
    N, CIN, COUT, H, W = 2, 4, 8, 16, 16

    key = jax.random.PRNGKey(0)
    ks = jax.random.split(key, 10)
    x = jax.random.normal(ks[0], (N, CIN, H, W), jnp.float32)
    params = {
        "conv1": jax.random.normal(ks[1], (COUT, CIN, 3, 3), jnp.float32) * 0.2,
        "bn1_w": 1.0 + 0.1 * jax.random.normal(ks[2], (COUT,), jnp.float32),
        "bn1_b": 0.1 * jax.random.normal(ks[3], (COUT,), jnp.float32),
        "gate1": 1.0 + 0.1 * jax.random.normal(ks[4], (COUT,), jnp.float32),
        "conv2": jax.random.normal(ks[5], (COUT, COUT, 3, 3), jnp.float32) * 0.2,
        "bn2_w": 1.0 + 0.1 * jax.random.normal(ks[6], (COUT,), jnp.float32),
        "bn2_b": 0.1 * jax.random.normal(ks[7], (COUT,), jnp.float32),
        "gate2": 1.0 + 0.1 * jax.random.normal(ks[8], (COUT,), jnp.float32),
        "ds_conv": jax.random.normal(ks[9], (COUT, CIN, 1, 1), jnp.float32) * 0.2,
        "ds_bn_w": jnp.ones((COUT,), jnp.float32),
        "ds_bn_b": jnp.zeros((COUT,), jnp.float32),
    }

    out = jax.block_until_ready(basic_block_forward(x, params))
    ref = _reference(x, params)

    assert out.shape == (N, COUT, H, W), out.shape
    max_err = float(jnp.max(jnp.abs(out - ref)))
    assert jnp.allclose(out, ref, rtol=3e-2, atol=3e-2), max_err  # bf16 MXU inputs

    print("KERNEL_OK")
</pallas_src>

<mosaic_0001>
module attributes {stable_mosaic.version = 11 : i64} {
  func.func @_conv_stats_kernel(%arg0: i32, %arg1: memref<1x288x12xbf16, #tpu.memory_space<vmem>>, %arg2: memref<3x12x128xbf16, #tpu.memory_space<vmem>>, %arg3: memref<1x256x128xf32, #tpu.memory_space<vmem>>, %arg4: memref<1x2x128xf32, #tpu.memory_space<vmem>>, %arg5: memref<256x128xf32, #tpu.memory_space<vmem>>) attributes {dimension_semantics = [#tpu.dimension_semantics<parallel>], iteration_bounds = array<i64: 2>, scalar_prefetch = 0 : i64, scratch_operands = 1 : i64, tpu.core_type = #tpu.core_type<tc>, window_params = [{transform_indices = @transform_0, window_bounds = array<i64: 1, 288, 12>}, {pipeline_mode = #tpu.pipeline_mode<synchronous>, transform_indices = @transform_1, window_bounds = array<i64: 3, 12, 128>}, {transform_indices = @transform_2, window_bounds = array<i64: 1, 256, 128>}, {transform_indices = @transform_3, window_bounds = array<i64: 1, 2, 128>}]} {
    %c0 = arith.constant 0 : index
    %c0_0 = arith.constant 0 : index
    %c0_1 = arith.constant 0 : index
    %0 = vector.load %arg1[%c0, %c0_0, %c0_1] : memref<1x288x12xbf16, #tpu.memory_space<vmem>>, vector<1x256x12xbf16>
    %1 = vector.shape_cast %0 : vector<1x256x12xbf16> to vector<256x12xbf16>
    %c0_2 = arith.constant 0 : index
    %c0_3 = arith.constant 0 : index
    %c0_4 = arith.constant 0 : index
    %2 = vector.load %arg2[%c0_2, %c0_3, %c0_4] : memref<3x12x128xbf16, #tpu.memory_space<vmem>>, vector<1x12x128xbf16>
    %3 = vector.shape_cast %2 : vector<1x12x128xbf16> to vector<12x128xbf16>
    %cst = arith.constant dense<0.000000e+00> : vector<256x128xf32>
    %4 = tpu.matmul %1, %3, %cst {dimension_numbers = #tpu.dot_dimension_numbers<[1], [0], [0], [1], [0, 0, 1, 1], [], []>} : vector<256x12xbf16>, vector<12x128xbf16>, vector<256x128xf32> -> vector<256x128xf32>
    %c0_5 = arith.constant 0 : index
    %c0_6 = arith.constant 0 : index
    %5 = vector.load %arg5[%c0_5, %c0_6] : memref<256x128xf32, #tpu.memory_space<vmem>>, vector<256x128xf32>
    tpu.vector_store %arg5[%c0_5, %c0_6], %4 {strides = array<i32>} : memref<256x128xf32, #tpu.memory_space<vmem>>, vector<256x128xf32>,
    %c0_7 = arith.constant 0 : index
    %c0_8 = arith.constant 0 : index
    %6 = vector.load %arg5[%c0_7, %c0_8] : memref<256x128xf32, #tpu.memory_space<vmem>>, vector<256x128xf32>
    %c0_9 = arith.constant 0 : index
    %c16 = arith.constant 16 : index
    %c0_10 = arith.constant 0 : index
    %7 = vector.load %arg1[%c0_9, %c16, %c0_10] : memref<1x288x12xbf16, #tpu.memory_space<vmem>>, vector<1x256x12xbf16>
    %8 = vector.shape_cast %7 : vector<1x256x12xbf16> to vector<256x12xbf16>
    %c1 = arith.constant 1 : index
    %c0_11 = arith.constant 0 : index
    %c0_12 = arith.constant 0 : index
    %9 = vector.load %arg2[%c1, %c0_11, %c0_12] : memref<3x12x128xbf16, #tpu.memory_space<vmem>>, vector<1x12x128xbf16>
    %10 = vector.shape_cast %9 : vector<1x12x128xbf16> to vector<12x128xbf16>
    %cst_13 = arith.constant dense<0.000000e+00> : vector<256x128xf32>
    %11 = tpu.matmul %8, %10, %cst_13 {dimension_numbers = #tpu.dot_dimension_numbers<[1], [0], [0], [1], [0, 0, 1, 1], [], []>} : vector<256x12xbf16>, vector<12x128xbf16>, vector<256x128xf32> -> vector<256x128xf32>
    %12 = arith.addf %6, %11 : vector<256x128xf32>
    %c0_14 = arith.constant 0 : index
    %c0_15 = arith.constant 0 : index
    %13 = vector.load %arg5[%c0_14, %c0_15] : memref<256x128xf32, #tpu.memory_space<vmem>>, vector<256x128xf32>
    tpu.vector_store %arg5[%c0_14, %c0_15], %12 {strides = array<i32>} : memref<256x128xf32, #tpu.memory_space<vmem>>, vector<256x128xf32>,
    %c0_16 = arith.constant 0 : index
    %c0_17 = arith.constant 0 : index
    %14 = vector.load %arg5[%c0_16, %c0_17] : memref<256x128xf32, #tpu.memory_space<vmem>>, vector<256x128xf32>
    %c0_18 = arith.constant 0 : index
    %c32 = arith.constant 32 : index
    %c0_19 = arith.constant 0 : index
    %15 = vector.load %arg1[%c0_18, %c32, %c0_19] : memref<1x288x12xbf16, #tpu.memory_space<vmem>>, vector<1x256x12xbf16>
    %16 = vector.shape_cast %15 : vector<1x256x12xbf16> to vector<256x12xbf16>
    %c2 = arith.constant 2 : index
    %c0_20 = arith.constant 0 : index
    %c0_21 = arith.constant 0 : index
    %17 = vector.load %arg2[%c2, %c0_20, %c0_21] : memref<3x12x128xbf16, #tpu.memory_space<vmem>>, vector<1x12x128xbf16>
    %18 = vector.shape_cast %17 : vector<1x12x128xbf16> to vector<12x128xbf16>
    %cst_22 = arith.constant dense<0.000000e+00> : vector<256x128xf32>
    %19 = tpu.matmul %16, %18, %cst_22 {dimension_numbers = #tpu.dot_dimension_numbers<[1], [0], [0], [1], [0, 0, 1, 1], [], []>} : vector<256x12xbf16>, vector<12x128xbf16>, vector<256x128xf32> -> vector<256x128xf32>
    %20 = arith.addf %14, %19 : vector<256x128xf32>
    %c0_23 = arith.constant 0 : index
    %c0_24 = arith.constant 0 : index
    %21 = vector.load %arg5[%c0_23, %c0_24] : memref<256x128xf32, #tpu.memory_space<vmem>>, vector<256x128xf32>
    tpu.vector_store %arg5[%c0_23, %c0_24], %20 {strides = array<i32>} : memref<256x128xf32, #tpu.memory_space<vmem>>, vector<256x128xf32>,
    %c0_25 = arith.constant 0 : index
    %c0_26 = arith.constant 0 : index
    %22 = vector.load %arg5[%c0_25, %c0_26] : memref<256x128xf32, #tpu.memory_space<vmem>>, vector<256x128xf32>
    %c0_27 = arith.constant 0 : index
    %c0_28 = arith.constant 0 : index
    %c0_29 = arith.constant 0 : index
    %23 = vector.load %arg3[%c0_27, %c0_28, %c0_29] : memref<1x256x128xf32, #tpu.memory_space<vmem>>, vector<1x256x128xf32>
    %24 = vector.shape_cast %23 : vector<1x256x128xf32> to vector<256x128xf32>
    %25 = vector.shape_cast %22 : vector<256x128xf32> to vector<1x256x128xf32>
    tpu.vector_store %arg3[%c0_27, %c0_28, %c0_29], %25 {strides = array<i32>} : memref<1x256x128xf32, #tpu.memory_space<vmem>>, vector<1x256x128xf32>,
    %cst_30 = arith.constant dense<0.000000e+00> : vector<128xf32>
    %26 = vector.multi_reduction <add>, %22, %cst_30 [0] : vector<256x128xf32> to vector<128xf32>
    %27 = vector.shape_cast %26 : vector<128xf32> to vector<1x128xf32>
    %28 = arith.mulf %22, %22 : vector<256x128xf32>
    %cst_31 = arith.constant dense<0.000000e+00> : vector<128xf32>
    %29 = vector.multi_reduction <add>, %28, %cst_31 [0] : vector<256x128xf32> to vector<128xf32>
    %30 = vector.shape_cast %29 : vector<128xf32> to vector<1x128xf32>
    %31 = tpu.concatenate %27, %30 in 0 : vector<1x128xf32>, vector<1x128xf32> -> vector<2x128xf32>
    %c0_32 = arith.constant 0 : index
    %c0_33 = arith.constant 0 : index
    %c0_34 = arith.constant 0 : index
    %32 = vector.load %arg4[%c0_32, %c0_33, %c0_34] : memref<1x2x128xf32, #tpu.memory_space<vmem>>, vector<1x2x128xf32>
    %33 = vector.shape_cast %32 : vector<1x2x128xf32> to vector<2x128xf32>
    %34 = vector.shape_cast %31 : vector<2x128xf32> to vector<1x2x128xf32>
    tpu.vector_store %arg4[%c0_32, %c0_33, %c0_34], %34 {strides = array<i32>} : memref<1x2x128xf32, #tpu.memory_space<vmem>>, vector<1x2x128xf32>,
    return
  }
  func.func @transform_0(%arg0: i32) -> (i32, i32, i32) {
    %c0_i32 = arith.constant 0 : i32
    %c0_i32_0 = arith.constant 0 : i32
    %c0_i32_1 = arith.constant 0 : i32
    return %arg0, %c0_i32, %c0_i32_0 : i32, i32, i32
  }
  func.func @transform_1(%arg0: i32) -> (i32, i32, i32) {
    %c0_i32 = arith.constant 0 : i32
    %c0_i32_0 = arith.constant 0 : i32
    %c0_i32_1 = arith.constant 0 : i32
    %c0_i32_2 = arith.constant 0 : i32
    return %c0_i32, %c0_i32_0, %c0_i32_1 : i32, i32, i32
  }
  func.func @transform_2(%arg0: i32) -> (i32, i32, i32) {
    %c0_i32 = arith.constant 0 : i32
    %c0_i32_0 = arith.constant 0 : i32
    %c0_i32_1 = arith.constant 0 : i32
    return %arg0, %c0_i32, %c0_i32_0 : i32, i32, i32
  }
  func.func @transform_3(%arg0: i32) -> (i32, i32, i32) {
    %c0_i32 = arith.constant 0 : i32
    %c0_i32_0 = arith.constant 0 : i32
    %c0_i32_1 = arith.constant 0 : i32
    return %arg0, %c0_i32, %c0_i32_0 : i32, i32, i32
  }
}

module attributes {stable_mosaic.version = 11 : i64} {
  func.func @_affine_relu_kernel(%arg0: i32, %arg1: memref<1x256x128xf32, #tpu.memory_space<vmem>>, %arg2: memref<1x128xf32, #tpu.memory_space<vmem>>, %arg3: memref<1x128xf32, #tpu.memory_space<vmem>>, %arg4: memref<1x256x128xbf16, #tpu.memory_space<vmem>>) attributes {dimension_semantics = [#tpu.dimension_semantics<parallel>], iteration_bounds = array<i64: 2>, scalar_prefetch = 0 : i64, scratch_operands = 0 : i64, tpu.core_type = #tpu.core_type<tc>, window_params = [{transform_indices = @transform_0, window_bounds = array<i64: 1, 256, 128>}, {pipeline_mode = #tpu.pipeline_mode<synchronous>, transform_indices = @transform_1, window_bounds = array<i64: 1, 128>}, {pipeline_mode = #tpu.pipeline_mode<synchronous>, transform_indices = @transform_2, window_bounds = array<i64: 1, 128>}, {transform_indices = @transform_3, window_bounds = array<i64: 1, 256, 128>}]} {
    %c0 = arith.constant 0 : index
    %c0_0 = arith.constant 0 : index
    %c0_1 = arith.constant 0 : index
    %0 = vector.load %arg1[%c0, %c0_0, %c0_1] : memref<1x256x128xf32, #tpu.memory_space<vmem>>, vector<1x256x128xf32>
    %1 = vector.shape_cast %0 : vector<1x256x128xf32> to vector<256x128xf32>
    %c0_2 = arith.constant 0 : index
    %c0_3 = arith.constant 0 : index
    %2 = vector.load %arg2[%c0_2, %c0_3] : memref<1x128xf32, #tpu.memory_space<vmem>>, vector<1x128xf32>
    %3 = vector.broadcast %2 : vector<1x128xf32> to vector<256x128xf32>
    %4 = arith.mulf %1, %3 : vector<256x128xf32>
    %c0_4 = arith.constant 0 : index
    %c0_5 = arith.constant 0 : index
    %5 = vector.load %arg3[%c0_4, %c0_5] : memref<1x128xf32, #tpu.memory_space<vmem>>, vector<1x128xf32>
    %6 = vector.broadcast %5 : vector<1x128xf32> to vector<256x128xf32>
    %7 = arith.addf %4, %6 : vector<256x128xf32>
    %cst = arith.constant 0.000000e+00 : f32
    %8 = vector.broadcast %cst : f32 to vector<256x128xf32>
    %9 = arith.maximumf %7, %8 : vector<256x128xf32>
    %10 = arith.truncf %9 : vector<256x128xf32> to vector<256x128xbf16>
    %c0_6 = arith.constant 0 : index
    %c0_7 = arith.constant 0 : index
    %c0_8 = arith.constant 0 : index
    %11 = vector.load %arg4[%c0_6, %c0_7, %c0_8] : memref<1x256x128xbf16, #tpu.memory_space<vmem>>, vector<1x256x128xbf16>
    %12 = vector.shape_cast %11 : vector<1x256x128xbf16> to vector<256x128xbf16>
    %13 = vector.shape_cast %10 : vector<256x128xbf16> to vector<1x256x128xbf16>
    tpu.vector_store %arg4[%c0_6, %c0_7, %c0_8], %13 {strides = array<i32>} : memref<1x256x128xbf16, #tpu.memory_space<vmem>>, vector<1x256x128xbf16>,
    return
  }
  func.func @transform_0(%arg0: i32) -> (i32, i32, i32) {
    %c0_i32 = arith.constant 0 : i32
    %c0_i32_0 = arith.constant 0 : i32
    %c0_i32_1 = arith.constant 0 : i32
    return %arg0, %c0_i32, %c0_i32_0 : i32, i32, i32
  }
  func.func @transform_1(%arg0: i32) -> (i32, i32) {
    %c0_i32 = arith.constant 0 : i32
    %c0_i32_0 = arith.constant 0 : i32
    %c0_i32_1 = arith.constant 0 : i32
    return %c0_i32, %c0_i32_0 : i32, i32
  }
  func.func @transform_2(%arg0: i32) -> (i32, i32) {
    %c0_i32 = arith.constant 0 : i32
    %c0_i32_0 = arith.constant 0 : i32
    %c0_i32_1 = arith.constant 0 : i32
    return %c0_i32, %c0_i32_0 : i32, i32
  }
  func.func @transform_3(%arg0: i32) -> (i32, i32, i32) {
    %c0_i32 = arith.constant 0 : i32
    %c0_i32_0 = arith.constant 0 : i32
    %c0_i32_1 = arith.constant 0 : i32
    return %arg0, %c0_i32, %c0_i32_0 : i32, i32, i32
  }
}

module attributes {stable_mosaic.version = 11 : i64} {
  func.func @_conv_stats_kernel(%arg0: i32, %arg1: memref<1x288x384xbf16, #tpu.memory_space<vmem>>, %arg2: memref<3x384x128xbf16, #tpu.memory_space<vmem>>, %arg3: memref<1x256x128xf32, #tpu.memory_space<vmem>>, %arg4: memref<1x2x128xf32, #tpu.memory_space<vmem>>, %arg5: memref<256x128xf32, #tpu.memory_space<vmem>>) attributes {dimension_semantics = [#tpu.dimension_semantics<parallel>], iteration_bounds = array<i64: 2>, scalar_prefetch = 0 : i64, scratch_operands = 1 : i64, tpu.core_type = #tpu.core_type<tc>, window_params = [{transform_indices = @transform_0, window_bounds = array<i64: 1, 288, 384>}, {pipeline_mode = #tpu.pipeline_mode<synchronous>, transform_indices = @transform_1, window_bounds = array<i64: 3, 384, 128>}, {transform_indices = @transform_2, window_bounds = array<i64: 1, 256, 128>}, {transform_indices = @transform_3, window_bounds = array<i64: 1, 2, 128>}]} {
    %c0 = arith.constant 0 : index
    %c0_0 = arith.constant 0 : index
    %c0_1 = arith.constant 0 : index
    %0 = vector.load %arg1[%c0, %c0_0, %c0_1] : memref<1x288x384xbf16, #tpu.memory_space<vmem>>, vector<1x256x384xbf16>
    %1 = vector.shape_cast %0 : vector<1x256x384xbf16> to vector<256x384xbf16>
    %c0_2 = arith.constant 0 : index
    %c0_3 = arith.constant 0 : index
    %c0_4 = arith.constant 0 : index
    %2 = vector.load %arg2[%c0_2, %c0_3, %c0_4] : memref<3x384x128xbf16, #tpu.memory_space<vmem>>, vector<1x384x128xbf16>
    %3 = vector.shape_cast %2 : vector<1x384x128xbf16> to vector<384x128xbf16>
    %cst = arith.constant dense<0.000000e+00> : vector<256x128xf32>
    %4 = tpu.matmul %1, %3, %cst {dimension_numbers = #tpu.dot_dimension_numbers<[1], [0], [0], [1], [0, 0, 1, 1], [], []>} : vector<256x384xbf16>, vector<384x128xbf16>, vector<256x128xf32> -> vector<256x128xf32>
    %c0_5 = arith.constant 0 : index
    %c0_6 = arith.constant 0 : index
    %5 = vector.load %arg5[%c0_5, %c0_6] : memref<256x128xf32, #tpu.memory_space<vmem>>, vector<256x128xf32>
    tpu.vector_store %arg5[%c0_5, %c0_6], %4 {strides = array<i32>} : memref<256x128xf32, #tpu.memory_space<vmem>>, vector<256x128xf32>,
    %c0_7 = arith.constant 0 : index
    %c0_8 = arith.constant 0 : index
    %6 = vector.load %arg5[%c0_7, %c0_8] : memref<256x128xf32, #tpu.memory_space<vmem>>, vector<256x128xf32>
    %c0_9 = arith.constant 0 : index
    %c16 = arith.constant 16 : index
    %c0_10 = arith.constant 0 : index
    %7 = vector.load %arg1[%c0_9, %c16, %c0_10] : memref<1x288x384xbf16, #tpu.memory_space<vmem>>, vector<1x256x384xbf16>
    %8 = vector.shape_cast %7 : vector<1x256x384xbf16> to vector<256x384xbf16>
    %c1 = arith.constant 1 : index
    %c0_11 = arith.constant 0 : index
    %c0_12 = arith.constant 0 : index
    %9 = vector.load %arg2[%c1, %c0_11, %c0_12] : memref<3x384x128xbf16, #tpu.memory_space<vmem>>, vector<1x384x128xbf16>
    %10 = vector.shape_cast %9 : vector<1x384x128xbf16> to vector<384x128xbf16>
    %cst_13 = arith.constant dense<0.000000e+00> : vector<256x128xf32>
    %11 = tpu.matmul %8, %10, %cst_13 {dimension_numbers = #tpu.dot_dimension_numbers<[1], [0], [0], [1], [0, 0, 1, 1], [], []>} : vector<256x384xbf16>, vector<384x128xbf16>, vector<256x128xf32> -> vector<256x128xf32>
    %12 = arith.addf %6, %11 : vector<256x128xf32>
    %c0_14 = arith.constant 0 : index
    %c0_15 = arith.constant 0 : index
    %13 = vector.load %arg5[%c0_14, %c0_15] : memref<256x128xf32, #tpu.memory_space<vmem>>, vector<256x128xf32>
    tpu.vector_store %arg5[%c0_14, %c0_15], %12 {strides = array<i32>} : memref<256x128xf32, #tpu.memory_space<vmem>>, vector<256x128xf32>,
    %c0_16 = arith.constant 0 : index
    %c0_17 = arith.constant 0 : index
    %14 = vector.load %arg5[%c0_16, %c0_17] : memref<256x128xf32, #tpu.memory_space<vmem>>, vector<256x128xf32>
    %c0_18 = arith.constant 0 : index
    %c32 = arith.constant 32 : index
    %c0_19 = arith.constant 0 : index
    %15 = vector.load %arg1[%c0_18, %c32, %c0_19] : memref<1x288x384xbf16, #tpu.memory_space<vmem>>, vector<1x256x384xbf16>
    %16 = vector.shape_cast %15 : vector<1x256x384xbf16> to vector<256x384xbf16>
    %c2 = arith.constant 2 : index
    %c0_20 = arith.constant 0 : index
    %c0_21 = arith.constant 0 : index
    %17 = vector.load %arg2[%c2, %c0_20, %c0_21] : memref<3x384x128xbf16, #tpu.memory_space<vmem>>, vector<1x384x128xbf16>
    %18 = vector.shape_cast %17 : vector<1x384x128xbf16> to vector<384x128xbf16>
    %cst_22 = arith.constant dense<0.000000e+00> : vector<256x128xf32>
    %19 = tpu.matmul %16, %18, %cst_22 {dimension_numbers = #tpu.dot_dimension_numbers<[1], [0], [0], [1], [0, 0, 1, 1], [], []>} : vector<256x384xbf16>, vector<384x128xbf16>, vector<256x128xf32> -> vector<256x128xf32>
    %20 = arith.addf %14, %19 : vector<256x128xf32>
    %c0_23 = arith.constant 0 : index
    %c0_24 = arith.constant 0 : index
    %21 = vector.load %arg5[%c0_23, %c0_24] : memref<256x128xf32, #tpu.memory_space<vmem>>, vector<256x128xf32>
    tpu.vector_store %arg5[%c0_23, %c0_24], %20 {strides = array<i32>} : memref<256x128xf32, #tpu.memory_space<vmem>>, vector<256x128xf32>,
    %c0_25 = arith.constant 0 : index
    %c0_26 = arith.constant 0 : index
    %22 = vector.load %arg5[%c0_25, %c0_26] : memref<256x128xf32, #tpu.memory_space<vmem>>, vector<256x128xf32>
    %c0_27 = arith.constant 0 : index
    %c0_28 = arith.constant 0 : index
    %c0_29 = arith.constant 0 : index
    %23 = vector.load %arg3[%c0_27, %c0_28, %c0_29] : memref<1x256x128xf32, #tpu.memory_space<vmem>>, vector<1x256x128xf32>
    %24 = vector.shape_cast %23 : vector<1x256x128xf32> to vector<256x128xf32>
    %25 = vector.shape_cast %22 : vector<256x128xf32> to vector<1x256x128xf32>
    tpu.vector_store %arg3[%c0_27, %c0_28, %c0_29], %25 {strides = array<i32>} : memref<1x256x128xf32, #tpu.memory_space<vmem>>, vector<1x256x128xf32>,
    %cst_30 = arith.constant dense<0.000000e+00> : vector<128xf32>
    %26 = vector.multi_reduction <add>, %22, %cst_30 [0] : vector<256x128xf32> to vector<128xf32>
    %27 = vector.shape_cast %26 : vector<128xf32> to vector<1x128xf32>
    %28 = arith.mulf %22, %22 : vector<256x128xf32>
    %cst_31 = arith.constant dense<0.000000e+00> : vector<128xf32>
    %29 = vector.multi_reduction <add>, %28, %cst_31 [0] : vector<256x128xf32> to vector<128xf32>
    %30 = vector.shape_cast %29 : vector<128xf32> to vector<1x128xf32>
    %31 = tpu.concatenate %27, %30 in 0 : vector<1x128xf32>, vector<1x128xf32> -> vector<2x128xf32>
    %c0_32 = arith.constant 0 : index
    %c0_33 = arith.constant 0 : index
    %c0_34 = arith.constant 0 : index
    %32 = vector.load %arg4[%c0_32, %c0_33, %c0_34] : memref<1x2x128xf32, #tpu.memory_space<vmem>>, vector<1x2x128xf32>
    %33 = vector.shape_cast %32 : vector<1x2x128xf32> to vector<2x128xf32>
    %34 = vector.shape_cast %31 : vector<2x128xf32> to vector<1x2x128xf32>
    tpu.vector_store %arg4[%c0_32, %c0_33, %c0_34], %34 {strides = array<i32>} : memref<1x2x128xf32, #tpu.memory_space<vmem>>, vector<1x2x128xf32>,
    return
  }
  func.func @transform_0(%arg0: i32) -> (i32, i32, i32) {
    %c0_i32 = arith.constant 0 : i32
    %c0_i32_0 = arith.constant 0 : i32
    %c0_i32_1 = arith.constant 0 : i32
    return %arg0, %c0_i32, %c0_i32_0 : i32, i32, i32
  }
  func.func @transform_1(%arg0: i32) -> (i32, i32, i32) {
    %c0_i32 = arith.constant 0 : i32
    %c0_i32_0 = arith.constant 0 : i32
    %c0_i32_1 = arith.constant 0 : i32
    %c0_i32_2 = arith.constant 0 : i32
    return %c0_i32, %c0_i32_0, %c0_i32_1 : i32, i32, i32
  }
  func.func @transform_2(%arg0: i32) -> (i32, i32, i32) {
    %c0_i32 = arith.constant 0 : i32
    %c0_i32_0 = arith.constant 0 : i32
    %c0_i32_1 = arith.constant 0 : i32
    return %arg0, %c0_i32, %c0_i32_0 : i32, i32, i32
  }
  func.func @transform_3(%arg0: i32) -> (i32, i32, i32) {
    %c0_i32 = arith.constant 0 : i32
    %c0_i32_0 = arith.constant 0 : i32
    %c0_i32_1 = arith.constant 0 : i32
    return %arg0, %c0_i32, %c0_i32_0 : i32, i32, i32
  }
}

module attributes {stable_mosaic.version = 11 : i64} {
  func.func @_conv_stats_kernel(%arg0: i32, %arg1: memref<1x256x4xbf16, #tpu.memory_space<vmem>>, %arg2: memref<1x4x128xbf16, #tpu.memory_space<vmem>>, %arg3: memref<1x256x128xf32, #tpu.memory_space<vmem>>, %arg4: memref<1x2x128xf32, #tpu.memory_space<vmem>>, %arg5: memref<256x128xf32, #tpu.memory_space<vmem>>) attributes {dimension_semantics = [#tpu.dimension_semantics<parallel>], iteration_bounds = array<i64: 2>, scalar_prefetch = 0 : i64, scratch_operands = 1 : i64, tpu.core_type = #tpu.core_type<tc>, window_params = [{transform_indices = @transform_0, window_bounds = array<i64: 1, 256, 4>}, {pipeline_mode = #tpu.pipeline_mode<synchronous>, transform_indices = @transform_1, window_bounds = array<i64: 1, 4, 128>}, {transform_indices = @transform_2, window_bounds = array<i64: 1, 256, 128>}, {transform_indices = @transform_3, window_bounds = array<i64: 1, 2, 128>}]} {
    %c0 = arith.constant 0 : index
    %c0_0 = arith.constant 0 : index
    %c0_1 = arith.constant 0 : index
    %0 = vector.load %arg1[%c0, %c0_0, %c0_1] : memref<1x256x4xbf16, #tpu.memory_space<vmem>>, vector<1x256x4xbf16>
    %1 = vector.shape_cast %0 : vector<1x256x4xbf16> to vector<256x4xbf16>
    %c0_2 = arith.constant 0 : index
    %c0_3 = arith.constant 0 : index
    %c0_4 = arith.constant 0 : index
    %2 = vector.load %arg2[%c0_2, %c0_3, %c0_4] : memref<1x4x128xbf16, #tpu.memory_space<vmem>>, vector<1x4x128xbf16>
    %3 = vector.shape_cast %2 : vector<1x4x128xbf16> to vector<4x128xbf16>
    %cst = arith.constant dense<0.000000e+00> : vector<256x128xf32>
    %4 = tpu.matmul %1, %3, %cst {dimension_numbers = #tpu.dot_dimension_numbers<[1], [0], [0], [1], [0, 0, 1, 1], [], []>} : vector<256x4xbf16>, vector<4x128xbf16>, vector<256x128xf32> -> vector<256x128xf32>
    %c0_5 = arith.constant 0 : index
    %c0_6 = arith.constant 0 : index
    %5 = vector.load %arg5[%c0_5, %c0_6] : memref<256x128xf32, #tpu.memory_space<vmem>>, vector<256x128xf32>
    tpu.vector_store %arg5[%c0_5, %c0_6], %4 {strides = array<i32>} : memref<256x128xf32, #tpu.memory_space<vmem>>, vector<256x128xf32>,
    %c0_7 = arith.constant 0 : index
    %c0_8 = arith.constant 0 : index
    %6 = vector.load %arg5[%c0_7, %c0_8] : memref<256x128xf32, #tpu.memory_space<vmem>>, vector<256x128xf32>
    %c0_9 = arith.constant 0 : index
    %c0_10 = arith.constant 0 : index
    %c0_11 = arith.constant 0 : index
    %7 = vector.load %arg3[%c0_9, %c0_10, %c0_11] : memref<1x256x128xf32, #tpu.memory_space<vmem>>, vector<1x256x128xf32>
    %8 = vector.shape_cast %7 : vector<1x256x128xf32> to vector<256x128xf32>
    %9 = vector.shape_cast %6 : vector<256x128xf32> to vector<1x256x128xf32>
    tpu.vector_store %arg3[%c0_9, %c0_10, %c0_11], %9 {strides = array<i32>} : memref<1x256x128xf32, #tpu.memory_space<vmem>>, vector<1x256x128xf32>,
    %cst_12 = arith.constant dense<0.000000e+00> : vector<128xf32>
    %10 = vector.multi_reduction <add>, %6, %cst_12 [0] : vector<256x128xf32> to vector<128xf32>
    %11 = vector.shape_cast %10 : vector<128xf32> to vector<1x128xf32>
    %12 = arith.mulf %6, %6 : vector<256x128xf32>
    %cst_13 = arith.constant dense<0.000000e+00> : vector<128xf32>
    %13 = vector.multi_reduction <add>, %12, %cst_13 [0] : vector<256x128xf32> to vector<128xf32>
    %14 = vector.shape_cast %13 : vector<128xf32> to vector<1x128xf32>
    %15 = tpu.concatenate %11, %14 in 0 : vector<1x128xf32>, vector<1x128xf32> -> vector<2x128xf32>
    %c0_14 = arith.constant 0 : index
    %c0_15 = arith.constant 0 : index
    %c0_16 = arith.constant 0 : index
    %16 = vector.load %arg4[%c0_14, %c0_15, %c0_16] : memref<1x2x128xf32, #tpu.memory_space<vmem>>, vector<1x2x128xf32>
    %17 = vector.shape_cast %16 : vector<1x2x128xf32> to vector<2x128xf32>
    %18 = vector.shape_cast %15 : vector<2x128xf32> to vector<1x2x128xf32>
    tpu.vector_store %arg4[%c0_14, %c0_15, %c0_16], %18 {strides = array<i32>} : memref<1x2x128xf32, #tpu.memory_space<vmem>>, vector<1x2x128xf32>,
    return
  }
  func.func @transform_0(%arg0: i32) -> (i32, i32, i32) {
    %c0_i32 = arith.constant 0 : i32
    %c0_i32_0 = arith.constant 0 : i32
    %c0_i32_1 = arith.constant 0 : i32
    return %arg0, %c0_i32, %c0_i32_0 : i32, i32, i32
  }
  func.func @transform_1(%arg0: i32) -> (i32, i32, i32) {
    %c0_i32 = arith.constant 0 : i32
    %c0_i32_0 = arith.constant 0 : i32
    %c0_i32_1 = arith.constant 0 : i32
    %c0_i32_2 = arith.constant 0 : i32
    return %c0_i32, %c0_i32_0, %c0_i32_1 : i32, i32, i32
  }
  func.func @transform_2(%arg0: i32) -> (i32, i32, i32) {
    %c0_i32 = arith.constant 0 : i32
    %c0_i32_0 = arith.constant 0 : i32
    %c0_i32_1 = arith.constant 0 : i32
    return %arg0, %c0_i32, %c0_i32_0 : i32, i32, i32
  }
  func.func @transform_3(%arg0: i32) -> (i32, i32, i32) {
    %c0_i32 = arith.constant 0 : i32
    %c0_i32_0 = arith.constant 0 : i32
    %c0_i32_1 = arith.constant 0 : i32
    return %arg0, %c0_i32, %c0_i32_0 : i32, i32, i32
  }
}

module attributes {stable_mosaic.version = 11 : i64} {
  func.func @_residual_fuse_kernel(%arg0: i32, %arg1: memref<1x256x128xf32, #tpu.memory_space<vmem>>, %arg2: memref<1x256x128xf32, #tpu.memory_space<vmem>>, %arg3: memref<1x128xf32, #tpu.memory_space<vmem>>, %arg4: memref<1x128xf32, #tpu.memory_space<vmem>>, %arg5: memref<1x128xf32, #tpu.memory_space<vmem>>, %arg6: memref<1x256x128xf32, #tpu.memory_space<vmem>>) attributes {dimension_semantics = [#tpu.dimension_semantics<parallel>], iteration_bounds = array<i64: 2>, scalar_prefetch = 0 : i64, scratch_operands = 0 : i64, tpu.core_type = #tpu.core_type<tc>, window_params = [{transform_indices = @transform_0, window_bounds = array<i64: 1, 256, 128>}, {transform_indices = @transform_1, window_bounds = array<i64: 1, 256, 128>}, {pipeline_mode = #tpu.pipeline_mode<synchronous>, transform_indices = @transform_2, window_bounds = array<i64: 1, 128>}, {pipeline_mode = #tpu.pipeline_mode<synchronous>, transform_indices = @transform_3, window_bounds = array<i64: 1, 128>}, {pipeline_mode = #tpu.pipeline_mode<synchronous>, transform_indices = @transform_4, window_bounds = array<i64: 1, 128>}, {transform_indices = @transform_5, window_bounds = array<i64: 1, 256, 128>}]} {
    %c0 = arith.constant 0 : index
    %c0_0 = arith.constant 0 : index
    %c0_1 = arith.constant 0 : index
    %0 = vector.load %arg1[%c0, %c0_0, %c0_1] : memref<1x256x128xf32, #tpu.memory_space<vmem>>, vector<1x256x128xf32>
    %1 = vector.shape_cast %0 : vector<1x256x128xf32> to vector<256x128xf32>
    %c0_2 = arith.constant 0 : index
    %c0_3 = arith.constant 0 : index
    %2 = vector.load %arg3[%c0_2, %c0_3] : memref<1x128xf32, #tpu.memory_space<vmem>>, vector<1x128xf32>
    %3 = vector.broadcast %2 : vector<1x128xf32> to vector<256x128xf32>
    %4 = arith.mulf %1, %3 : vector<256x128xf32>
    %c0_4 = arith.constant 0 : index
    %c0_5 = arith.constant 0 : index
    %c0_6 = arith.constant 0 : index
    %5 = vector.load %arg2[%c0_4, %c0_5, %c0_6] : memref<1x256x128xf32, #tpu.memory_space<vmem>>, vector<1x256x128xf32>
    %6 = vector.shape_cast %5 : vector<1x256x128xf32> to vector<256x128xf32>
    %c0_7 = arith.constant 0 : index
    %c0_8 = arith.constant 0 : index
    %7 = vector.load %arg4[%c0_7, %c0_8] : memref<1x128xf32, #tpu.memory_space<vmem>>, vector<1x128xf32>
    %8 = vector.broadcast %7 : vector<1x128xf32> to vector<256x128xf32>
    %9 = arith.mulf %6, %8 : vector<256x128xf32>
    %10 = arith.addf %4, %9 : vector<256x128xf32>
    %c0_9 = arith.constant 0 : index
    %c0_10 = arith.constant 0 : index
    %11 = vector.load %arg5[%c0_9, %c0_10] : memref<1x128xf32, #tpu.memory_space<vmem>>, vector<1x128xf32>
    %12 = vector.broadcast %11 : vector<1x128xf32> to vector<256x128xf32>
    %13 = arith.addf %10, %12 : vector<256x128xf32>
    %c0_11 = arith.constant 0 : index
    %c0_12 = arith.constant 0 : index
    %c0_13 = arith.constant 0 : index
    %14 = vector.load %arg6[%c0_11, %c0_12, %c0_13] : memref<1x256x128xf32, #tpu.memory_space<vmem>>, vector<1x256x128xf32>
    %15 = vector.shape_cast %14 : vector<1x256x128xf32> to vector<256x128xf32>
    %16 = vector.shape_cast %13 : vector<256x128xf32> to vector<1x256x128xf32>
    tpu.vector_store %arg6[%c0_11, %c0_12, %c0_13], %16 {strides = array<i32>} : memref<1x256x128xf32, #tpu.memory_space<vmem>>, vector<1x256x128xf32>,
    return
  }
  func.func @transform_0(%arg0: i32) -> (i32, i32, i32) {
    %c0_i32 = arith.constant 0 : i32
    %c0_i32_0 = arith.constant 0 : i32
    %c0_i32_1 = arith.constant 0 : i32
    return %arg0, %c0_i32, %c0_i32_0 : i32, i32, i32
  }
  func.func @transform_1(%arg0: i32) -> (i32, i32, i32) {
    %c0_i32 = arith.constant 0 : i32
    %c0_i32_0 = arith.constant 0 : i32
    %c0_i32_1 = arith.constant 0 : i32
    return %arg0, %c0_i32, %c0_i32_0 : i32, i32, i32
  }
  func.func @transform_2(%arg0: i32) -> (i32, i32) {
    %c0_i32 = arith.constant 0 : i32
    %c0_i32_0 = arith.constant 0 : i32
    %c0_i32_1 = arith.constant 0 : i32
    return %c0_i32, %c0_i32_0 : i32, i32
  }
  func.func @transform_3(%arg0: i32) -> (i32, i32) {
    %c0_i32 = arith.constant 0 : i32
    %c0_i32_0 = arith.constant 0 : i32
    %c0_i32_1 = arith.constant 0 : i32
    return %c0_i32, %c0_i32_0 : i32, i32
  }
  func.func @transform_4(%arg0: i32) -> (i32, i32) {
    %c0_i32 = arith.constant 0 : i32
    %c0_i32_0 = arith.constant 0 : i32
    %c0_i32_1 = arith.constant 0 : i32
    return %c0_i32, %c0_i32_0 : i32, i32
  }
  func.func @transform_5(%arg0: i32) -> (i32, i32, i32) {
    %c0_i32 = arith.constant 0 : i32
    %c0_i32_0 = arith.constant 0 : i32
    %c0_i32_1 = arith.constant 0 : i32
    return %arg0, %c0_i32, %c0_i32_0 : i32, i32, i32
  }
}

</mosaic_0001>

<bundles_post_ra>
// kernel: basic_block_forward.7
= control target key start
LH: loop header
LB: loop body
LE: loop exit
PB: predicated region body
PF: predicated region fallthrough
CT: control target
= control target key end

     0   :  { %8 = vsyncpa [#allocation3], 0  ;;  %s1416_s0 = inlined_call_operand.hbm [shape: f32[2,256,128], index: 0, kind: input, shape index: {}]   ;;  %s1417_s1 = inlined_call_operand.hbm [shape: f32[1,128], index: 1, kind: input, shape index: {}]   ;;  %s1418_s2 = inlined_call_operand.hbm [shape: f32[1,128], index: 2, kind: input, shape index: {}]   ;;  %s1419_s3 = inlined_call_operand.hbm [shape: bf16[2,256,128], index: 3, kind: output, shape index: {}]  }
   0x1   :  { %10 = vsyncpa [#allocation3 + $0x1], 0 }
   0x2   :  { %11 = vsyncpa [#allocation6], 0 }
   0x3   :  { %12 = vsyncpa [#allocation4], 0 }
   0x4   :  { %14 = vsyncpa [#allocation4 + $0x1], 0  ;;  %s1060_s12 = smov 0   ;;  %s1062_s13 = smov 0  }
   0x5   :  { %s1064_s14 = smov 0   ;;  %s1066_s15 = smov 0  }
   0x6 LB: > { %s1081_s16 = sadd.s32 4294967295, %s1030_s15   ;;  %s622_s17 = sadd.s32 4294967294, %s1030_s15   ;;  %s1030_s15 = sphi %s1066_s15, %s1444_s15   ;;  %s1026_s14 = sphi %s1064_s14, %s1443_s14   ;;  %s1022_s13 = sphi %s1062_s13, %s1442_s13   ;;  %s1018_s12 = sphi %s1060_s12, %s1441_s12  }
   0x7   : > { %s1085_s18 = sadd.s32 1, %s1030_s15   ;;  %s27_s19 = sadd.s32 1, %s1026_s14 }
   0x8   : > { %s24_s20 = ssub.s32 %s1030_s15, %s1085_s18  ;;  %p34_p0 = scmp.ne.s32.totalorder %s1026_s14, %s1022_s13 }
   0x9   : > { %p25_p1 = scmp.eq.s32.totalorder %s24_s20, 0  ;;  %p35_p2 = scmp.eq.s32.totalorder %s1030_s15, 0 }
   0xa   : > { %p40_p3 = scmp.ne.s32.totalorder %s1022_s13, %s1018_s12  ;;  %p1420_p4 = scmp.eq.s32.totalorder %s1081_s16, 0 }
   0xb   : > { %s1097_s21 = scalar_select %p25_p1, %s1026_s14, %s27_s19  }
   0xc   : > { %p1099_p5 = por %p35_p2, %p34_p0  ;;  %p1105_p6 = por %p1420_p4, %p40_p3 }
   0xd   : > { %p106_p7 = scmp.eq.s32.totalorder %s1081_s16, 1  ;;  %p112_p8 = scmp.eq.s32.totalorder %s622_s17, 1 }
   0xe   : > { %s1426_s23 = scalar_select %p1105_p6, 1, 0 }
   0xf   : > { %p623_p9 = scmp.ge.s32.totalorder %s1030_s15, 1  ;;  %p119_p10 = scmp.lt.s32.totalorder %s1030_s15, 3 }
  0x10   : > { %p1112_p11 = por %p106_p7, %p34_p0  ;;  %p1116_p12 = por %p112_p8, %p40_p3 }
  0x11   : > { %p1120_p13 = pnand %p623_p9, %p119_p10  ;;  %s1032_s27 = smov [#allocation5]  }
  0x12   : > { %s1427_s24 = scalar_select %p1112_p11, 1, 0 }
  0x13   : > { %s1428_s25 = scalar_select %p1116_p12, 1, 0 }
  0x14   : > { %s1429_s26 = scalar_select %p1120_p13, 1, 0 }
  0x15   : > { %p815_p2 = pneg %p1120_p13  ;;  %s132_s28 = sshll.u32 %s1032_s27, 4  ;;  %s133_s28 = int_to_ptr.vmem [resolvable:$true] %s132_s28 }
  0x16   : > { %p832_p4 = scmp.lt.s32.totalorder %s1030_s15, 2  ;;  %p1430_p0 = scmp.eq.s32.totalorder %s1081_s16, 0 }
  0x17   : > { %s1033_s4 = smov [#allocation7]   ;;  %s874_s8 = scalar_lea.hbm %s1417_s1, 16 }
  0x18   : > { %p1130_p7 = pnand %p815_p2, %p1430_p0  ;;  %p1136_p3 = pnand %p832_p4, %p1099_p5 }
  0x19   : > { %s143_s5 = sshll.u32 %s1033_s4, 4  ;;  %p875_p8 = scmp.ne.s32.totalorder %s1417_s1, %s874_s8  ;;  %s1140_s5 = int_to_ptr.vmem [resolvable:$true] %s143_s5 }
  0x1a   : > { %s1432_s30 = scalar_select %p1136_p3, 1, 0 }
  0x1b   : > { %p876_p9 = pneg %p1130_p7  ;;  %p881_p10 = scmp.lt.u32.totalorder %s874_s8, %s1417_s1 }
  0x1d   : > { %p877_p4 = pnand %p876_p9, %p875_p8 }
  0x1f   : > { %p878_p5 = pneg %p877_p4 }
  0x21   : > { %p883_p2 = pnand %p881_p10, %p878_p5 }
  0x23   : > { %886 = shalt.err (!%p883_p2)
}
  0x24   : > { %s887_s19 = scalar_lea.vmem %s133_s28, 16  ;;  %s894_s20 = scalar_lea.vmem %s133_s28, 32 }
  0x25   : > { %p888_p0 = scmp.ne.s32.totalorder %s133_s28, %s887_s19  ;;  %p895_p11 = scmp.lt.s32.totalorder %s133_s28, %s133_s28 }
  0x26   : > { %p896_p6 = scmp.lt.s32.totalorder %s894_s20, %s887_s19 }
  0x27   : > { %p890_p1 = pnand %p888_p0, %p876_p9 }
  0x28   : > { %p897_p13 = por %p896_p6, %p895_p11 }
  0x29   : > { %p891_p12 = pneg %p890_p1 }
  0x2b   : > { %p898_p3 = pnand %p897_p13, %p891_p12 }
  0x2d   : > { %901 = shalt.err (!%p898_p3)
}
  0x2e   : > { %818 = dma.hbm_to_vmem [thread:$0]  (!%p1130_p7), %s1417_s1, 16, %s133_s28, [#allocation6]  }
  0x2f   : > { %s154_s4 = sand.u32 1, %s1026_s14   ;;  %s902_s8 = scalar_lea.hbm %s1418_s2, 16 }
  0x30   : > { %p903_p1 = scmp.ne.s32.totalorder %s1418_s2, %s902_s8  ;;  %p909_p12 = scmp.lt.u32.totalorder %s902_s8, %s1418_s2 }
  0x32   : > { %p905_p6 = pnand %p903_p1, %p876_p9 }
  0x34   : > { %p906_p11 = pneg %p905_p6 }
  0x36   : > { %p911_p13 = pnand %p909_p12, %p906_p11 }
  0x38   : > { %914 = shalt.err (!%p911_p13)
}
  0x39   : > { %s915_s28 = scalar_lea.vmem %s1140_s5, 16  ;;  %s922_s19 = scalar_lea.vmem %s1140_s5, 32 }
  0x3a   : > { %p916_p3 = scmp.ne.s32.totalorder %s1140_s5, %s915_s28  ;;  %p923_p5 = scmp.lt.s32.totalorder %s1140_s5, %s1140_s5 }
  0x3b   : > { %p924_p10 = scmp.lt.s32.totalorder %s922_s19, %s915_s28 }
  0x3c   : > { %p918_p8 = pnand %p916_p3, %p876_p9 }
  0x3d   : > { %p925_p2 = por %p924_p10, %p923_p5 }
  0x3e   : > { %p919_p4 = pneg %p918_p8 }
  0x40   : > { %p926_p0 = pnand %p925_p2, %p919_p4 }
  0x42   : > { %929 = shalt.err (!%p926_p0)
}
  0x43   : > { %821 = dma.hbm_to_vmem [thread:$0]  (!%p1130_p7), %s1418_s2, 16, %s1140_s5, [#allocation6]  }
  0x44   : > { %s627_s27 = sshll.u32 %s154_s4, 8  ;;  %s674_s6 = sshll.u32 %s1030_s15, 12 }
  0x45   : > { %s1195_s9 = scalar_lea.hbm %s1416_s0, %s674_s6  ;;  %s158_s29 = scalar_lea.vmem [#allocation2], %s627_s27 }
  0x46   : > { %s165_s10 = sshll.u32 %s158_s29, 4  ;;  %s1199_s11 = scalar_lea.sflag [#allocation3], %s154_s4  ;;  %s1197_s10 = int_to_ptr.vmem [resolvable:$true] %s165_s10 }
  0x47   : > { %s930_s17 = scalar_lea.hbm %s1195_s9, 4096  ;;  %p1433_p7 = scmp.ne.s32.totalorder %s1432_s30, 0 }
  0x48   : > { %p931_p9 = scmp.ne.s32.totalorder %s1195_s9, %s930_s17  ;;  %s935_s19 = scalar_lea.hbm %s1416_s0, 8192 }
  0x49   : > { %p932_p1 = pneg %p1433_p7  ;;  %p936_p12 = scmp.lt.u32.totalorder %s1195_s9, %s1416_s0 }
  0x4a   : > { %p937_p13 = scmp.lt.u32.totalorder %s935_s19, %s930_s17  ;;  %p939_p8 = scmp.lt.u32.totalorder %s930_s17, %s1195_s9 }
  0x4b   : > { %p933_p6 = pnand %p932_p1, %p931_p9 }
  0x4c   : > { %p938_p3 = por %p937_p13, %p936_p12 }
  0x4d   : > { %p934_p11 = pneg %p933_p6 }
  0x4e   : > { %p940_p4 = por %p939_p8, %p938_p3 }
  0x50   : > { %p941_p5 = pnand %p940_p4, %p934_p11 }
  0x52   : > { %944 = shalt.err (!%p941_p5)
}
  0x53   : > { %s945_s4 = scalar_lea.vmem %s1197_s10, 4096  ;;  %s1034_s27 = smov [#allocation2]  }
  0x54   : > { %p946_p10 = scmp.ne.s32.totalorder %s1197_s10, %s945_s4  ;;  %s950_s6 = sshll.u32 %s1034_s27, 4  ;;  %s951_s6 = int_to_ptr.vmem [resolvable:$false] %s950_s6 }
  0x55   : > { %s952_s7 = scalar_lea.vmem %s951_s6, 8192  ;;  %p953_p9 = scmp.lt.s32.totalorder %s1197_s10, %s951_s6 }
  0x56   : > { %p948_p2 = pnand %p946_p10, %p932_p1  ;;  %p954_p6 = scmp.lt.s32.totalorder %s952_s7, %s945_s4 }
  0x58   : > { %p949_p0 = pneg %p948_p2  ;;  %p955_p12 = por %p954_p6, %p953_p9 }
  0x5a   : > { %p956_p13 = pnand %p955_p12, %p949_p0 }
  0x5c   : > { %959 = shalt.err (!%p956_p13)
}
  0x5d   : > { %s1035_s8 = smov 128   ;;  %s1036_s29 = smov 8  }
  0x5e   : > { %825 = dma.hbm_to_vmem [thread:$0]  (!%p1433_p7), %s1195_s9, 4096, %s1197_s10, %s1199_s11, %s1035_s8, %s1035_s8, %s1036_s29  }
  0x5f   : > { %p1434_p1 = scmp.ne.s32.totalorder %s1429_s26, 0 }
  0x60   : > { %s1230_s17 = sand.u32 (!%p1434_p1), 1, %s1022_s13   ;;  %p1435_p11 = scmp.ne.s32.totalorder (!%p1434_p1), %s1426_s23, 0 }
  0x61   : > { %177 = sbr.rel (%p1434_p1) target bundleno = 158 (0x9e), region = 32  ;;  %s631_s5 = sshll.u32 (!%p1434_p1), %s1230_s17, 8 }
  0x62   : > { %s180_s28 = scalar_lea.sflag (!%p1434_p1), [#allocation3], %s1230_s17  ;;  %s1234_s19 = scalar_lea.vmem (!%p1434_p1), [#allocation2], %s631_s5 }
  0x68   : > { %1005 = dma.done.wait (%p1435_p11), %s180_s28, 4096  }
  0x69   : > { %1007 = vsyncadd (%p1435_p11), %s180_s28, 4294963200  ;;  %p1436_p7 = scmp.eq.s32.totalorder %s1081_s16, 0 }
  0x6b   : > { %1009 = dma.done.wait (%p1436_p7), [#allocation6], 32   ;;  %p1437_p3 = pmov %p1436_p7 }
  0x6c   : > { %v214_v0 = vld [vmem:[%s1234_s19] sm:$0xff]  ;;  %v215_v1 = vld [vmem:[%s1234_s19 + $0x8] sm:$0xff]  ;;  %v216_v6 = vld [vmem:[%s1234_s19 + $0x10] sm:$0xff]  ;;  %s634_s23 = sshll.u32 %s1230_s17, 7  ;;  %s707_s30 = sshll.u32 %s1081_s16, 11 }
  0x6d   : > { %1011 = vsyncadd (%p1437_p3), [#allocation6], 4294967264  ;;  %v1246_v2 = vld [vmem:[#allocation5] ss:$0 sm:$0xff]  ;;  %v1250_v5 = vld [vmem:[#allocation7] ss:$0 sm:$0xff]  ;;  %s1368_s20 = scalar_lea.hbm %s1419_s3, %s707_s30 }
  0x6e   : > { %v253_v3 = vmul.f32 %v1246_v2, %v214_v0  ;;  %v254_v4 = vmul.f32 %v1246_v2, %v215_v1  ;;  %v217_v7 = vld [vmem:[%s1234_s19 + $0x18] sm:$0xff]  ;;  %v255_v8 = vmul.f32 %v1246_v2, %v216_v6  ;;  %v218_v10 = vld [vmem:[%s1234_s19 + $0x20] sm:$0xff]  ;;  %v219_v11 = vld [vmem:[%s1234_s19 + $0x28] sm:$0xff]  ;;  %s1284_s26 = scalar_lea.vmem [#allocation8], %s634_s23  ;;  %s517_s16 = scalar_lea.sflag [#allocation4], %s1230_s17 }
  0x6f   : > { %v256_v9 = vmul.f32 %v1246_v2, %v217_v7  ;;  %v220_v12 = vld [vmem:[%s1234_s19 + $0x30] sm:$0xff]  ;;  %v257_v15 = vmul.f32 %v1246_v2, %v218_v10  ;;  %v258_v16 = vmul.f32 %v1246_v2, %v219_v11  ;;  %v221_v17 = vld [vmem:[%s1234_s19 + $0x38] sm:$0xff]  ;;  %v222_v22 = vld [vmem:[%s1234_s19 + $0x40] sm:$0xff]  ;;  %s530_s9 = sshll.u32 %s1284_s26, 4  ;;  %p1438_p4 = scmp.ne.s32.totalorder %s1427_s24, 0  ;;  %s1370_s9 = int_to_ptr.vmem [resolvable:$true] %s530_s9 }
  0x70   : > { %v292_v13 = vadd.f32 %v1250_v5, %v253_v3  ;;  %v293_v14 = vadd.f32 %v1250_v5, %v254_v4  ;;  %v294_v18 = vadd.f32 %v1250_v5, %v255_v8  ;;  %v259_v20 = vmul.f32 %v1246_v2, %v220_v12  ;;  %v223_v27 = vld [vmem:[%s1234_s19 + $0x48] sm:$0xff]  ;;  %v224_v32 = vld [vmem:[%s1234_s19 + $0x50] sm:$0xff]  ;;  %v225_v33 = vld [vmem:[%s1234_s19 + $0x58] sm:$0xff]  ;;  %s960_s22 = scalar_lea.vmem %s1370_s9, 2048  ;;  %s1037_s4 = smov [#allocation8]  }
  0x71   : > { %v295_v19 = vadd.f32 %v1250_v5, %v256_v9  ;;  %v260_v21 = vmul.f32 %v1246_v2, %v221_v17  ;;  %v296_v25 = vadd.f32 %v1250_v5, %v257_v15  ;;  %v297_v26 = vadd.f32 %v1250_v5, %v258_v16  ;;  %v226_v38 = vld [vmem:[%s1234_s19 + $0x60] sm:$0xff]  ;;  %v227_v39 = vld [vmem:[%s1234_s19 + $0x68] sm:$0xff]  ;;  %v228_v44 = vld [vmem:[%s1234_s19 + $0x70] sm:$0xff]  ;;  %p961_p8 = scmp.ne.s32.totalorder %s1370_s9, %s960_s22  ;;  %s964_s27 = sshll.u32 %s1037_s4, 4  ;;  %s965_s27 = int_to_ptr.vmem [resolvable:$false] %s964_s27 }
  0x72   : > { %v324_v23 = vmax.f32 %v292_v13, 0.0  ;;  %v325_v24 = vmax.f32 %v293_v14, 0.0  ;;  %v326_v28 = vmax.f32 %v294_v18, 0.0  ;;  %v298_v30 = vadd.f32 %v1250_v5, %v259_v20  ;;  %v229_v49 = vld [vmem:[%s1234_s19 + $0x78] sm:$0xff]  ;;  %v230_v54 = vld [vmem:[%s1234_s19 + $0x80] sm:$0xff]  ;;  %v231_v63 = vld [vmem:[%s1234_s19 + $0x88] sm:$0xff]  ;;  %p967_p2 = scmp.lt.s32.totalorder %s1370_s9, %s965_s27 }
  0x73   : > { %v327_v29 = vmax.f32 %v295_v19, 0.0  ;;  %v299_v31 = vadd.f32 %v1250_v5, %v260_v21  ;;  %v328_v35 = vmax.f32 %v296_v25, 0.0  ;;  %v329_v36 = vmax.f32 %v297_v26, 0.0  ;;  %v232_v6 = vld [vmem:[%s1234_s19 + $0x90] sm:$0xff]  ;;  %v233_v7 = vld [vmem:[%s1234_s19 + $0x98] sm:$0xff]  ;;  %v234_v12 = vld [vmem:[%s1234_s19 + $0xa0] sm:$0xff]  ;;  %p962_p5 = pnand %p961_p8, %p1438_p4 }
  0x74   : > { %v711_v34 = vpack.c.bf16 %v325_v24, %v324_v23  ;;  %v261_v37 = vmul.f32 %v1246_v2, %v222_v22  ;;  %v330_v41 = vmax.f32 %v298_v30, 0.0  ;;  %v262_v43 = vmul.f32 %v1246_v2, %v223_v27  ;;  %v235_v13 = vld [vmem:[%s1234_s19 + $0xa8] sm:$0xff]  ;;  %v236_v18 = vld [vmem:[%s1234_s19 + $0xb0] sm:$0xff]  ;;  %v237_v23 = vld [vmem:[%s1234_s19 + $0xb8] sm:$0xff]  ;;  %s966_s6 = scalar_lea.vmem %s965_s27, 4096 }
  0x75   : > { %v716_v40 = vpack.c.bf16 %v327_v29, %v326_v28  ;;  %v331_v42 = vmax.f32 %v299_v31, 0.0  ;;  %v721_v45 = vpack.c.bf16 %v329_v36, %v328_v35  ;;  %v263_v47 = vmul.f32 %v1246_v2, %v224_v32  ;;  %v238_v28 = vld [vmem:[%s1234_s19 + $0xc0] sm:$0xff]  ;;  %p963_p10 = pneg %p962_p5  ;;  %p968_p0 = scmp.lt.s32.totalorder %s966_s6, %s960_s22 }
  0x76   : > { %712 = vst [vmem:[%s1284_s26] sm:$0xff] %v711_v34   ;;  %v300_v46 = vadd.f32 %v1250_v5, %v261_v37  ;;  %v264_v48 = vmul.f32 %v1246_v2, %v225_v33  ;;  %v301_v51 = vadd.f32 %v1250_v5, %v262_v43  ;;  %v265_v52 = vmul.f32 %v1246_v2, %v226_v38  ;;  %v239_v37 = vld [vmem:[%s1234_s19 + $0xc8] sm:$0xff]  ;;  %v241_v43 = vld [vmem:[%s1234_s19 + $0xd8] sm:$0xff] }
  0x77   : > { %788 = vst [vmem:[%s1284_s26 + $0x8] sm:$0xff] %v716_v40   ;;  %v726_v50 = vpack.c.bf16 %v331_v42, %v330_v41  ;;  %v266_v53 = vmul.f32 %v1246_v2, %v227_v39  ;;  %789 = vst [vmem:[%s1284_s26 + $0x10] sm:$0xff] %v721_v45   ;;  %v302_v56 = vadd.f32 %v1250_v5, %v263_v47  ;;  %v240_v42 = vld [vmem:[%s1234_s19 + $0xd0] sm:$0xff]  ;;  %p969_p9 = por %p968_p0, %p967_p2 }
  0x78   : > { %v332_v55 = vmax.f32 %v300_v46, 0.0  ;;  %v303_v57 = vadd.f32 %v1250_v5, %v264_v48  ;;  %v267_v58 = vmul.f32 %v1246_v2, %v228_v44  ;;  %v333_v59 = vmax.f32 %v301_v51, 0.0  ;;  %v242_v48 = vld [vmem:[%s1234_s19 + $0xe0] sm:$0xff] }
  0x79   : > { %790 = vst [vmem:[%s1284_s26 + $0x18] sm:$0xff] %v726_v50   ;;  %v304_v60 = vadd.f32 %v1250_v5, %v265_v52  ;;  %v305_v61 = vadd.f32 %v1250_v5, %v266_v53  ;;  %v268_v62 = vmul.f32 %v1246_v2, %v229_v49  ;;  %v334_v0 = vmax.f32 %v302_v56, 0.0  ;;  %v243_v49 = vld [vmem:[%s1234_s19 + $0xe8] sm:$0xff]  ;;  %p970_p6 = pnand %p969_p9, %p963_p10 }
  0x7a   : > { %v335_v1 = vmax.f32 %v303_v57, 0.0  ;;  %v306_v3 = vadd.f32 %v1250_v5, %v267_v58  ;;  %v269_v4 = vmul.f32 %v1246_v2, %v230_v54  ;;  %v731_v8 = vpack.c.bf16 %v333_v59, %v332_v55  ;;  %v244_v54 = vld [vmem:[%s1234_s19 + $0xf0] sm:$0xff]  ;;  %v245_v59 = vld [vmem:[%s1234_s19 + $0xf8] sm:$0xff] }
  0x7b   : > { %v336_v9 = vmax.f32 %v304_v60, 0.0  ;;  %v337_v10 = vmax.f32 %v305_v61, 0.0  ;;  %v307_v11 = vadd.f32 %v1250_v5, %v268_v62  ;;  %v270_v16 = vmul.f32 %v1246_v2, %v231_v63 }
  0x7c   : > { %v736_v14 = vpack.c.bf16 %v335_v1, %v334_v0  ;;  %v338_v15 = vmax.f32 %v306_v3, 0.0  ;;  %v308_v17 = vadd.f32 %v1250_v5, %v269_v4  ;;  %791 = vst [vmem:[%s1284_s26 + $0x20] sm:$0xff] %v731_v8   ;;  %v271_v21 = vmul.f32 %v1246_v2, %v232_v6 }
  0x7d   : > { %v741_v19 = vpack.c.bf16 %v337_v10, %v336_v9  ;;  %v339_v20 = vmax.f32 %v307_v11, 0.0  ;;  %v272_v22 = vmul.f32 %v1246_v2, %v233_v7  ;;  %v309_v24 = vadd.f32 %v1250_v5, %v270_v16 }
  0x7e   : > { %792 = vst [vmem:[%s1284_s26 + $0x28] sm:$0xff] %v736_v14   ;;  %v340_v25 = vmax.f32 %v308_v17, 0.0  ;;  %v273_v26 = vmul.f32 %v1246_v2, %v234_v12  ;;  %v274_v27 = vmul.f32 %v1246_v2, %v235_v13  ;;  %v310_v30 = vadd.f32 %v1250_v5, %v271_v21 }
  0x7f   : > { %793 = vst [vmem:[%s1284_s26 + $0x30] sm:$0xff] %v741_v19   ;;  %v746_v29 = vpack.c.bf16 %v339_v20, %v338_v15  ;;  %v311_v31 = vadd.f32 %v1250_v5, %v272_v22  ;;  %v275_v32 = vmul.f32 %v1246_v2, %v236_v18  ;;  %v341_v33 = vmax.f32 %v309_v24, 0.0 }
  0x80   : > { %v312_v34 = vadd.f32 %v1250_v5, %v273_v26  ;;  %v313_v35 = vadd.f32 %v1250_v5, %v274_v27  ;;  %v276_v36 = vmul.f32 %v1246_v2, %v237_v23  ;;  %v342_v38 = vmax.f32 %v310_v30, 0.0 }
  0x81   : > { %794 = vst [vmem:[%s1284_s26 + $0x38] sm:$0xff] %v746_v29   ;;  %v343_v39 = vmax.f32 %v311_v31, 0.0  ;;  %v314_v40 = vadd.f32 %v1250_v5, %v275_v32  ;;  %v277_v41 = vmul.f32 %v1246_v2, %v238_v28  ;;  %v751_v44 = vpack.c.bf16 %v341_v33, %v340_v25 }
  0x82   : > { %v344_v45 = vmax.f32 %v312_v34, 0.0  ;;  %v345_v46 = vmax.f32 %v313_v35, 0.0  ;;  %v315_v47 = vadd.f32 %v1250_v5, %v276_v36  ;;  %v278_v52 = vmul.f32 %v1246_v2, %v239_v37 }
  0x83   : > { %v756_v50 = vpack.c.bf16 %v343_v39, %v342_v38  ;;  %v346_v51 = vmax.f32 %v314_v40, 0.0  ;;  %v316_v53 = vadd.f32 %v1250_v5, %v277_v41  ;;  %795 = vst [vmem:[%s1284_s26 + $0x40] sm:$0xff] %v751_v44   ;;  %v279_v57 = vmul.f32 %v1246_v2, %v240_v42 }
  0x84   : > { %v761_v55 = vpack.c.bf16 %v345_v46, %v344_v45  ;;  %v347_v56 = vmax.f32 %v315_v47, 0.0  ;;  %v280_v58 = vmul.f32 %v1246_v2, %v241_v43  ;;  %v317_v60 = vadd.f32 %v1250_v5, %v278_v52 }
  0x85   : > { %796 = vst [vmem:[%s1284_s26 + $0x48] sm:$0xff] %v756_v50   ;;  %v348_v61 = vmax.f32 %v316_v53, 0.0  ;;  %v281_v62 = vmul.f32 %v1246_v2, %v242_v48  ;;  %v282_v63 = vmul.f32 %v1246_v2, %v243_v49  ;;  %v318_v1 = vadd.f32 %v1250_v5, %v279_v57 }
  0x86   : > { %797 = vst [vmem:[%s1284_s26 + $0x50] sm:$0xff] %v761_v55   ;;  %v766_v0 = vpack.c.bf16 %v347_v56, %v346_v51  ;;  %v319_v3 = vadd.f32 %v1250_v5, %v280_v58  ;;  %v283_v4 = vmul.f32 %v1246_v2, %v244_v54  ;;  %v349_v6 = vmax.f32 %v317_v60, 0.0 }
  0x87   : > { %v320_v7 = vadd.f32 %v1250_v5, %v281_v62  ;;  %v321_v8 = vadd.f32 %v1250_v5, %v282_v63  ;;  %v284_v9 = vmul.f32 %v1246_v2, %v245_v59  ;;  %v350_v10 = vmax.f32 %v318_v1, 0.0 }
  0x88   : > { %798 = vst [vmem:[%s1284_s26 + $0x58] sm:$0xff] %v766_v0   ;;  %v351_v11 = vmax.f32 %v319_v3, 0.0  ;;  %v322_v12 = vadd.f32 %v1250_v5, %v283_v4  ;;  %v771_v13 = vpack.c.bf16 %v349_v6, %v348_v61 }
  0x89   : > { %v352_v14 = vmax.f32 %v320_v7, 0.0  ;;  %v353_v15 = vmax.f32 %v321_v8, 0.0  ;;  %v323_v16 = vadd.f32 %v1250_v5, %v284_v9 }
  0x8a   : > { %v776_v17 = vpack.c.bf16 %v351_v11, %v350_v10  ;;  %v354_v18 = vmax.f32 %v322_v12, 0.0  ;;  %799 = vst [vmem:[%s1284_s26 + $0x60] sm:$0xff] %v771_v13  }
  0x8b   : > { %v781_v2 = vpack.c.bf16 %v353_v15, %v352_v14  ;;  %v355_v19 = vmax.f32 %v323_v16, 0.0 }
  0x8c   : > { %800 = vst [vmem:[%s1284_s26 + $0x68] sm:$0xff] %v776_v17  }
  0x8d   : > { %801 = vst [vmem:[%s1284_s26 + $0x70] sm:$0xff] %v781_v2   ;;  %v786_v5 = vpack.c.bf16 %v355_v19, %v354_v18 }
  0x8f   : > { %802 = vst [vmem:[%s1284_s26 + $0x78] sm:$0xff] %v786_v5  }
  0x90   : > { %973 = shalt.err (!%p970_p6)
}
  0x91   : > { %s974_s7 = scalar_lea.hbm %s1368_s20, 2048  ;;  %s978_s5 = scalar_lea.hbm %s1419_s3, 4096 }
  0x92   : > { %p975_p12 = scmp.ne.s32.totalorder %s1368_s20, %s974_s7  ;;  %p979_p11 = scmp.lt.u32.totalorder %s1368_s20, %s1419_s3 }
  0x93   : > { %p980_p7 = scmp.lt.u32.totalorder %s978_s5, %s974_s7  ;;  %p982_p8 = scmp.lt.u32.totalorder %s974_s7, %s1368_s20 }
  0x94   : > { %p976_p13 = pnand %p975_p12, %p1438_p4 }
  0x95   : > { %p981_p3 = por %p980_p7, %p979_p11 }
  0x96   : > { %p977_p1 = pneg %p976_p13 }
  0x97   : > { %p983_p5 = por %p982_p8, %p981_p3 }
  0x99   : > { %p984_p10 = pnand %p983_p5, %p977_p1 }
  0x9b   : > { %987 = shalt.err (!%p984_p10)
}
  0x9c   : > { %s1038_s23 = smov 64   ;;  %s1039_s26 = smov 4  }
  0x9d   : > { %813 = dma.vmem_to_hbm [thread:$0]  (%p1438_p4), %s1370_s9, 2048, %s1368_s20, %s517_s16, %s1038_s23, %s1038_s23, %s1039_s26  }
  0x9e PF: > { %s545_s30 = sand.u32 1, %s1018_s12   ;;  %p1439_p2 = scmp.ne.s32.totalorder %s1428_s25, 0 }
  0x9f   : > { %p1440_p0 = scmp.ge.s32.totalorder %s1030_s15, 2  ;;  %s546_s10 = scalar_lea.sflag [#allocation4], %s545_s30 }
  0xa1   : > { %p827_p9 = pnand %p1440_p0, %p1439_p2 }
  0xa3   : > { %1013 = dma.done.wait (!%p827_p9), %s546_s10, 2048  }
  0xa4   : > { %1015 = vsyncadd (!%p827_p9), %s546_s10, 4294965248  ;;  %p17_p6 = scmp.ge.s32.totalorder %s1085_s18, 4   ;;  %s1441_s12 = smov %s1022_s13 }
  0xa5   : > { %s1442_s13 = smov %s1026_s14  ;;  %s1443_s14 = smov %s1097_s21 }
  0xa6   : > { %s1444_s15 = smov %s1085_s18  ;;  %19 = sbr.rel (!%p17_p6) target bundleno = 6 (0x6), region = 85 }
  0xad   :  { %551 = vsyncpa [#allocation3], 1 }
  0xae   :  { %553 = vsyncpa [#allocation3 + $0x1], 1 }
  0xaf   :  { %554 = vsyncpa [#allocation6], 1 }
  0xb0   :  { %555 = vsyncpa [#allocation4], 1 }
  0xb1   :  { %557 = vsyncpa [#allocation4 + $0x1], 1 }

// kernel: basic_block_forward.5
= control target key start
LH: loop header
LB: loop body
LE: loop exit
PB: predicated region body
PF: predicated region fallthrough
CT: control target
= control target key end

     0   :  { %9 = vsyncpa [#allocation4], 0  ;;  %s2800_s0 = inlined_call_operand.hbm [shape: bf16[2,288,12], index: 0, kind: input, shape index: {}]   ;;  %s2801_s1 = inlined_call_operand.hbm [shape: bf16[3,12,128], index: 1, kind: input, shape index: {}]   ;;  %s2802_s2 = inlined_call_operand.hbm [shape: f32[2,256,128], index: 2, kind: output, shape index: {0}]   ;;  %s2803_s3 = inlined_call_operand.hbm [shape: f32[2,2,128], index: 3, kind: output, shape index: {1}]  }
   0x1   :  { %11 = vsyncpa [#allocation4 + $0x1], 0 }
   0x2   :  { %12 = vsyncpa [#allocation7], 0 }
   0x3   :  { %13 = vsyncpa [#allocation5], 0 }
   0x4   :  { %15 = vsyncpa [#allocation5 + $0x1], 0 }
   0x5   :  { %16 = vsyncpa [#allocation10], 0 }
   0x6   :  { %18 = vsyncpa [#allocation10 + $0x1], 0  ;;  %s2406_s12 = smov 0   ;;  %s2408_s13 = smov 0  }
   0x7   :  { %s2410_s14 = smov 0   ;;  %s2412_s15 = smov 0  }
   0x8 LB: > { %s2427_s16 = sadd.s32 4294967295, %s2376_s15   ;;  %s1757_s17 = sadd.s32 4294967294, %s2376_s15   ;;  %s2376_s15 = sphi %s2412_s15, %s2823_s15   ;;  %s2372_s14 = sphi %s2410_s14, %s2822_s14   ;;  %s2368_s13 = sphi %s2408_s13, %s2821_s13   ;;  %s2364_s12 = sphi %s2406_s12, %s2820_s12  }
   0x9   : > { %p44_p0 = scmp.ne.s32.totalorder %s2368_s13, %s2364_s12  ;;  %p2804_p1 = scmp.eq.s32.totalorder %s2427_s16, 0 }
   0xa   : > { %p95_p3 = scmp.eq.s32.totalorder %s1757_s17, 1  ;;  %p1758_p5 = scmp.ge.s32.totalorder %s2376_s15, 1 }
   0xb   : > { %p2436_p4 = por %p2804_p1, %p44_p0  ;;  %p128_p7 = scmp.lt.s32.totalorder %s2376_s15, 3 }
   0xc   : > { %p2441_p6 = por %p95_p3, %p44_p0  ;;  %s2378_s21 = smov [#allocation6]  }
   0xd   : > { %s2807_s18 = scalar_select %p2436_p4, 1, 0 }
   0xe   : > { %s2808_s19 = scalar_select %p2441_p6, 1, 0 }
   0xf   : > { %p2446_p8 = pnand %p1758_p5, %p128_p7  ;;  %s140_s22 = sshll.u32 %s2378_s21, 4  ;;  %s2450_s22 = int_to_ptr.vmem [resolvable:$true] %s140_s22 }
  0x10   : > { %s2462_s24 = sadd.s32 1, %s2376_s15   ;;  %s31_s25 = sadd.s32 1, %s2372_s14 }
  0x11   : > { %s2809_s20 = scalar_select %p2446_p8, 1, 0 }
  0x12   : > { %p2109_p9 = pneg %p2446_p8  ;;  %s28_s26 = ssub.s32 %s2376_s15, %s2462_s24 }
  0x13   : > { %s2216_s29 = scalar_lea.hbm %s2801_s1, 384 }
  0x14   : > { %p2457_p11 = pnand %p2109_p9, %p2804_p1  ;;  %p2217_p12 = scmp.ne.s32.totalorder %s2801_s1, %s2216_s29 }
  0x15   : > { %p2223_p5 = scmp.lt.u32.totalorder %s2216_s29, %s2801_s1 }
  0x16   : > { %p2218_p13 = pneg %p2457_p11 }
  0x18   : > { %p2219_p0 = pnand %p2218_p13, %p2217_p12 }
  0x1a   : > { %p2220_p3 = pneg %p2219_p0 }
  0x1c   : > { %p2225_p7 = pnand %p2223_p5, %p2220_p3 }
  0x1e   : > { %2228 = shalt.err (!%p2225_p7)
}
  0x1f   : > { %s2229_s7 = scalar_lea.vmem %s2450_s22, 384  ;;  %p2237_p2 = scmp.lt.s32.totalorder %s2450_s22, %s2450_s22 }
  0x20   : > { %p2230_p9 = scmp.ne.s32.totalorder %s2450_s22, %s2229_s7  ;;  %p2238_p6 = scmp.lt.s32.totalorder %s2229_s7, %s2229_s7 }
  0x22   : > { %p2232_p10 = pnand %p2230_p9, %p2218_p13  ;;  %p2239_p4 = por %p2238_p6, %p2237_p2 }
  0x24   : > { %p2233_p1 = pneg %p2232_p10 }
  0x26   : > { %p2240_p8 = pnand %p2239_p4, %p2233_p1 }
  0x28   : > { %2243 = shalt.err (!%p2240_p8)
}
  0x29   : > { %s2379_s8 = smov 64   ;;  %s2380_s9 = smov 4  }
  0x2a   : > { %2112 = dma.hbm_to_vmem [thread:$0]  (!%p2457_p11), %s2801_s1, 384, %s2450_s22, [#allocation7], %s2379_s8, %s2379_s8, %s2380_s9  }
  0x2b   : > { %p29_p1 = scmp.eq.s32.totalorder %s28_s26, 0  ;;  %p38_p2 = scmp.ne.s32.totalorder %s2372_s14, %s2368_s13 }
  0x2c   : > { %p39_p4 = scmp.eq.s32.totalorder %s2376_s15, 0  ;;  %p2125_p6 = scmp.lt.s32.totalorder %s2376_s15, 2 }
  0x2d   : > { %s2496_s17 = scalar_select %p29_p1, %s2372_s14, %s31_s25  }
  0x2e   : > { %p40_p8 = por %p39_p4, %p38_p2  ;;  %p2811_p10 = scmp.eq.s32.totalorder %s2427_s16, 1 }
  0x2f   : > { %s154_s23 = sand.u32 1, %s2372_s14   ;;  %s2097_s27 = smul.u32 2304, %s2376_s15 }
  0x30   : > { %p2500_p12 = por %p2811_p10, %p38_p2  ;;  %s2096_s28 = smul.u32 144, %s154_s23 }
  0x31   : > { %p2506_p13 = pnand %p2125_p6, %p40_p8  ;;  %s2513_s25 = scalar_lea.hbm %s2800_s0, %s2097_s27 }
  0x32   : > { %s158_s30 = scalar_lea.vmem [#allocation3], %s2096_s28  ;;  %s2517_s5 = scalar_lea.sflag [#allocation4], %s154_s23 }
  0x33   : > { %s165_s4 = sshll.u32 %s158_s30, 4  ;;  %s2244_s6 = scalar_lea.hbm %s2513_s25, 2304  ;;  %s2515_s4 = int_to_ptr.vmem [resolvable:$true] %s165_s4 }
  0x34   : > { %p2245_p11 = scmp.ne.s32.totalorder %s2513_s25, %s2244_s6  ;;  %p2246_p0 = pneg %p2506_p13 }
  0x35   : > { %s2249_s11 = scalar_lea.hbm %s2800_s0, 4608  ;;  %p2250_p7 = scmp.lt.u32.totalorder %s2513_s25, %s2800_s0 }
  0x36   : > { %p2247_p3 = pnand %p2246_p0, %p2245_p11  ;;  %p2251_p9 = scmp.lt.u32.totalorder %s2249_s11, %s2244_s6 }
  0x37   : > { %p2253_p2 = scmp.lt.u32.totalorder %s2244_s6, %s2513_s25 }
  0x38   : > { %p2248_p5 = pneg %p2247_p3  ;;  %p2252_p1 = por %p2251_p9, %p2250_p7 }
  0x3a   : > { %p2254_p4 = por %p2253_p2, %p2252_p1 }
  0x3c   : > { %p2255_p6 = pnand %p2254_p4, %p2248_p5 }
  0x3e   : > { %2258 = shalt.err (!%p2255_p6)
}
  0x3f   : > { %s2259_s23 = scalar_lea.vmem %s2515_s4, 2304  ;;  %s2381_s28 = smov [#allocation3]  }
  0x40   : > { %p2260_p8 = scmp.ne.s32.totalorder %s2515_s4, %s2259_s23  ;;  %s2264_s26 = sshll.u32 %s2381_s28, 4  ;;  %s2265_s26 = int_to_ptr.vmem [resolvable:$false] %s2264_s26 }
  0x41   : > { %s2266_s30 = scalar_lea.vmem %s2265_s26, 4608  ;;  %p2267_p3 = scmp.lt.s32.totalorder %s2515_s4, %s2265_s26 }
  0x42   : > { %p2262_p10 = pnand %p2260_p8, %p2246_p0  ;;  %p2268_p7 = scmp.lt.s32.totalorder %s2266_s30, %s2259_s23 }
  0x44   : > { %p2263_p11 = pneg %p2262_p10  ;;  %p2269_p9 = por %p2268_p7, %p2267_p3 }
  0x46   : > { %p2270_p1 = pnand %p2269_p9, %p2263_p11 }
  0x48   : > { %2273 = shalt.err (!%p2270_p1)
}
  0x49   : > { %2116 = dma.hbm_to_vmem [thread:$0]  (!%p2506_p13), %s2513_s25, 2304, %s2515_s4, %s2517_s5, %s2379_s8, %s2379_s8, %s2380_s9  }
  0x4a   : > { %p2814_p0 = scmp.ne.s32.totalorder %s2809_s20, 0 }
  0x4b   : > { %s2551_s6 = sand.u32 (!%p2814_p0), 1, %s2368_s13   ;;  %p2815_p5 = scmp.ne.s32.totalorder (!%p2814_p0), %s2807_s18, 0 }
  0x4c   : > { %177 = sbr.rel (%p2814_p0) target bundleno = 443 (0x1bb), region = 28  ;;  %s180_s10 = scalar_lea.sflag (!%p2814_p0), [#allocation4], %s2551_s6 }
  0x4d   : > { %s2098_s7 = smul.u32 (!%p2814_p0), 144, %s2551_s6 }
  0x4f   : > { %s2555_s11 = scalar_lea.vmem (!%p2814_p0), [#allocation3], %s2098_s7 }
  0x53   : > { %2347 = dma.done.wait (%p2815_p5), %s180_s10, 2304  }
  0x54   : > { %2349 = vsyncadd (%p2815_p5), %s180_s10, 4294964992  ;;  %p2816_p13 = scmp.eq.s32.totalorder %s2427_s16, 0 }
  0x56   : > { %2351 = dma.done.wait (%p2816_p13), [#allocation7], 384   ;;  %p2817_p2 = pmov %p2816_p13 }
  0x57   : > { %vm384_vm0 = vcmask 1045504   ;;  %vm335_vm1 = vcmask 97280   ;;  %v2165_v0 = vld [vmem:[#allocation6] sm:$0x3f]   ;;  %v2166_v1 = vld [vmem:[#allocation6 + $0x8] sm:$0x3f]  }
  0x58   : > { %2353 = vsyncadd (%p2817_p2), [#allocation7], 4294966912  ;;  %2092 = vmatprep.subr.msk.bf16.mxu1 %vm384_vm0, %v2165_v0  ;;  %v386_v2 = vsel %vm384_vm0, %v2165_v0, 0  ;;  %v2167_v3 = vld [vmem:[%s2555_s11] sm:$0xff]   ;;  %2093 = vmatprep.subr.msk.bf16.mxu0 %vm384_vm0, %v2166_v1  ;;  %v782_v4 = vsel %vm384_vm0, %v2166_v1, 0  ;;  %v2168_v5 = vld [vmem:[%s2555_s11 + $0x8] sm:$0xff]  }
  0x59   : > { %1925 = vmatpush3.bf16.msra.mxu1 %v386_v2  ;;  %1959 = vmatpush3.bf16.msra.mxu0 %v782_v4  ;;  %v2169_v6 = vld [vmem:[%s2555_s11 + $0x8] sm:$0xff]   ;;  %v2170_v7 = vld [vmem:[%s2555_s11 + $0x10] sm:$0xff]   ;;  %v2173_v11 = vld [vmem:[%s2555_s11 + $0x18] sm:$0xff]   ;;  %s1764_s18 = sshll.u32 %s2551_s6, 8  ;;  %s1872_s8 = sshll.u32 %s2427_s16, 12 }
  0x5a   : > { %1926 = vmatprep.mubr.msk.bf16.mxu1 %vm335_vm1, %v2167_v3  ;;  %1960 = vmatprep.mubr.msk.bf16.mxu0 %vm335_vm1, %v2168_v5  ;;  %v2171_v8 = vld [vmem:[#allocation6 + $0x10] sm:$0x3f]   ;;  %v2174_v12 = vld [vmem:[%s2555_s11 + $0x18] sm:$0xff]   ;;  %v2177_v15 = vld [vmem:[%s2555_s11 + $0x28] sm:$0xff]   ;;  %s2679_s20 = scalar_lea.vmem [#allocation8], %s1764_s18  ;;  %s2720_s4 = scalar_lea.hbm %s2802_s2, %s1872_s8 }
  0x5b   : > { %2094 = vmatprep.subr.msk.bf16.mxu1 %vm384_vm0, %v2166_v1  ;;  %v2172_v9 = vld [vmem:[%s2555_s11 + $0x10] sm:$0xff]   ;;  %2095 = vmatprep.subr.msk.bf16.mxu0 %vm384_vm0, %v2171_v8  ;;  %v1210_v10 = vsel %vm384_vm0, %v2171_v8, 0  ;;  %v2175_v13 = vld [vmem:[%s2555_s11 + $0x20] sm:$0xff]   ;;  %v2178_v16 = vld [vmem:[%s2555_s11 + $0x28] sm:$0xff]   ;;  %s1629_s9 = sshll.u32 %s2679_s20, 4  ;;  %s1611_s5 = scalar_lea.sflag [#allocation5], %s2551_s6  ;;  %s2722_s9 = int_to_ptr.vmem [resolvable:$true] %s1629_s9 }
  0x5c   : > { %1927 = vmatmul.mubr.msk.bf16.vlgmr.msra.gmra.mrb[0].mxu1 %vm335_vm1, %v2169_v6  ;;  %1961 = vmatmul.mubr.msk.bf16.vlgmr.msra.gmra.mrb[0].mxu0 %vm335_vm1, %v2170_v7  ;;  %v2176_v14 = vld [vmem:[%s2555_s11 + $0x20] sm:$0xff]   ;;  %v2179_v17 = vld [vmem:[%s2555_s11 + $0x30] sm:$0xff]   ;;  %v2181_v19 = vld [vmem:[%s2555_s11 + $0x38] sm:$0xff]   ;;  %s2274_s27 = scalar_lea.vmem %s2722_s9, 4096  ;;  %s2382_s22 = smov [#allocation8]  }
  0x5d   : > { %2027 = vmatpush3.bf16.msra.mxu1 %v782_v4  ;;  %1993 = vmatpush3.bf16.msra.mxu0 %v1210_v10  ;;  %v2180_v18 = vld [vmem:[%s2555_s11 + $0x30] sm:$0xff]   ;;  %v2182_v20 = vld [vmem:[%s2555_s11 + $0x38] sm:$0xff]   ;;  %v2183_v21 = vld [vmem:[%s2555_s11 + $0x40] sm:$0xff]   ;;  %p2275_p4 = scmp.ne.s32.totalorder %s2722_s9, %s2274_s27  ;;  %s2278_s23 = sshll.u32 %s2382_s22, 4  ;;  %s2279_s23 = int_to_ptr.vmem [resolvable:$false] %s2278_s23 }
  0x5e   : > { %1930 = vmatprep.mubr.msk.bf16.mxu1 %vm335_vm1, %v2172_v9  ;;  %1964 = vmatprep.mubr.msk.bf16.mxu0 %vm335_vm1, %v2173_v11  ;;  %v2184_v22 = vld [vmem:[%s2555_s11 + $0x40] sm:$0xff]   ;;  %v2185_v23 = vld [vmem:[%s2555_s11 + $0x10] sm:$0xff]   ;;  %v2186_v24 = vld [vmem:[%s2555_s11 + $0x48] sm:$0xff]   ;;  %s2280_s28 = scalar_lea.vmem %s2279_s23, 8192  ;;  %p2281_p10 = scmp.lt.s32.totalorder %s2722_s9, %s2279_s23 }
  0x5f   : > { %v2187_v25 = vld [vmem:[%s2555_s11 + $0x18] sm:$0xff]   ;;  %v2188_v26 = vld [vmem:[%s2555_s11 + $0x50] sm:$0xff]   ;;  %v2189_v27 = vld [vmem:[%s2555_s11 + $0x20] sm:$0xff]   ;;  %p2276_p6 = pnand %p2275_p4, %p2500_p12  ;;  %p2282_p11 = scmp.lt.s32.totalorder %s2280_s28, %s2274_s27 }
  0x60   : > { %v2190_v28 = vld [vmem:[%s2555_s11 + $0x58] sm:$0xff]   ;;  %v2191_v29 = vld [vmem:[%s2555_s11 + $0x28] sm:$0xff]   ;;  %v2192_v30 = vld [vmem:[%s2555_s11 + $0x60] sm:$0xff]  }
  0x61   : > { %v2193_v31 = vld [vmem:[%s2555_s11 + $0x30] sm:$0xff]   ;;  %v2194_v32 = vld [vmem:[%s2555_s11 + $0x68] sm:$0xff]   ;;  %v2195_v33 = vld [vmem:[%s2555_s11 + $0x38] sm:$0xff]   ;;  %p2277_p8 = pneg %p2276_p6  ;;  %p2283_p3 = por %p2282_p11, %p2281_p10 }
  0x62   : > { %v2196_v34 = vld [vmem:[%s2555_s11 + $0x70] sm:$0xff]   ;;  %v2197_v35 = vld [vmem:[%s2555_s11 + $0x40] sm:$0xff]   ;;  %v2198_v36 = vld [vmem:[%s2555_s11 + $0x78] sm:$0xff]  }
  0x63   : > { %v2199_v37 = vld [vmem:[%s2555_s11 + $0x48] sm:$0xff]   ;;  %v2201_v39 = vld [vmem:[%s2555_s11 + $0x50] sm:$0xff]   ;;  %v2203_v41 = vld [vmem:[%s2555_s11 + $0x58] sm:$0xff]   ;;  %p2284_p7 = pnand %p2283_p3, %p2277_p8 }
  0x64   : > { %1931 = vmatmul.mubr.msk.bf16.gmra.mrb[4].mxu1 %vm335_vm1, %v2174_v12  ;;  %1965 = vmatmul.mubr.msk.bf16.gmra.mrb[4].mxu0 %vm335_vm1, %v2175_v13  ;;  %v2200_v38 = vld [vmem:[%s2555_s11 + $0x48] sm:$0xff]   ;;  %v2202_v40 = vld [vmem:[%s2555_s11 + $0x50] sm:$0xff]   ;;  %v2204_v42 = vld [vmem:[%s2555_s11 + $0x58] sm:$0xff]  }
  0x65   : > { %1934 = vmatprep.mubr.msk.bf16.mxu1 %vm335_vm1, %v2176_v14  ;;  %1968 = vmatprep.mubr.msk.bf16.mxu0 %vm335_vm1, %v2177_v15  ;;  %v2205_v43 = vld [vmem:[%s2555_s11 + $0x60] sm:$0xff]   ;;  %v2207_v45 = vld [vmem:[%s2555_s11 + $0x68] sm:$0xff]   ;;  %v2209_v47 = vld [vmem:[%s2555_s11 + $0x70] sm:$0xff]  }
  0x66   : > { %v2206_v44 = vld [vmem:[%s2555_s11 + $0x60] sm:$0xff]   ;;  %v2208_v46 = vld [vmem:[%s2555_s11 + $0x68] sm:$0xff]   ;;  %v2210_v48 = vld [vmem:[%s2555_s11 + $0x70] sm:$0xff]  }
  0x67   : > { %v2211_v49 = vld [vmem:[%s2555_s11 + $0x78] sm:$0xff]   ;;  %v2213_v51 = vld [vmem:[%s2555_s11 + $0x80] sm:$0xff]   ;;  %v2215_v53 = vld [vmem:[%s2555_s11 + $0x88] sm:$0xff]  }
  0x68   : > { %v2212_v50 = vld [vmem:[%s2555_s11 + $0x78] sm:$0xff]   ;;  %v2214_v52 = vld [vmem:[%s2555_s11 + $0x80] sm:$0xff]  }
  0x6c   : > { %1935 = vmatmul.mubr.msk.bf16.gmra.mrb[8].mxu1 %vm335_vm1, %v2178_v16  ;;  %1969 = vmatmul.mubr.msk.bf16.gmra.mrb[8].mxu0 %vm335_vm1, %v2179_v17 }
  0x6d   : > { %1938 = vmatprep.mubr.msk.bf16.mxu1 %vm335_vm1, %v2180_v18  ;;  %1972 = vmatprep.mubr.msk.bf16.mxu0 %vm335_vm1, %v2181_v19 }
  0x74   : > { %1939 = vmatmul.mubr.msk.bf16.gmra.mrb[12].mxu1 %vm335_vm1, %v2182_v20  ;;  %1973 = vmatmul.mubr.msk.bf16.gmra.mrb[12].mxu0 %vm335_vm1, %v2183_v21 }
  0x75   : > { %1942 = vmatprep.mubr.msk.bf16.mxu1 %vm335_vm1, %v2184_v22  ;;  %1994 = vmatprep.mubr.msk.bf16.mxu0 %vm335_vm1, %v2185_v23 }
  0x7c   : > { %1943 = vmatmul.mubr.msk.bf16.gmra.mrb[16].mxu1 %vm335_vm1, %v2186_v24  ;;  %1995 = vmatmul.mubr.msk.bf16.vlgmr.msra.gmra.mrb[0].mxu0 %vm335_vm1, %v2187_v25 }
  0x7d   : > { %1946 = vmatprep.mubr.msk.bf16.mxu1 %vm335_vm1, %v2188_v26  ;;  %1998 = vmatprep.mubr.msk.bf16.mxu0 %vm335_vm1, %v2189_v27 }
  0x84   : > { %1947 = vmatmul.mubr.msk.bf16.gmra.mrb[20].mxu1 %vm335_vm1, %v2190_v28  ;;  %1999 = vmatmul.mubr.msk.bf16.gmra.mrb[4].mxu0 %vm335_vm1, %v2191_v29 }
  0x85   : > { %1950 = vmatprep.mubr.msk.bf16.mxu1 %vm335_vm1, %v2192_v30  ;;  %2002 = vmatprep.mubr.msk.bf16.mxu0 %vm335_vm1, %v2193_v31 }
  0x8c   : > { %1951 = vmatmul.mubr.msk.bf16.gmra.mrb[24].mxu1 %vm335_vm1, %v2194_v32  ;;  %2003 = vmatmul.mubr.msk.bf16.gmra.mrb[8].mxu0 %vm335_vm1, %v2195_v33 }
  0x8d   : > { %1954 = vmatprep.mubr.msk.bf16.mxu1 %vm335_vm1, %v2196_v34  ;;  %2006 = vmatprep.mubr.msk.bf16.mxu0 %vm335_vm1, %v2197_v35 }
  0x94   : > { %1955 = vmatmul.mubr.msk.bf16.gmra.mrb[28].mxu1 %vm335_vm1, %v2198_v36  ;;  %2007 = vmatmul.mubr.msk.bf16.gmra.mrb[12].mxu0 %vm335_vm1, %v2199_v37 }
  0x95   : > { %1976 = vmatprep.mubr.msk.bf16.mxu1 %vm335_vm1, %v2200_v38  ;;  %2010 = vmatprep.mubr.msk.bf16.mxu0 %vm335_vm1, %v2201_v39 }
  0x9c   : > { %1977 = vmatmul.mubr.msk.bf16.vlgmr.msra.gmra.mrb[16].mxu1 %vm335_vm1, %v2202_v40  ;;  %2011 = vmatmul.mubr.msk.bf16.gmra.mrb[16].mxu0 %vm335_vm1, %v2203_v41 }
  0x9d   : > { %1980 = vmatprep.mubr.msk.bf16.mxu1 %vm335_vm1, %v2204_v42  ;;  %2014 = vmatprep.mubr.msk.bf16.mxu0 %vm335_vm1, %v2205_v43 }
  0xa4   : > { %1981 = vmatmul.mubr.msk.bf16.gmra.mrb[20].mxu1 %vm335_vm1, %v2206_v44  ;;  %2015 = vmatmul.mubr.msk.bf16.gmra.mrb[20].mxu0 %vm335_vm1, %v2207_v45 }
  0xa5   : > { %1984 = vmatprep.mubr.msk.bf16.mxu1 %vm335_vm1, %v2208_v46  ;;  %2018 = vmatprep.mubr.msk.bf16.mxu0 %vm335_vm1, %v2209_v47 }
  0xac   : > { %1985 = vmatmul.mubr.msk.bf16.gmra.mrb[24].mxu1 %vm335_vm1, %v2210_v48  ;;  %2019 = vmatmul.mubr.msk.bf16.gmra.mrb[24].mxu0 %vm335_vm1, %v2211_v49 }
  0xad   : > { %1988 = vmatprep.mubr.msk.bf16.mxu1 %vm335_vm1, %v2212_v50  ;;  %2022 = vmatprep.mubr.msk.bf16.mxu0 %vm335_vm1, %v2213_v51 }
  0xb4   : > { %1989 = vmatmul.mubr.msk.bf16.gmra.mrb[28].mxu1 %vm335_vm1, %v2214_v52  ;;  %2023 = vmatmul.mubr.msk.bf16.gmra.mrb[28].mxu0 %vm335_vm1, %v2215_v53 }
 0x12f   : > { %v1928_v54 = vpop.f32.mrb[0].mxu1 }
 0x130   : > { %v422_v55 = vpop.f32.mrb[1].mxu1 }
 0x131   : > { %v1929_v56 = vpop.f32.mrb[2].mxu1 }
 0x132   : > { %v425_v57 = vpop.f32.mrb[3].mxu1 }
 0x137   : > { %v1932_v58 = vpop.f32.mrb[4].mxu1 }
 0x138   : > { %v438_v59 = vpop.f32.mrb[5].mxu1 }
 0x139   : > { %v1933_v60 = vpop.f32.mrb[6].mxu1 }
 0x13a   : > { %v441_v61 = vpop.f32.mrb[7].mxu1 }
 0x13f   : > { %v1936_v62 = vpop.f32.mrb[8].mxu1 }
 0x140   : > { %v454_v63 = vpop.f32.mrb[9].mxu1 }
 0x141   : > { %v1937_v0 = vpop.f32.mrb[10].mxu1 }
 0x142   : > { %v2668_v1 = vpop.f32.mrb[11].mxu1 }
 0x147   : > { %v2670_v2 = vpop.f32.mrb[12].mxu1 }
 0x148   : > { %v2672_v3 = vpop.f32.mrb[13].mxu1 }
 0x149   : > { %v2674_v4 = vpop.f32.mrb[14].mxu1 }
 0x14a   : > { %v2676_v5 = vpop.f32.mrb[15].mxu1 }
 0x14f   : > { %v1996_v6 = vpop.f32.mrb[0].mxu0 }
 0x150   : > { %v2028_v7 = vadd.f32 %v1996_v6, %v1928_v54  ;;  %v1246_v8 = vpop.f32.mrb[1].mxu0 }
 0x151   : > { %v2029_v9 = vadd.f32 %v1246_v8, %v422_v55  ;;  %v1997_v10 = vpop.f32.mrb[2].mxu0 }
 0x152   : > { %1471 = vst [vmem:[%s2679_s20 + $0x10] sm:$0xff] %v2028_v7  ;;  %v2030_v11 = vadd.f32 %v1997_v10, %v1929_v56  ;;  %v1249_v12 = vpop.f32.mrb[3].mxu0  ;;  %v1540_v17 = vmul.f32 %v2028_v7, %v2028_v7 }
 0x153   : > { %1469 = vst [vmem:[%s2679_s20] sm:$0xff] %v2029_v9  ;;  %v2031_v13 = vadd.f32 %v1249_v12, %v425_v57  ;;  %v1538_v14 = vmul.f32 %v2029_v9, %v2029_v9 }
 0x154   : > { %1472 = vst [vmem:[%s2679_s20 + $0x18] sm:$0xff] %v2030_v11  ;;  %v1541_v23 = vmul.f32 %v2030_v11, %v2030_v11 }
 0x155   : > { %1470 = vst [vmem:[%s2679_s20 + $0x8] sm:$0xff] %v2031_v13  ;;  %v1501_v15 = vadd.f32 %v2031_v13, %v2029_v9  ;;  %v1539_v16 = vmul.f32 %v2031_v13, %v2031_v13 }
 0x157   : > { %v1502_v18 = vadd.f32 %v2028_v7, %v1501_v15  ;;  %v1570_v19 = vadd.f32 %v1539_v16, %v1538_v14  ;;  %v2000_v20 = vpop.f32.mrb[4].mxu0 }
 0x158   : > { %v2032_v21 = vadd.f32 %v2000_v20, %v1932_v58  ;;  %v1262_v22 = vpop.f32.mrb[5].mxu0 }
 0x159   : > { %v1571_v24 = vadd.f32 %v1570_v19, %v1540_v17  ;;  %v2033_v25 = vadd.f32 %v1262_v22, %v438_v59  ;;  %v1503_v26 = vadd.f32 %v2030_v11, %v1502_v18  ;;  %v2001_v27 = vpop.f32.mrb[6].mxu0 }
 0x15a   : > { %1475 = vst [vmem:[%s2679_s20 + $0x30] sm:$0xff] %v2032_v21  ;;  %v2034_v28 = vadd.f32 %v2001_v27, %v1933_v60  ;;  %v1265_v29 = vpop.f32.mrb[7].mxu0  ;;  %v1544_v37 = vmul.f32 %v2032_v21, %v2032_v21 }
 0x15b   : > { %1473 = vst [vmem:[%s2679_s20 + $0x20] sm:$0xff] %v2033_v25  ;;  %v1504_v30 = vadd.f32 %v2033_v25, %v1503_v26  ;;  %v1542_v31 = vmul.f32 %v2033_v25, %v2033_v25  ;;  %v1572_v32 = vadd.f32 %v1571_v24, %v1541_v23  ;;  %v2035_v33 = vadd.f32 %v1265_v29, %v441_v61 }
 0x15c   : > { %1476 = vst [vmem:[%s2679_s20 + $0x38] sm:$0xff] %v2034_v28  ;;  %v1545_v43 = vmul.f32 %v2034_v28, %v2034_v28 }
 0x15d   : > { %v1573_v34 = vadd.f32 %v1572_v32, %v1542_v31  ;;  %1474 = vst [vmem:[%s2679_s20 + $0x28] sm:$0xff] %v2035_v33  ;;  %v1505_v35 = vadd.f32 %v2035_v33, %v1504_v30  ;;  %v1543_v36 = vmul.f32 %v2035_v33, %v2035_v33 }
 0x15f   : > { %v1506_v38 = vadd.f32 %v2032_v21, %v1505_v35  ;;  %v1574_v39 = vadd.f32 %v1573_v34, %v1543_v36  ;;  %v2004_v40 = vpop.f32.mrb[8].mxu0 }
 0x160   : > { %v2036_v41 = vadd.f32 %v2004_v40, %v1936_v62  ;;  %v1278_v42 = vpop.f32.mrb[9].mxu0 }
 0x161   : > { %v1575_v44 = vadd.f32 %v1574_v39, %v1544_v37  ;;  %v2037_v45 = vadd.f32 %v1278_v42, %v454_v63  ;;  %v1507_v46 = vadd.f32 %v2034_v28, %v1506_v38  ;;  %v2005_v47 = vpop.f32.mrb[10].mxu0 }
 0x162   : > { %1479 = vst [vmem:[%s2679_s20 + $0x50] sm:$0xff] %v2036_v41  ;;  %v2038_v48 = vadd.f32 %v2005_v47, %v1937_v0  ;;  %v1281_v49 = vpop.f32.mrb[11].mxu0  ;;  %v1548_v57 = vmul.f32 %v2036_v41, %v2036_v41 }
 0x163   : > { %1477 = vst [vmem:[%s2679_s20 + $0x40] sm:$0xff] %v2037_v45  ;;  %v1508_v50 = vadd.f32 %v2037_v45, %v1507_v46  ;;  %v1546_v51 = vmul.f32 %v2037_v45, %v2037_v45  ;;  %v1576_v52 = vadd.f32 %v1575_v44, %v1545_v43  ;;  %v2039_v53 = vadd.f32 %v1281_v49, %v2668_v1 }
 0x164   : > { %1480 = vst [vmem:[%s2679_s20 + $0x58] sm:$0xff] %v2038_v48  ;;  %v1549_v63 = vmul.f32 %v2038_v48, %v2038_v48 }
 0x165   : > { %v1577_v54 = vadd.f32 %v1576_v52, %v1546_v51  ;;  %1478 = vst [vmem:[%s2679_s20 + $0x48] sm:$0xff] %v2039_v53  ;;  %v1509_v55 = vadd.f32 %v2039_v53, %v1508_v50  ;;  %v1547_v56 = vmul.f32 %v2039_v53, %v2039_v53 }
 0x167   : > { %v1510_v58 = vadd.f32 %v2036_v41, %v1509_v55  ;;  %v1578_v59 = vadd.f32 %v1577_v54, %v1547_v56  ;;  %v2008_v60 = vpop.f32.mrb[12].mxu0 }
 0x168   : > { %v2040_v61 = vadd.f32 %v2008_v60, %v2670_v2  ;;  %v1294_v62 = vpop.f32.mrb[13].mxu0 }
 0x169   : > { %v1579_v0 = vadd.f32 %v1578_v59, %v1548_v57  ;;  %v2041_v1 = vadd.f32 %v1294_v62, %v2672_v3  ;;  %v1511_v6 = vadd.f32 %v2038_v48, %v1510_v58  ;;  %v2009_v7 = vpop.f32.mrb[14].mxu0 }
 0x16a   : > { %1483 = vst [vmem:[%s2679_s20 + $0x70] sm:$0xff] %v2040_v61  ;;  %v2042_v8 = vadd.f32 %v2009_v7, %v2674_v4  ;;  %v1297_v9 = vpop.f32.mrb[15].mxu0  ;;  %v1552_v3 = vmul.f32 %v2040_v61, %v2040_v61 }
 0x16b   : > { %1481 = vst [vmem:[%s2679_s20 + $0x60] sm:$0xff] %v2041_v1  ;;  %v1512_v10 = vadd.f32 %v2041_v1, %v1511_v6  ;;  %v1550_v11 = vmul.f32 %v2041_v1, %v2041_v1  ;;  %v1580_v12 = vadd.f32 %v1579_v0, %v1549_v63  ;;  %v2043_v13 = vadd.f32 %v1297_v9, %v2676_v5 }
 0x16c   : > { %1484 = vst [vmem:[%s2679_s20 + $0x78] sm:$0xff] %v2042_v8  ;;  %v1553_v23 = vmul.f32 %v2042_v8, %v2042_v8 }
 0x16d   : > { %v1581_v2 = vadd.f32 %v1580_v12, %v1550_v11  ;;  %1482 = vst [vmem:[%s2679_s20 + $0x68] sm:$0xff] %v2043_v13  ;;  %v1513_v14 = vadd.f32 %v2043_v13, %v1512_v10  ;;  %v1551_v15 = vmul.f32 %v2043_v13, %v2043_v13 }
 0x16f   : > { %v1978_v16 = vpop.f32.mrb[16].mxu1  ;;  %v1514_v17 = vadd.f32 %v2040_v61, %v1513_v14  ;;  %v1582_v18 = vadd.f32 %v1581_v2, %v1551_v15  ;;  %v2012_v19 = vpop.f32.mrb[16].mxu0 }
 0x170   : > { %v882_v4 = vpop.f32.mrb[17].mxu1  ;;  %v2044_v20 = vadd.f32 %v2012_v19, %v1978_v16  ;;  %v1310_v21 = vpop.f32.mrb[17].mxu0 }
 0x171   : > { %v1979_v22 = vpop.f32.mrb[18].mxu1  ;;  %v1583_v5 = vadd.f32 %v1582_v18, %v1552_v3  ;;  %v2045_v24 = vadd.f32 %v1310_v21, %v882_v4  ;;  %v1515_v25 = vadd.f32 %v2042_v8, %v1514_v17  ;;  %v2013_v26 = vpop.f32.mrb[18].mxu0 }
 0x172   : > { %v885_v27 = vpop.f32.mrb[19].mxu1  ;;  %1487 = vst [vmem:[%s2679_s20 + $0x90] sm:$0xff] %v2044_v20  ;;  %v2046_v28 = vadd.f32 %v2013_v26, %v1979_v22  ;;  %v1313_v29 = vpop.f32.mrb[19].mxu0  ;;  %v1556_v38 = vmul.f32 %v2044_v20, %v2044_v20 }
 0x173   : > { %1485 = vst [vmem:[%s2679_s20 + $0x80] sm:$0xff] %v2045_v24  ;;  %v1516_v30 = vadd.f32 %v2045_v24, %v1515_v25  ;;  %v1554_v31 = vmul.f32 %v2045_v24, %v2045_v24  ;;  %v1584_v32 = vadd.f32 %v1583_v5, %v1553_v23  ;;  %v2047_v33 = vadd.f32 %v1313_v29, %v885_v27 }
 0x174   : > { %1488 = vst [vmem:[%s2679_s20 + $0x98] sm:$0xff] %v2046_v28  ;;  %v1557_v46 = vmul.f32 %v2046_v28, %v2046_v28 }
 0x175   : > { %v1585_v34 = vadd.f32 %v1584_v32, %v1554_v31  ;;  %1486 = vst [vmem:[%s2679_s20 + $0x88] sm:$0xff] %v2047_v33  ;;  %v1517_v35 = vadd.f32 %v2047_v33, %v1516_v30  ;;  %v1555_v36 = vmul.f32 %v2047_v33, %v2047_v33 }
 0x177   : > { %v1982_v37 = vpop.f32.mrb[20].mxu1  ;;  %v1518_v39 = vadd.f32 %v2044_v20, %v1517_v35  ;;  %v1586_v40 = vadd.f32 %v1585_v34, %v1555_v36  ;;  %v2016_v41 = vpop.f32.mrb[20].mxu0 }
 0x178   : > { %v898_v42 = vpop.f32.mrb[21].mxu1  ;;  %v2048_v43 = vadd.f32 %v2016_v41, %v1982_v37  ;;  %v1326_v44 = vpop.f32.mrb[21].mxu0 }
 0x179   : > { %v1983_v45 = vpop.f32.mrb[22].mxu1  ;;  %v1587_v47 = vadd.f32 %v1586_v40, %v1556_v38  ;;  %v2049_v48 = vadd.f32 %v1326_v44, %v898_v42  ;;  %v1519_v49 = vadd.f32 %v2046_v28, %v1518_v39  ;;  %v2017_v50 = vpop.f32.mrb[22].mxu0 }
 0x17a   : > { %v901_v51 = vpop.f32.mrb[23].mxu1  ;;  %1491 = vst [vmem:[%s2679_s20 + $0xb0] sm:$0xff] %v2048_v43  ;;  %v2050_v52 = vadd.f32 %v2017_v50, %v1983_v45  ;;  %v1329_v53 = vpop.f32.mrb[23].mxu0  ;;  %v1560_v62 = vmul.f32 %v2048_v43, %v2048_v43 }
 0x17b   : > { %1489 = vst [vmem:[%s2679_s20 + $0xa0] sm:$0xff] %v2049_v48  ;;  %v1520_v54 = vadd.f32 %v2049_v48, %v1519_v49  ;;  %v1558_v55 = vmul.f32 %v2049_v48, %v2049_v48  ;;  %v1588_v56 = vadd.f32 %v1587_v47, %v1557_v46  ;;  %v2051_v57 = vadd.f32 %v1329_v53, %v901_v51 }
 0x17c   : > { %1492 = vst [vmem:[%s2679_s20 + $0xb8] sm:$0xff] %v2050_v52  ;;  %v1561_v10 = vmul.f32 %v2050_v52, %v2050_v52 }
 0x17d   : > { %v1589_v58 = vadd.f32 %v1588_v56, %v1558_v55  ;;  %1490 = vst [vmem:[%s2679_s20 + $0xa8] sm:$0xff] %v2051_v57  ;;  %v1521_v59 = vadd.f32 %v2051_v57, %v1520_v54  ;;  %v1559_v60 = vmul.f32 %v2051_v57, %v2051_v57 }
 0x17f   : > { %v1986_v61 = vpop.f32.mrb[24].mxu1  ;;  %v1522_v63 = vadd.f32 %v2048_v43, %v1521_v59  ;;  %v1590_v0 = vadd.f32 %v1589_v58, %v1559_v60  ;;  %v2020_v1 = vpop.f32.mrb[24].mxu0 }
 0x180   : > { %v914_v6 = vpop.f32.mrb[25].mxu1  ;;  %v2052_v7 = vadd.f32 %v2020_v1, %v1986_v61  ;;  %v1342_v8 = vpop.f32.mrb[25].mxu0 }
 0x181   : > { %v1987_v9 = vpop.f32.mrb[26].mxu1  ;;  %v1591_v11 = vadd.f32 %v1590_v0, %v1560_v62  ;;  %v2053_v12 = vadd.f32 %v1342_v8, %v914_v6  ;;  %v1523_v13 = vadd.f32 %v2050_v52, %v1522_v63  ;;  %v2021_v2 = vpop.f32.mrb[26].mxu0 }
 0x182   : > { %v917_v14 = vpop.f32.mrb[27].mxu1  ;;  %1495 = vst [vmem:[%s2679_s20 + $0xd0] sm:$0xff] %v2052_v7  ;;  %v2054_v15 = vadd.f32 %v2021_v2, %v1987_v9  ;;  %v1345_v16 = vpop.f32.mrb[27].mxu0  ;;  %v1564_v23 = vmul.f32 %v2052_v7, %v2052_v7 }
 0x183   : > { %1493 = vst [vmem:[%s2679_s20 + $0xc0] sm:$0xff] %v2053_v12  ;;  %v1524_v3 = vadd.f32 %v2053_v12, %v1523_v13  ;;  %v1562_v17 = vmul.f32 %v2053_v12, %v2053_v12  ;;  %v1592_v18 = vadd.f32 %v1591_v11, %v1561_v10  ;;  %v2055_v19 = vadd.f32 %v1345_v16, %v917_v14 }
 0x184   : > { %1496 = vst [vmem:[%s2679_s20 + $0xd8] sm:$0xff] %v2054_v15  ;;  %v1565_v30 = vmul.f32 %v2054_v15, %v2054_v15 }
 0x185   : > { %v1593_v4 = vadd.f32 %v1592_v18, %v1562_v17  ;;  %1494 = vst [vmem:[%s2679_s20 + $0xc8] sm:$0xff] %v2055_v19  ;;  %v1525_v20 = vadd.f32 %v2055_v19, %v1524_v3  ;;  %v1563_v21 = vmul.f32 %v2055_v19, %v2055_v19 }
 0x187   : > { %v1990_v22 = vpop.f32.mrb[28].mxu1  ;;  %v1526_v5 = vadd.f32 %v2052_v7, %v1525_v20  ;;  %v1594_v24 = vadd.f32 %v1593_v4, %v1563_v21  ;;  %v2024_v25 = vpop.f32.mrb[28].mxu0 }
 0x188   : > { %v930_v26 = vpop.f32.mrb[29].mxu1  ;;  %v2056_v27 = vadd.f32 %v2024_v25, %v1990_v22  ;;  %v1358_v28 = vpop.f32.mrb[29].mxu0 }
 0x189   : > { %v1991_v29 = vpop.f32.mrb[30].mxu1  ;;  %v1595_v31 = vadd.f32 %v1594_v24, %v1564_v23  ;;  %v2057_v32 = vadd.f32 %v1358_v28, %v930_v26  ;;  %v1527_v33 = vadd.f32 %v2054_v15, %v1526_v5  ;;  %v2025_v34 = vpop.f32.mrb[30].mxu0 }
 0x18a   : > { %v933_v35 = vpop.f32.mrb[31].mxu1  ;;  %1499 = vst [vmem:[%s2679_s20 + $0xf0] sm:$0xff] %v2056_v27  ;;  %v2058_v36 = vadd.f32 %v2025_v34, %v1991_v29  ;;  %v1361_v37 = vpop.f32.mrb[31].mxu0 }
 0x18b   : > { %1497 = vst [vmem:[%s2679_s20 + $0xe0] sm:$0xff] %v2057_v32  ;;  %v1528_v38 = vadd.f32 %v2057_v32, %v1527_v33  ;;  %v1566_v39 = vmul.f32 %v2057_v32, %v2057_v32  ;;  %v1596_v40 = vadd.f32 %v1595_v31, %v1565_v30  ;;  %v2059_v41 = vadd.f32 %v1361_v37, %v933_v35 }
 0x18c   : > { %1500 = vst [vmem:[%s2679_s20 + $0xf8] sm:$0xff] %v2058_v36 }
 0x18d   : > { %v1597_v42 = vadd.f32 %v1596_v40, %v1566_v39  ;;  %1498 = vst [vmem:[%s2679_s20 + $0xe8] sm:$0xff] %v2059_v41  ;;  %v1529_v43 = vadd.f32 %v2059_v41, %v1528_v38  ;;  %v1567_v44 = vmul.f32 %v2059_v41, %v2059_v41 }
 0x18e   : > { %2287 = shalt.err (!%p2284_p7)
}
 0x18f   : > { %s2288_s26 = scalar_lea.hbm %s2720_s4, 4096  ;;  %s2292_s10 = scalar_lea.hbm %s2802_s2, 8192 }
 0x190   : > { %p2289_p9 = scmp.ne.s32.totalorder %s2720_s4, %s2288_s26  ;;  %p2293_p5 = scmp.lt.u32.totalorder %s2720_s4, %s2802_s2 }
 0x191   : > { %p2294_p13 = scmp.lt.u32.totalorder %s2292_s10, %s2288_s26  ;;  %p2296_p4 = scmp.lt.u32.totalorder %s2288_s26, %s2720_s4 }
 0x192   : > { %p2290_p1 = pnand %p2289_p9, %p2500_p12 }
 0x193   : > { %p2295_p2 = por %p2294_p13, %p2293_p5 }
 0x194   : > { %p2291_p0 = pneg %p2290_p1 }
 0x195   : > { %p2297_p6 = por %p2296_p4, %p2295_p2 }
 0x197   : > { %p2298_p8 = pnand %p2297_p6, %p2291_p0 }
 0x199   : > { %2301 = shalt.err (!%p2298_p8)
}
 0x19a   : > { %s2383_s20 = smov 128   ;;  %s2384_s8 = smov 8   ;;  %v1568_v45 = vmul.f32 %v2056_v27, %v2056_v27  ;;  %v1530_v46 = vadd.f32 %v2056_v27, %v1529_v43  ;;  %v1598_v47 = vadd.f32 %v1597_v42, %v1567_v44  ;;  %v1569_v48 = vmul.f32 %v2058_v36, %v2058_v36 }
 0x19b   : > { %2105 = dma.vmem_to_hbm [thread:$0]  (%p2500_p12), %s2722_s9, 4096, %s2720_s4, %s1611_s5, %s2383_s20, %s2383_s20, %s2384_s8   ;;  %vm1607_vm2 = vcmask 1040384  }
 0x19c   : > { %v1531_v49 = vadd.f32 %v2058_v36, %v1530_v46  ;;  %v1599_v50 = vadd.f32 %v1598_v47, %v1568_v45  ;;  %s1765_s29 = sshll.u32 %s2551_s6, 1  ;;  %s1869_s9 = sshll.u32 %s2427_s16, 5 }
 0x19d   : > { %s214_s25 = scalar_lea.vmem [#allocation9], %s1765_s29  ;;  %s2756_s22 = scalar_lea.hbm %s2803_s3, %s1869_s9 }
 0x19e   : > { %v1532_v51 = vrot.slane %v1531_v49, 4  ;;  %v1600_v52 = vadd.f32 %v1599_v50, %v1569_v48  ;;  %s1645_s4 = sshll.u32 %s214_s25, 4  ;;  %s1616_s23 = scalar_lea.sflag [#allocation10], %s2551_s6  ;;  %s2758_s4 = int_to_ptr.vmem [resolvable:$true] %s1645_s4 }
 0x19f   : > { %s2302_s28 = scalar_lea.vmem %s2758_s4, 32  ;;  %s2385_s16 = smov [#allocation9]  }
 0x1a0   : > { %v1533_v53 = vadd.f32 %v1532_v51, %v1531_v49  ;;  %v1601_v54 = vrot.slane %v1600_v52, 4  ;;  %p2303_p10 = scmp.ne.s32.totalorder %s2758_s4, %s2302_s28  ;;  %s2306_s26 = sshll.u32 %s2385_s16, 4  ;;  %s2307_s26 = int_to_ptr.vmem [resolvable:$false] %s2306_s26 }
 0x1a1   : > { %s2308_s30 = scalar_lea.vmem %s2307_s26, 64  ;;  %p2309_p7 = scmp.lt.s32.totalorder %s2758_s4, %s2307_s26 }
 0x1a2   : > { %v1534_v55 = vrot.slane %v1533_v53, 2  ;;  %v1602_v56 = vadd.f32 %v1601_v54, %v1600_v52  ;;  %p2304_p11 = pnand %p2303_p10, %p2500_p12  ;;  %p2310_p9 = scmp.lt.s32.totalorder %s2308_s30, %s2302_s28 }
 0x1a4   : > { %v1535_v57 = vadd.f32 %v1534_v55, %v1533_v53  ;;  %v1603_v58 = vrot.slane %v1602_v56, 2  ;;  %p2305_p3 = pneg %p2304_p11  ;;  %p2311_p1 = por %p2310_p9, %p2309_p7 }
 0x1a6   : > { %v1536_v59 = vrot.slane %v1535_v57, 1  ;;  %v1604_v60 = vadd.f32 %v1603_v58, %v1602_v56  ;;  %p2312_p0 = pnand %p2311_p1, %p2305_p3 }
 0x1a8   : > { %v1605_v61 = vrot.slane %v1604_v60, 1  ;;  %v1537_v62 = vadd.f32 %v1536_v59, %v1535_v57 }
 0x1aa   : > { %v1606_v63 = vadd.f32 %v1605_v61, %v1604_v60 }
 0x1ac   : > { %v1608_v0 = vsel %vm1607_vm2, %v1537_v62, %v1606_v63 }
 0x1ad   : > { %1609 = vst [vmem:[%s214_s25] sm:$0x3] %v1608_v0 }
 0x1ae   : > { %2315 = shalt.err (!%p2312_p0)
}
 0x1af   : > { %s2316_s6 = scalar_lea.hbm %s2756_s22, 32  ;;  %s2320_s11 = scalar_lea.hbm %s2803_s3, 64 }
 0x1b0   : > { %p2317_p5 = scmp.ne.s32.totalorder %s2756_s22, %s2316_s6  ;;  %p2321_p4 = scmp.lt.u32.totalorder %s2756_s22, %s2803_s3 }
 0x1b1   : > { %p2322_p6 = scmp.lt.u32.totalorder %s2320_s11, %s2316_s6  ;;  %p2324_p10 = scmp.lt.u32.totalorder %s2316_s6, %s2756_s22 }
 0x1b2   : > { %p2318_p13 = pnand %p2317_p5, %p2500_p12 }
 0x1b3   : > { %p2323_p8 = por %p2322_p6, %p2321_p4 }
 0x1b4   : > { %p2319_p2 = pneg %p2318_p13 }
 0x1b5   : > { %p2325_p11 = por %p2324_p10, %p2323_p8 }
 0x1b7   : > { %p2326_p3 = pnand %p2325_p11, %p2319_p2 }
 0x1b9   : > { %2329 = shalt.err (!%p2326_p3)
}
 0x1ba   : > { %2106 = dma.vmem_to_hbm [thread:$0]  (%p2500_p12), %s2758_s4, 32, %s2756_s22, %s1616_s23  }
 0x1bb PF: > { %s1657_s8 = sand.u32 1, %s2364_s12   ;;  %p2818_p7 = scmp.ne.s32.totalorder %s2808_s19, 0 }
 0x1bc   : > { %p2819_p9 = scmp.ge.s32.totalorder %s2376_s15, 2  ;;  %s1658_s29 = scalar_lea.sflag [#allocation5], %s1657_s8 }
 0x1be   : > { %p2118_p1 = pnand %p2819_p9, %p2818_p7 }
 0x1c0   : > { %2355 = dma.done.wait (!%p2118_p1), %s1658_s29, 4096  }
 0x1c1   : > { %2357 = vsyncadd (!%p2118_p1), %s1658_s29, 4294963200  ;;  %s1667_s9 = scalar_lea.sflag [#allocation10], %s1657_s8 }
 0x1c2   : > { %2359 = dma.done.wait (!%p2118_p1), %s1667_s9, 32  }
 0x1c3   : > { %2361 = vsyncadd (!%p2118_p1), %s1667_s9, 4294967264  ;;  %p21_p12 = scmp.ge.s32.totalorder %s2462_s24, 4   ;;  %s2820_s12 = smov %s2368_s13 }
 0x1c4   : > { %s2821_s13 = smov %s2372_s14  ;;  %s2822_s14 = smov %s2496_s17 }
 0x1c5   : > { %s2823_s15 = smov %s2462_s24  ;;  %23 = sbr.rel (!%p21_p12) target bundleno = 8 (0x8), region = 96 }
 0x1cc   :  { %1672 = vsyncpa [#allocation4], 1 }
 0x1cd   :  { %1674 = vsyncpa [#allocation4 + $0x1], 1 }
 0x1ce   :  { %1675 = vsyncpa [#allocation7], 1 }
 0x1cf   :  { %1676 = vsyncpa [#allocation5], 1 }
 0x1d0   :  { %1678 = vsyncpa [#allocation5 + $0x1], 1 }
 0x1d1   :  { %1679 = vsyncpa [#allocation10], 1 }
 0x1d2   :  { %1681 = vsyncpa [#allocation10 + $0x1], 1 }

// kernel: basic_block_forward.6
= control target key start
LH: loop header
LB: loop body
LE: loop exit
PB: predicated region body
PF: predicated region fallthrough
CT: control target
= control target key end

     0   :  { %9 = vsyncpa [#allocation4], 0  ;;  %s1668_s0 = inlined_call_operand.hbm [shape: bf16[2,256,4], index: 0, kind: input, shape index: {}]   ;;  %s1669_s1 = inlined_call_operand.hbm [shape: bf16[1,4,128], index: 1, kind: input, shape index: {}]   ;;  %s1670_s2 = inlined_call_operand.hbm [shape: f32[2,256,128], index: 2, kind: output, shape index: {0}]   ;;  %s1671_s3 = inlined_call_operand.hbm [shape: f32[2,2,128], index: 3, kind: output, shape index: {1}]  }
   0x1   :  { %11 = vsyncpa [#allocation4 + $0x1], 0 }
   0x2   :  { %12 = vsyncpa [#allocation7], 0 }
   0x3   :  { %13 = vsyncpa [#allocation5], 0 }
   0x4   :  { %15 = vsyncpa [#allocation5 + $0x1], 0 }
   0x5   :  { %16 = vsyncpa [#allocation10], 0 }
   0x6   :  { %18 = vsyncpa [#allocation10 + $0x1], 0  ;;  %s1273_s12 = smov 0   ;;  %s1275_s13 = smov 0  }
   0x7   :  { %s1277_s14 = smov 0   ;;  %s1279_s15 = smov 0  }
   0x8 LB: > { %s1294_s16 = sadd.s32 4294967295, %s1243_s15   ;;  %s893_s17 = sadd.s32 4294967294, %s1243_s15   ;;  %s1243_s15 = sphi %s1279_s15, %s1696_s15   ;;  %s1239_s14 = sphi %s1277_s14, %s1695_s14   ;;  %s1235_s13 = sphi %s1275_s13, %s1694_s13   ;;  %s1231_s12 = sphi %s1273_s12, %s1693_s12  }
   0x9   : > { %s1298_s18 = sadd.s32 1, %s1243_s15   ;;  %s31_s19 = sadd.s32 1, %s1239_s14 }
   0xa   : > { %s28_s20 = ssub.s32 %s1243_s15, %s1298_s18  ;;  %p38_p0 = scmp.ne.s32.totalorder %s1239_s14, %s1235_s13 }
   0xb   : > { %p29_p1 = scmp.eq.s32.totalorder %s28_s20, 0  ;;  %p39_p2 = scmp.eq.s32.totalorder %s1243_s15, 0 }
   0xc   : > { %p44_p3 = scmp.ne.s32.totalorder %s1235_s13, %s1231_s12  ;;  %p1672_p4 = scmp.eq.s32.totalorder %s1294_s16, 0 }
   0xd   : > { %s1310_s21 = scalar_select %p29_p1, %s1239_s14, %s31_s19  }
   0xe   : > { %p1312_p5 = por %p39_p2, %p38_p0  ;;  %p1318_p6 = por %p1672_p4, %p44_p3 }
   0xf   : > { %p89_p7 = scmp.eq.s32.totalorder %s1294_s16, 1  ;;  %p95_p8 = scmp.eq.s32.totalorder %s893_s17, 1 }
  0x10   : > { %s1678_s23 = scalar_select %p1318_p6, 1, 0 }
  0x11   : > { %p894_p9 = scmp.ge.s32.totalorder %s1243_s15, 1  ;;  %p128_p10 = scmp.lt.s32.totalorder %s1243_s15, 3 }
  0x12   : > { %p1325_p11 = por %p89_p7, %p38_p0  ;;  %p1329_p12 = por %p95_p8, %p44_p3 }
  0x13   : > { %p1333_p13 = pnand %p894_p9, %p128_p10  ;;  %s1245_s27 = smov [#allocation6]  }
  0x14   : > { %s1679_s24 = scalar_select %p1325_p11, 1, 0 }
  0x15   : > { %s1680_s25 = scalar_select %p1329_p12, 1, 0 }
  0x16   : > { %s1681_s26 = scalar_select %p1333_p13, 1, 0 }
  0x17   : > { %p1011_p2 = pneg %p1333_p13  ;;  %s141_s28 = sshll.u32 %s1245_s27, 4  ;;  %s142_s28 = int_to_ptr.vmem [resolvable:$true] %s141_s28 }
  0x18   : > { %p1027_p4 = scmp.lt.s32.totalorder %s1243_s15, 2  ;;  %p1682_p0 = scmp.eq.s32.totalorder %s1294_s16, 0 }
  0x19   : > { %s152_s30 = sand.u32 1, %s1239_s14   ;;  %s1083_s8 = scalar_lea.hbm %s1669_s1, 32 }
  0x1a   : > { %p1343_p7 = pnand %p1011_p2, %p1682_p0  ;;  %p1350_p3 = pnand %p1027_p4, %p1312_p5 }
  0x1b   : > { %s897_s5 = sshll.u32 %s152_s30, 7  ;;  %p1084_p8 = scmp.ne.s32.totalorder %s1669_s1, %s1083_s8 }
  0x1c   : > { %s1684_s4 = scalar_select %p1350_p3, 1, 0 }
  0x1d   : > { %p1085_p9 = pneg %p1343_p7  ;;  %p1090_p4 = scmp.lt.u32.totalorder %s1083_s8, %s1669_s1 }
  0x1f   : > { %p1086_p10 = pnand %p1085_p9, %p1084_p8 }
  0x21   : > { %p1087_p2 = pneg %p1086_p10 }
  0x23   : > { %p1092_p5 = pnand %p1090_p4, %p1087_p2 }
  0x25   : > { %1095 = shalt.err (!%p1092_p5)
}
  0x26   : > { %s1096_s19 = scalar_lea.vmem %s142_s28, 32  ;;  %p1104_p11 = scmp.lt.s32.totalorder %s142_s28, %s142_s28 }
  0x27   : > { %p1097_p0 = scmp.ne.s32.totalorder %s142_s28, %s1096_s19  ;;  %p1105_p6 = scmp.lt.s32.totalorder %s1096_s19, %s1096_s19 }
  0x29   : > { %p1099_p1 = pnand %p1097_p0, %p1085_p9  ;;  %p1106_p13 = por %p1105_p6, %p1104_p11 }
  0x2b   : > { %p1100_p12 = pneg %p1099_p1 }
  0x2d   : > { %p1107_p3 = pnand %p1106_p13, %p1100_p12 }
  0x2f   : > { %1110 = shalt.err (!%p1107_p3)
}
  0x30   : > { %1014 = dma.hbm_to_vmem [thread:$0]  (!%p1343_p7), %s1669_s1, 32, %s142_s28, [#allocation7]  }
  0x31   : > { %s944_s27 = sshll.u32 %s1243_s15, 11  ;;  %s156_s6 = scalar_lea.vmem [#allocation3], %s897_s5 }
  0x32   : > { %s163_s7 = sshll.u32 %s156_s6, 4  ;;  %s1374_s10 = scalar_lea.hbm %s1668_s0, %s944_s27  ;;  %s1376_s7 = int_to_ptr.vmem [resolvable:$true] %s163_s7 }
  0x33   : > { %s1378_s29 = scalar_lea.sflag [#allocation4], %s152_s30  ;;  %s1111_s11 = scalar_lea.hbm %s1374_s10, 2048 }
  0x34   : > { %p1112_p6 = scmp.ne.s32.totalorder %s1374_s10, %s1111_s11  ;;  %p1685_p11 = scmp.ne.s32.totalorder %s1684_s4, 0 }
  0x35   : > { %s1116_s17 = scalar_lea.hbm %s1668_s0, 4096  ;;  %p1117_p7 = scmp.lt.u32.totalorder %s1374_s10, %s1668_s0 }
  0x36   : > { %p1113_p12 = pneg %p1685_p11  ;;  %p1118_p3 = scmp.lt.u32.totalorder %s1116_s17, %s1111_s11 }
  0x37   : > { %p1120_p9 = scmp.lt.u32.totalorder %s1111_s11, %s1374_s10 }
  0x38   : > { %p1114_p13 = pnand %p1113_p12, %p1112_p6  ;;  %p1119_p8 = por %p1118_p3, %p1117_p7 }
  0x3a   : > { %p1115_p1 = pneg %p1114_p13  ;;  %p1121_p10 = por %p1120_p9, %p1119_p8 }
  0x3c   : > { %p1122_p2 = pnand %p1121_p10, %p1115_p1 }
  0x3e   : > { %1125 = shalt.err (!%p1122_p2)
}
  0x3f   : > { %s1126_s30 = scalar_lea.vmem %s1376_s7, 2048  ;;  %s1246_s22 = smov [#allocation3]  }
  0x40   : > { %p1127_p4 = scmp.ne.s32.totalorder %s1376_s7, %s1126_s30  ;;  %s1131_s27 = sshll.u32 %s1246_s22, 4  ;;  %s1132_s27 = int_to_ptr.vmem [resolvable:$false] %s1131_s27 }
  0x41   : > { %s1133_s6 = scalar_lea.vmem %s1132_s27, 4096  ;;  %p1134_p6 = scmp.lt.s32.totalorder %s1376_s7, %s1132_s27 }
  0x42   : > { %p1129_p5 = pnand %p1127_p4, %p1113_p12  ;;  %p1135_p13 = scmp.lt.s32.totalorder %s1133_s6, %s1126_s30 }
  0x44   : > { %p1130_p0 = pneg %p1129_p5  ;;  %p1136_p7 = por %p1135_p13, %p1134_p6 }
  0x46   : > { %p1137_p3 = pnand %p1136_p7, %p1130_p0 }
  0x48   : > { %1140 = shalt.err (!%p1137_p3)
}
  0x49   : > { %s1247_s8 = smov 64   ;;  %s1248_s9 = smov 4  }
  0x4a   : > { %1018 = dma.hbm_to_vmem [thread:$0]  (!%p1685_p11), %s1374_s10, 2048, %s1376_s7, %s1378_s29, %s1247_s8, %s1247_s8, %s1248_s9  }
  0x4b   : > { %p1686_p12 = scmp.ne.s32.totalorder %s1681_s26, 0 }
  0x4c   : > { %s1409_s11 = sand.u32 (!%p1686_p12), 1, %s1235_s13   ;;  %p1687_p1 = scmp.ne.s32.totalorder (!%p1686_p12), %s1678_s23, 0 }
  0x4d   : > { %175 = sbr.rel (%p1686_p12) target bundleno = 410 (0x19a), region = 28  ;;  %s901_s28 = sshll.u32 (!%p1686_p12), %s1409_s11, 7 }
  0x4e   : > { %s178_s5 = scalar_lea.sflag (!%p1686_p12), [#allocation4], %s1409_s11  ;;  %s1413_s17 = scalar_lea.vmem (!%p1686_p12), [#allocation3], %s901_s28 }
  0x54   : > { %1214 = dma.done.wait (%p1687_p1), %s178_s5, 2048  }
  0x55   : > { %1216 = vsyncadd (%p1687_p1), %s178_s5, 4294965248  ;;  %p1688_p11 = scmp.eq.s32.totalorder %s1294_s16, 0 }
  0x57   : > { %1218 = dma.done.wait (%p1688_p11), [#allocation7], 32   ;;  %p1689_p8 = pmov %p1688_p11 }
  0x58   : > { %vm376_vm0 = vcmask 1041408   ;;  %vm327_vm1 = vcmask 31744   ;;  %v246_v0 = vld [vmem:[#allocation6] sm:$0x3]  ;;  %v1068_v3 = vld [vmem:[%s1413_s17 + $0x8] sm:$0xff]   ;;  %v1069_v4 = vld [vmem:[%s1413_s17 + $0x10] sm:$0xff]  }
  0x59   : > { %1220 = vsyncadd (%p1689_p8), [#allocation7], 4294967264  ;;  %999 = vmatprep.subr.msk.bf16.mxu0 %vm376_vm0, %v246_v0  ;;  %v378_v1 = vsel %vm376_vm0, %v246_v0, 0  ;;  %v1067_v2 = vld [vmem:[%s1413_s17] sm:$0xff]   ;;  %1000 = vmatprep.subr.msk.bf16.mxu1 %vm376_vm0, %v246_v0  ;;  %v1070_v5 = vld [vmem:[%s1413_s17 + $0x18] sm:$0xff]   ;;  %s903_s23 = sshll.u32 %s1409_s11, 8 }
  0x5a   : > { %964 = vmatpush3.bf16.msra.mxu0 %v378_v1  ;;  %998 = vmatpush3.bf16.msra.mxu1 %v378_v1  ;;  %v1071_v6 = vld [vmem:[%s1413_s17 + $0x20] sm:$0xff]   ;;  %v1076_v8 = vld [vmem:[%s1413_s17 + $0x48] sm:$0xff]   ;;  %v1077_v9 = vld [vmem:[%s1413_s17 + $0x50] sm:$0xff]   ;;  %s1456_s26 = scalar_lea.vmem [#allocation8], %s903_s23  ;;  %s945_s4 = sshll.u32 %s1294_s16, 12 }
  0x5b   : > { %965 = vmatprep.mubr.msk.bf16.mxu0 %vm327_vm1, %v1067_v2  ;;  %v1075_v7 = vld [vmem:[%s1413_s17 + $0x40] sm:$0xff]   ;;  %v1078_v10 = vld [vmem:[%s1413_s17 + $0x58] sm:$0xff]   ;;  %v1072_v11 = vld [vmem:[%s1413_s17 + $0x28] sm:$0xff]   ;;  %s765_s7 = sshll.u32 %s1456_s26, 4  ;;  %s1535_s19 = scalar_lea.hbm %s1670_s2, %s945_s4  ;;  %s1537_s7 = int_to_ptr.vmem [resolvable:$true] %s765_s7 }
  0x5c   : > { %981 = vmatprep.mubr.msk.bf16.mxu1 %vm327_vm1, %v1075_v7  ;;  %v1079_v12 = vld [vmem:[%s1413_s17 + $0x60] sm:$0xff]   ;;  %v1073_v13 = vld [vmem:[%s1413_s17 + $0x30] sm:$0xff]   ;;  %v1080_v14 = vld [vmem:[%s1413_s17 + $0x68] sm:$0xff]   ;;  %s747_s20 = scalar_lea.sflag [#allocation5], %s1409_s11  ;;  %s1141_s30 = scalar_lea.vmem %s1537_s7, 4096 }
  0x5d   : > { %966 = vmatmul.mubr.msk.bf16.vlgmr.msra.gmra.mrb[0].mxu0 %vm327_vm1, %v1068_v3  ;;  %982 = vmatmul.mubr.msk.bf16.vlgmr.msra.gmra.mrb[0].mxu1 %vm327_vm1, %v1076_v8  ;;  %v1074_v15 = vld [vmem:[%s1413_s17 + $0x38] sm:$0xff]   ;;  %v1081_v16 = vld [vmem:[%s1413_s17 + $0x70] sm:$0xff]   ;;  %p1142_p9 = scmp.ne.s32.totalorder %s1537_s7, %s1141_s30  ;;  %p1690_p10 = scmp.ne.s32.totalorder %s1679_s24, 0 }
  0x5e   : > { %969 = vmatprep.mubr.msk.bf16.mxu0 %vm327_vm1, %v1069_v4  ;;  %985 = vmatprep.mubr.msk.bf16.mxu1 %vm327_vm1, %v1077_v9  ;;  %v1082_v17 = vld [vmem:[%s1413_s17 + $0x78] sm:$0xff]   ;;  %s1249_s22 = smov [#allocation8]  }
  0x5f   : > { %p1143_p2 = pnand %p1142_p9, %p1690_p10  ;;  %s1145_s27 = sshll.u32 %s1249_s22, 4  ;;  %s1146_s27 = int_to_ptr.vmem [resolvable:$false] %s1145_s27 }
  0x60   : > { %s1147_s6 = scalar_lea.vmem %s1146_s27, 8192  ;;  %p1148_p5 = scmp.lt.s32.totalorder %s1537_s7, %s1146_s27 }
  0x61   : > { %p1144_p4 = pneg %p1143_p2  ;;  %p1149_p0 = scmp.lt.s32.totalorder %s1147_s6, %s1141_s30 }
  0x63   : > { %p1150_p6 = por %p1149_p0, %p1148_p5 }
  0x65   : > { %970 = vmatmul.mubr.msk.bf16.gmra.mrb[4].mxu0 %vm327_vm1, %v1070_v5  ;;  %986 = vmatmul.mubr.msk.bf16.gmra.mrb[4].mxu1 %vm327_vm1, %v1078_v10  ;;  %p1151_p13 = pnand %p1150_p6, %p1144_p4 }
  0x66   : > { %973 = vmatprep.mubr.msk.bf16.mxu0 %vm327_vm1, %v1071_v6  ;;  %989 = vmatprep.mubr.msk.bf16.mxu1 %vm327_vm1, %v1079_v12 }
  0x6d   : > { %974 = vmatmul.mubr.msk.bf16.gmra.mrb[8].mxu0 %vm327_vm1, %v1072_v11  ;;  %990 = vmatmul.mubr.msk.bf16.gmra.mrb[8].mxu1 %vm327_vm1, %v1080_v14 }
  0x6e   : > { %977 = vmatprep.mubr.msk.bf16.mxu0 %vm327_vm1, %v1073_v13  ;;  %993 = vmatprep.mubr.msk.bf16.mxu1 %vm327_vm1, %v1081_v16 }
  0x75   : > { %978 = vmatmul.mubr.msk.bf16.gmra.mrb[12].mxu0 %vm327_vm1, %v1074_v15  ;;  %994 = vmatmul.mubr.msk.bf16.gmra.mrb[12].mxu1 %vm327_vm1, %v1082_v17 }
 0x130   : > { %v967_v18 = vpop.f32.mrb[0].mxu0  ;;  %v1462_v28 = vpop.f32.mrb[0].mxu1 }
 0x131   : > { %607 = vst [vmem:[%s1456_s26 + $0x10] sm:$0xff] %v967_v18  ;;  %v414_v19 = vpop.f32.mrb[1].mxu0  ;;  %v676_v25 = vmul.f32 %v967_v18, %v967_v18  ;;  %623 = vst [vmem:[%s1456_s26 + $0x90] sm:$0xff] %v1462_v28  ;;  %v1466_v33 = vpop.f32.mrb[1].mxu1 }
 0x132   : > { %605 = vst [vmem:[%s1456_s26] sm:$0xff] %v414_v19  ;;  %v968_v20 = vpop.f32.mrb[2].mxu0  ;;  %v674_v22 = vmul.f32 %v414_v19, %v414_v19  ;;  %621 = vst [vmem:[%s1456_s26 + $0x80] sm:$0xff] %v1466_v33  ;;  %v1471_v35 = vpop.f32.mrb[2].mxu1 }
 0x133   : > { %608 = vst [vmem:[%s1456_s26 + $0x18] sm:$0xff] %v968_v20  ;;  %v417_v21 = vpop.f32.mrb[3].mxu0  ;;  %v677_v29 = vmul.f32 %v968_v20, %v968_v20  ;;  %624 = vst [vmem:[%s1456_s26 + $0x98] sm:$0xff] %v1471_v35  ;;  %v1476_v40 = vpop.f32.mrb[3].mxu1 }
 0x134   : > { %606 = vst [vmem:[%s1456_s26 + $0x8] sm:$0xff] %v417_v21  ;;  %v637_v23 = vadd.f32 %v417_v21, %v414_v19  ;;  %v675_v24 = vmul.f32 %v417_v21, %v417_v21  ;;  %622 = vst [vmem:[%s1456_s26 + $0x88] sm:$0xff] %v1476_v40 }
 0x136   : > { %v638_v26 = vadd.f32 %v967_v18, %v637_v23  ;;  %v706_v27 = vadd.f32 %v675_v24, %v674_v22 }
 0x138   : > { %v707_v30 = vadd.f32 %v706_v27, %v676_v25  ;;  %v971_v31 = vpop.f32.mrb[4].mxu0  ;;  %v639_v32 = vadd.f32 %v968_v20, %v638_v26  ;;  %v1482_v48 = vpop.f32.mrb[4].mxu1 }
 0x139   : > { %611 = vst [vmem:[%s1456_s26 + $0x30] sm:$0xff] %v971_v31  ;;  %v430_v34 = vpop.f32.mrb[5].mxu0  ;;  %v680_v45 = vmul.f32 %v971_v31, %v971_v31  ;;  %627 = vst [vmem:[%s1456_s26 + $0xb0] sm:$0xff] %v1482_v48  ;;  %v1486_v53 = vpop.f32.mrb[5].mxu1 }
 0x13a   : > { %609 = vst [vmem:[%s1456_s26 + $0x20] sm:$0xff] %v430_v34  ;;  %v640_v36 = vadd.f32 %v639_v32, %v430_v34  ;;  %v678_v37 = vmul.f32 %v430_v34, %v430_v34  ;;  %v708_v38 = vadd.f32 %v707_v30, %v677_v29  ;;  %v972_v39 = vpop.f32.mrb[6].mxu0  ;;  %625 = vst [vmem:[%s1456_s26 + $0xa0] sm:$0xff] %v1486_v53  ;;  %v1491_v55 = vpop.f32.mrb[6].mxu1 }
 0x13b   : > { %612 = vst [vmem:[%s1456_s26 + $0x38] sm:$0xff] %v972_v39  ;;  %v433_v41 = vpop.f32.mrb[7].mxu0  ;;  %v681_v49 = vmul.f32 %v972_v39, %v972_v39  ;;  %628 = vst [vmem:[%s1456_s26 + $0xb8] sm:$0xff] %v1491_v55  ;;  %v1496_v60 = vpop.f32.mrb[7].mxu1  ;;  %v690_v29 = vmul.f32 %v1466_v33, %v1466_v33 }
 0x13c   : > { %v709_v42 = vadd.f32 %v708_v38, %v678_v37  ;;  %610 = vst [vmem:[%s1456_s26 + $0x28] sm:$0xff] %v433_v41  ;;  %v641_v43 = vadd.f32 %v640_v36, %v433_v41  ;;  %v679_v44 = vmul.f32 %v433_v41, %v433_v41  ;;  %626 = vst [vmem:[%s1456_s26 + $0xa8] sm:$0xff] %v1496_v60 }
 0x13e   : > { %v642_v46 = vadd.f32 %v971_v31, %v641_v43  ;;  %v710_v47 = vadd.f32 %v709_v42, %v679_v44 }
 0x140   : > { %v711_v50 = vadd.f32 %v710_v47, %v680_v45  ;;  %v975_v51 = vpop.f32.mrb[8].mxu0  ;;  %v643_v52 = vadd.f32 %v972_v39, %v642_v46  ;;  %v1502_v4 = vpop.f32.mrb[8].mxu1  ;;  %v691_v39 = vmul.f32 %v1476_v40, %v1476_v40 }
 0x141   : > { %615 = vst [vmem:[%s1456_s26 + $0x50] sm:$0xff] %v975_v51  ;;  %v446_v54 = vpop.f32.mrb[9].mxu0  ;;  %v684_v1 = vmul.f32 %v975_v51, %v975_v51  ;;  %631 = vst [vmem:[%s1456_s26 + $0xd0] sm:$0xff] %v1502_v4  ;;  %v1506_v9 = vpop.f32.mrb[9].mxu1 }
 0x142   : > { %613 = vst [vmem:[%s1456_s26 + $0x40] sm:$0xff] %v446_v54  ;;  %v644_v56 = vadd.f32 %v643_v52, %v446_v54  ;;  %v682_v57 = vmul.f32 %v446_v54, %v446_v54  ;;  %v712_v58 = vadd.f32 %v711_v50, %v681_v49  ;;  %v976_v59 = vpop.f32.mrb[10].mxu0  ;;  %629 = vst [vmem:[%s1456_s26 + $0xc0] sm:$0xff] %v1506_v9  ;;  %v1511_v11 = vpop.f32.mrb[10].mxu1 }
 0x143   : > { %616 = vst [vmem:[%s1456_s26 + $0x58] sm:$0xff] %v976_v59  ;;  %v449_v61 = vpop.f32.mrb[11].mxu0  ;;  %v685_v5 = vmul.f32 %v976_v59, %v976_v59  ;;  %632 = vst [vmem:[%s1456_s26 + $0xd8] sm:$0xff] %v1511_v11  ;;  %v1516_v16 = vpop.f32.mrb[11].mxu1 }
 0x144   : > { %v713_v62 = vadd.f32 %v712_v58, %v682_v57  ;;  %614 = vst [vmem:[%s1456_s26 + $0x48] sm:$0xff] %v449_v61  ;;  %v645_v63 = vadd.f32 %v644_v56, %v449_v61  ;;  %v683_v0 = vmul.f32 %v449_v61, %v449_v61  ;;  %630 = vst [vmem:[%s1456_s26 + $0xc8] sm:$0xff] %v1516_v16 }
 0x146   : > { %v646_v2 = vadd.f32 %v975_v51, %v645_v63  ;;  %v714_v3 = vadd.f32 %v713_v62, %v683_v0 }
 0x148   : > { %v715_v6 = vadd.f32 %v714_v3, %v684_v1  ;;  %v979_v7 = vpop.f32.mrb[12].mxu0  ;;  %v647_v8 = vadd.f32 %v976_v59, %v646_v2  ;;  %v1524_v24 = vpop.f32.mrb[12].mxu1 }
 0x149   : > { %619 = vst [vmem:[%s1456_s26 + $0x70] sm:$0xff] %v979_v7  ;;  %v462_v10 = vpop.f32.mrb[13].mxu0  ;;  %v688_v21 = vmul.f32 %v979_v7, %v979_v7  ;;  %635 = vst [vmem:[%s1456_s26 + $0xf0] sm:$0xff] %v1524_v24  ;;  %v1530_v30 = vpop.f32.mrb[13].mxu1 }
 0x14a   : > { %617 = vst [vmem:[%s1456_s26 + $0x60] sm:$0xff] %v462_v10  ;;  %v648_v12 = vadd.f32 %v647_v8, %v462_v10  ;;  %v686_v13 = vmul.f32 %v462_v10, %v462_v10  ;;  %v716_v14 = vadd.f32 %v715_v6, %v685_v5  ;;  %v980_v15 = vpop.f32.mrb[14].mxu0  ;;  %633 = vst [vmem:[%s1456_s26 + $0xe0] sm:$0xff] %v1530_v30  ;;  %v1541_v31 = vpop.f32.mrb[14].mxu1 }
 0x14b   : > { %620 = vst [vmem:[%s1456_s26 + $0x78] sm:$0xff] %v980_v15  ;;  %v465_v17 = vpop.f32.mrb[15].mxu0  ;;  %v689_v25 = vmul.f32 %v980_v15, %v980_v15  ;;  %636 = vst [vmem:[%s1456_s26 + $0xf8] sm:$0xff] %v1541_v31  ;;  %v1546_v36 = vpop.f32.mrb[15].mxu1 }
 0x14c   : > { %v717_v18 = vadd.f32 %v716_v14, %v686_v13  ;;  %618 = vst [vmem:[%s1456_s26 + $0x68] sm:$0xff] %v465_v17  ;;  %v649_v19 = vadd.f32 %v648_v12, %v465_v17  ;;  %v687_v20 = vmul.f32 %v465_v17, %v465_v17  ;;  %634 = vst [vmem:[%s1456_s26 + $0xe8] sm:$0xff] %v1546_v36 }
 0x14e   : > { %v650_v22 = vadd.f32 %v979_v7, %v649_v19  ;;  %v718_v23 = vadd.f32 %v717_v18, %v687_v20 }
 0x150   : > { %v719_v26 = vadd.f32 %v718_v23, %v688_v21  ;;  %v651_v27 = vadd.f32 %v980_v15, %v650_v22 }
 0x152   : > { %v652_v32 = vadd.f32 %v651_v27, %v1466_v33  ;;  %v720_v34 = vadd.f32 %v719_v26, %v689_v25 }
 0x154   : > { %v721_v37 = vadd.f32 %v720_v34, %v690_v29  ;;  %v653_v38 = vadd.f32 %v652_v32, %v1476_v40 }
 0x155   : > { %1154 = shalt.err (!%p1151_p13)
}
 0x156   : > { %s1155_s8 = scalar_lea.hbm %s1535_s19, 4096  ;;  %s1159_s5 = scalar_lea.hbm %s1670_s2, 8192 }
 0x157   : > { %p1156_p7 = scmp.ne.s32.totalorder %s1535_s19, %s1155_s8  ;;  %p1160_p1 = scmp.lt.u32.totalorder %s1535_s19, %s1670_s2 }
 0x158   : > { %p1161_p11 = scmp.lt.u32.totalorder %s1159_s5, %s1155_s8  ;;  %p1163_p9 = scmp.lt.u32.totalorder %s1155_s8, %s1535_s19 }
 0x159   : > { %p1157_p3 = pnand %p1156_p7, %p1690_p10 }
 0x15a   : > { %p1162_p8 = por %p1161_p11, %p1160_p1 }
 0x15b   : > { %p1158_p12 = pneg %p1157_p3 }
 0x15c   : > { %p1164_p2 = por %p1163_p9, %p1162_p8 }
 0x15e   : > { %p1165_p4 = pnand %p1164_p2, %p1158_p12 }
 0x160   : > { %1168 = shalt.err (!%p1165_p4)
}
 0x161   : > { %s1250_s26 = smov 128   ;;  %s1251_s4 = smov 8   ;;  %v692_v33 = vmul.f32 %v1462_v28, %v1462_v28  ;;  %v654_v40 = vadd.f32 %v1462_v28, %v653_v38  ;;  %v722_v41 = vadd.f32 %v721_v37, %v691_v39  ;;  %v693_v42 = vmul.f32 %v1471_v35, %v1471_v35 }
 0x162   : > { %1007 = dma.vmem_to_hbm [thread:$0]  (%p1690_p10), %s1537_s7, 4096, %s1535_s19, %s747_s20, %s1250_s26, %s1250_s26, %s1251_s4   ;;  %v694_v45 = vmul.f32 %v1486_v53, %v1486_v53  ;;  %v695_v51 = vmul.f32 %v1496_v60, %v1496_v60  ;;  %v696_v28 = vmul.f32 %v1482_v48, %v1482_v48  ;;  %v699_v62 = vmul.f32 %v1516_v16, %v1516_v16 }
 0x163   : > { %v723_v43 = vadd.f32 %v722_v41, %v692_v33  ;;  %v655_v44 = vadd.f32 %v1471_v35, %v654_v40  ;;  %v697_v35 = vmul.f32 %v1491_v55, %v1491_v55  ;;  %v702_v3 = vmul.f32 %v1530_v30, %v1530_v30  ;;  %s904_s7 = sshll.u32 %s1409_s11, 1  ;;  %s941_s10 = sshll.u32 %s1294_s16, 5 }
 0x164   : > { %s212_s29 = scalar_lea.vmem [#allocation9], %s904_s7  ;;  %vm743_vm2 = vcmask 1040384   ;;  %s1624_s22 = scalar_lea.hbm %s1671_s3, %s941_s10 }
 0x165   : > { %v656_v46 = vadd.f32 %v655_v44, %v1486_v53  ;;  %v724_v47 = vadd.f32 %v723_v43, %v693_v42  ;;  %v698_v53 = vmul.f32 %v1506_v9, %v1506_v9  ;;  %s781_s19 = sshll.u32 %s212_s29, 4  ;;  %s752_s27 = scalar_lea.sflag [#allocation10], %s1409_s11  ;;  %s1626_s19 = int_to_ptr.vmem [resolvable:$true] %s781_s19 }
 0x166   : > { %s1169_s6 = scalar_lea.vmem %s1626_s19, 32  ;;  %s1252_s16 = smov [#allocation9]  }
 0x167   : > { %v725_v49 = vadd.f32 %v724_v47, %v694_v45  ;;  %v657_v50 = vadd.f32 %v656_v46, %v1496_v60  ;;  %p1170_p5 = scmp.ne.s32.totalorder %s1626_s19, %s1169_s6  ;;  %s1173_s8 = sshll.u32 %s1252_s16, 4  ;;  %s1174_s8 = int_to_ptr.vmem [resolvable:$false] %s1173_s8 }
 0x168   : > { %s1175_s9 = scalar_lea.vmem %s1174_s8, 64  ;;  %p1176_p13 = scmp.lt.s32.totalorder %s1626_s19, %s1174_s8 }
 0x169   : > { %v658_v52 = vadd.f32 %v1482_v48, %v657_v50  ;;  %v726_v54 = vadd.f32 %v725_v49, %v695_v51  ;;  %v700_v48 = vmul.f32 %v1502_v4, %v1502_v4  ;;  %p1171_p0 = pnand %p1170_p5, %p1690_p10  ;;  %p1177_p7 = scmp.lt.s32.totalorder %s1175_s9, %s1169_s6 }
 0x16b   : > { %v727_v56 = vadd.f32 %v726_v54, %v696_v28  ;;  %v659_v57 = vadd.f32 %v1491_v55, %v658_v52  ;;  %v701_v55 = vmul.f32 %v1511_v11, %v1511_v11  ;;  %p1172_p6 = pneg %p1171_p0  ;;  %p1178_p3 = por %p1177_p7, %p1176_p13 }
 0x16d   : > { %v660_v58 = vadd.f32 %v659_v57, %v1506_v9  ;;  %v728_v59 = vadd.f32 %v727_v56, %v697_v35  ;;  %v704_v9 = vmul.f32 %v1524_v24, %v1524_v24  ;;  %p1179_p12 = pnand %p1178_p3, %p1172_p6 }
 0x16f   : > { %v729_v61 = vadd.f32 %v728_v59, %v698_v53  ;;  %v661_v60 = vadd.f32 %v660_v58, %v1516_v16 }
 0x171   : > { %v662_v63 = vadd.f32 %v1502_v4, %v661_v60  ;;  %v730_v0 = vadd.f32 %v729_v61, %v699_v62  ;;  %v703_v4 = vmul.f32 %v1546_v36, %v1546_v36 }
 0x173   : > { %v731_v1 = vadd.f32 %v730_v0, %v700_v48  ;;  %v663_v2 = vadd.f32 %v1511_v11, %v662_v63  ;;  %v705_v11 = vmul.f32 %v1541_v31, %v1541_v31 }
 0x175   : > { %v664_v5 = vadd.f32 %v663_v2, %v1530_v30  ;;  %v732_v6 = vadd.f32 %v731_v1, %v701_v55 }
 0x177   : > { %v733_v7 = vadd.f32 %v732_v6, %v702_v3  ;;  %v665_v8 = vadd.f32 %v664_v5, %v1546_v36 }
 0x179   : > { %v666_v10 = vadd.f32 %v1524_v24, %v665_v8  ;;  %v734_v12 = vadd.f32 %v733_v7, %v703_v4 }
 0x17b   : > { %v667_v13 = vadd.f32 %v1541_v31, %v666_v10  ;;  %v735_v14 = vadd.f32 %v734_v12, %v704_v9 }
 0x17d   : > { %v668_v15 = vrot.slane %v667_v13, 4  ;;  %v736_v16 = vadd.f32 %v735_v14, %v705_v11 }
 0x17f   : > { %v669_v17 = vadd.f32 %v668_v15, %v667_v13  ;;  %v737_v18 = vrot.slane %v736_v16, 4 }
 0x181   : > { %v670_v19 = vrot.slane %v669_v17, 2  ;;  %v738_v20 = vadd.f32 %v737_v18, %v736_v16 }
 0x183   : > { %v671_v21 = vadd.f32 %v670_v19, %v669_v17  ;;  %v739_v22 = vrot.slane %v738_v20, 2 }
 0x185   : > { %v672_v23 = vrot.slane %v671_v21, 1  ;;  %v740_v24 = vadd.f32 %v739_v22, %v738_v20 }
 0x187   : > { %v741_v25 = vrot.slane %v740_v24, 1  ;;  %v673_v26 = vadd.f32 %v672_v23, %v671_v21 }
 0x189   : > { %v742_v27 = vadd.f32 %v741_v25, %v740_v24 }
 0x18b   : > { %v744_v29 = vsel %vm743_vm2, %v673_v26, %v742_v27 }
 0x18c   : > { %745 = vst [vmem:[%s212_s29] sm:$0x3] %v744_v29 }
 0x18d   : > { %1182 = shalt.err (!%p1179_p12)
}
 0x18e   : > { %s1183_s11 = scalar_lea.hbm %s1624_s22, 32  ;;  %s1187_s17 = scalar_lea.hbm %s1671_s3, 64 }
 0x18f   : > { %p1184_p1 = scmp.ne.s32.totalorder %s1624_s22, %s1183_s11  ;;  %p1188_p9 = scmp.lt.u32.totalorder %s1624_s22, %s1671_s3 }
 0x190   : > { %p1189_p2 = scmp.lt.u32.totalorder %s1187_s17, %s1183_s11  ;;  %p1191_p5 = scmp.lt.u32.totalorder %s1183_s11, %s1624_s22 }
 0x191   : > { %p1185_p11 = pnand %p1184_p1, %p1690_p10 }
 0x192   : > { %p1190_p4 = por %p1189_p2, %p1188_p9 }
 0x193   : > { %p1186_p8 = pneg %p1185_p11 }
 0x194   : > { %p1192_p0 = por %p1191_p5, %p1190_p4 }
 0x196   : > { %p1193_p6 = pnand %p1192_p0, %p1186_p8 }
 0x198   : > { %1196 = shalt.err (!%p1193_p6)
}
 0x199   : > { %1008 = dma.vmem_to_hbm [thread:$0]  (%p1690_p10), %s1626_s19, 32, %s1624_s22, %s752_s27  }
 0x19a PF: > { %s793_s4 = sand.u32 1, %s1231_s12   ;;  %p1691_p13 = scmp.ne.s32.totalorder %s1680_s25, 0 }
 0x19b   : > { %p1692_p7 = scmp.ge.s32.totalorder %s1243_s15, 2  ;;  %s794_s7 = scalar_lea.sflag [#allocation5], %s793_s4 }
 0x19d   : > { %p1020_p3 = pnand %p1692_p7, %p1691_p13 }
 0x19f   : > { %1222 = dma.done.wait (!%p1020_p3), %s794_s7, 4096  }
 0x1a0   : > { %1224 = vsyncadd (!%p1020_p3), %s794_s7, 4294963200  ;;  %s803_s10 = scalar_lea.sflag [#allocation10], %s793_s4 }
 0x1a1   : > { %1226 = dma.done.wait (!%p1020_p3), %s803_s10, 32  }
 0x1a2   : > { %1228 = vsyncadd (!%p1020_p3), %s803_s10, 4294967264  ;;  %p21_p10 = scmp.ge.s32.totalorder %s1298_s18, 4   ;;  %s1693_s12 = smov %s1235_s13 }
 0x1a3   : > { %s1694_s13 = smov %s1239_s14  ;;  %s1695_s14 = smov %s1310_s21 }
 0x1a4   : > { %s1696_s15 = smov %s1298_s18  ;;  %23 = sbr.rel (!%p21_p10) target bundleno = 8 (0x8), region = 94 }
 0x1ab   :  { %808 = vsyncpa [#allocation4], 1 }
 0x1ac   :  { %810 = vsyncpa [#allocation4 + $0x1], 1 }
 0x1ad   :  { %811 = vsyncpa [#allocation7], 1 }
 0x1ae   :  { %812 = vsyncpa [#allocation5], 1 }
 0x1af   :  { %814 = vsyncpa [#allocation5 + $0x1], 1 }
 0x1b0   :  { %815 = vsyncpa [#allocation10], 1 }
 0x1b1   :  { %817 = vsyncpa [#allocation10 + $0x1], 1 }

// kernel: basic_block_forward.9
= control target key start
LH: loop header
LB: loop body
LE: loop exit
PB: predicated region body
PF: predicated region fallthrough
CT: control target
= control target key end

     0   :  { %s1604_s0 = inlined_call_operand.hbm [shape: f32[2,256,128], index: 0, kind: input, shape index: {}]   ;;  %s1605_s1 = inlined_call_operand.hbm [shape: f32[2,256,128], index: 1, kind: input, shape index: {}]   ;;  %s1606_s2 = inlined_call_operand.hbm [shape: f32[1,128], index: 2, kind: input, shape index: {}]   ;;  %s1607_s3 = inlined_call_operand.hbm [shape: f32[1,128], index: 3, kind: input, shape index: {}]   ;;  %s1608_s4 = inlined_call_operand.hbm [shape: f32[1,128], index: 4, kind: input, shape index: {}]   ;;  %s1609_s5 = inlined_call_operand.hbm [shape: f32[2,256,128], index: 5, kind: output, shape index: {}]  }
   0x1   :  { %1613 = sst [smem:[#allocation17_spill]] %s1604_s0 }
   0x2   :  { %1614 = sst [smem:[#allocation18_spill]] %s1606_s2 }
   0x3   :  { %10 = vsyncpa [#allocation3], 0 }
   0x4   :  { %12 = vsyncpa [#allocation3 + $0x1], 0 }
   0x5   :  { %13 = vsyncpa [#allocation6], 0 }
   0x6   :  { %15 = vsyncpa [#allocation6 + $0x1], 0 }
   0x7   :  { %16 = vsyncpa [#allocation9], 0 }
   0x8   :  { %17 = vsyncpa [#allocation4], 0 }
   0x9   :  { %19 = vsyncpa [#allocation4 + $0x1], 0  ;;  %s1083_s18 = smov 0   ;;  %s1085_s19 = smov 0  }
   0xa   :  { %s1087_s20 = smov 0   ;;  %s1089_s21 = smov 0  }
   0xb LB: > { %s1104_s22 = sadd.s32 4294967295, %s1041_s21   ;;  %s703_s23 = sadd.s32 4294967294, %s1041_s21   ;;  %s1041_s21 = sphi %s1089_s21, %s1636_s21   ;;  %s1037_s20 = sphi %s1087_s20, %s1635_s20   ;;  %s1033_s19 = sphi %s1085_s19, %s1634_s19   ;;  %s1029_s18 = sphi %s1083_s18, %s1633_s18  }
   0xc   : > { %p45_p0 = scmp.ne.s32.totalorder %s1033_s19, %s1029_s18  ;;  %p1610_p1 = scmp.eq.s32.totalorder %s1104_s22, 0 }
   0xd   : > { %p164_p3 = scmp.eq.s32.totalorder %s703_s23, 1  ;;  %p704_p5 = scmp.ge.s32.totalorder %s1041_s21, 1 }
   0xe   : > { %p1113_p4 = por %p1610_p1, %p45_p0  ;;  %p171_p7 = scmp.lt.s32.totalorder %s1041_s21, 3 }
   0xf   : > { %p1118_p6 = por %p164_p3, %p45_p0  ;;  %s1043_s27 = smov [#allocation7]  }
  0x10   : > { %s1615_s24 = scalar_select %p1113_p4, 1, 0 }
  0x11   : > { %s1616_s25 = scalar_select %p1118_p6, 1, 0 }
  0x12   : > { %p1123_p8 = pnand %p704_p5, %p171_p7  ;;  %s184_s28 = sshll.u32 %s1043_s27, 4  ;;  %s185_s28 = int_to_ptr.vmem [resolvable:$true] %s184_s28 }
  0x13   : > { %s1044_s29 = smov [#allocation8]   ;;  %s1045_s7 = smov [#allocation10]  }
  0x14   : > { %s1617_s26 = scalar_select %p1123_p8, 1, 0 }
  0x15   : > { %p751_p10 = pneg %p1123_p8  ;;  %s195_s30 = sshll.u32 %s1044_s29, 4  ;;  %s1136_s30 = int_to_ptr.vmem [resolvable:$true] %s195_s30 }
  0x16   : > { %s206_s8 = sshll.u32 %s1045_s7, 4  ;;  %s1619_s2 = sld [smem:[#allocation18_spill]]  ;;  %s1138_s8 = int_to_ptr.vmem [resolvable:$true] %s206_s8 }
  0x17   : > { %p1132_p11 = pnand %p751_p10, %p1610_p1 }
  0x19   : > { %p1148_p13 = pneg %p1132_p11 }
  0x1c   : > { %s819_s11 = scalar_lea.hbm %s1619_s2, 16 }
  0x1d   : > { %p820_p12 = scmp.ne.s32.totalorder %s1619_s2, %s819_s11  ;;  %p826_p5 = scmp.lt.u32.totalorder %s819_s11, %s1619_s2 }
  0x1f   : > { %p822_p0 = pnand %p1148_p13, %p820_p12 }
  0x21   : > { %p823_p3 = pneg %p822_p0 }
  0x23   : > { %p828_p7 = pnand %p826_p5, %p823_p3 }
  0x25   : > { %831 = shalt.err (!%p828_p7)
}
  0x26   : > { %s832_s17 = scalar_lea.vmem %s185_s28, 16  ;;  %s839_s23 = scalar_lea.vmem %s185_s28, 32 }
  0x27   : > { %p833_p10 = scmp.ne.s32.totalorder %s185_s28, %s832_s17  ;;  %p840_p2 = scmp.lt.s32.totalorder %s185_s28, %s185_s28 }
  0x28   : > { %p841_p6 = scmp.lt.s32.totalorder %s839_s23, %s832_s17 }
  0x29   : > { %p835_p9 = pnand %p833_p10, %p1148_p13 }
  0x2a   : > { %p842_p4 = por %p841_p6, %p840_p2 }
  0x2b   : > { %p836_p1 = pneg %p835_p9 }
  0x2d   : > { %p843_p8 = pnand %p842_p4, %p836_p1 }
  0x2f   : > { %846 = shalt.err (!%p843_p8)
}
  0x30   : > { %754 = dma.hbm_to_vmem [thread:$0]  (!%p1132_p11), %s1619_s2, 16, %s185_s28, [#allocation6]  }
  0x31   : > { %s847_s10 = scalar_lea.hbm %s1607_s3, 16 }
  0x32   : > { %p848_p9 = scmp.ne.s32.totalorder %s1607_s3, %s847_s10  ;;  %p854_p1 = scmp.lt.u32.totalorder %s847_s10, %s1607_s3 }
  0x34   : > { %p850_p12 = pnand %p848_p9, %p1148_p13 }
  0x36   : > { %p851_p2 = pneg %p850_p12 }
  0x38   : > { %p856_p4 = pnand %p854_p1, %p851_p2 }
  0x3a   : > { %859 = shalt.err (!%p856_p4)
}
  0x3b   : > { %s860_s28 = scalar_lea.vmem %s1136_s30, 16  ;;  %s867_s16 = scalar_lea.vmem %s1136_s30, 32 }
  0x3c   : > { %p861_p6 = scmp.ne.s32.totalorder %s1136_s30, %s860_s28  ;;  %p868_p3 = scmp.lt.s32.totalorder %s1136_s30, %s1136_s30 }
  0x3d   : > { %p869_p5 = scmp.lt.s32.totalorder %s867_s16, %s860_s28 }
  0x3e   : > { %p863_p8 = pnand %p861_p6, %p1148_p13 }
  0x3f   : > { %p870_p7 = por %p869_p5, %p868_p3 }
  0x40   : > { %p864_p0 = pneg %p863_p8 }
  0x42   : > { %p871_p10 = pnand %p870_p7, %p864_p0 }
  0x44   : > { %874 = shalt.err (!%p871_p10)
}
  0x45   : > { %757 = dma.hbm_to_vmem [thread:$0]  (!%p1132_p11), %s1607_s3, 16, %s1136_s30, [#allocation9]  }
  0x46   : > { %s875_s7 = scalar_lea.hbm %s1608_s4, 16 }
  0x47   : > { %p876_p9 = scmp.ne.s32.totalorder %s1608_s4, %s875_s7  ;;  %p882_p1 = scmp.lt.u32.totalorder %s875_s7, %s1608_s4 }
  0x49   : > { %p878_p12 = pnand %p876_p9, %p1148_p13 }
  0x4b   : > { %p879_p2 = pneg %p878_p12 }
  0x4d   : > { %p884_p4 = pnand %p882_p1, %p879_p2 }
  0x4f   : > { %887 = shalt.err (!%p884_p4)
}
  0x50   : > { %s888_s30 = scalar_lea.vmem %s1138_s8, 16  ;;  %s895_s13 = scalar_lea.vmem %s1138_s8, 32 }
  0x51   : > { %p889_p6 = scmp.ne.s32.totalorder %s1138_s8, %s888_s30  ;;  %p896_p3 = scmp.lt.s32.totalorder %s1138_s8, %s1138_s8 }
  0x52   : > { %p897_p5 = scmp.lt.s32.totalorder %s895_s13, %s888_s30 }
  0x53   : > { %p891_p8 = pnand %p889_p6, %p1148_p13 }
  0x54   : > { %p898_p7 = por %p897_p5, %p896_p3 }
  0x55   : > { %p892_p0 = pneg %p891_p8 }
  0x57   : > { %p899_p10 = pnand %p898_p7, %p892_p0 }
  0x59   : > { %902 = shalt.err (!%p899_p10)
}
  0x5a   : > { %760 = dma.hbm_to_vmem [thread:$0]  (!%p1132_p11), %s1608_s4, 16, %s1138_s8, [#allocation9]  }
  0x5b   : > { %s1213_s14 = sadd.s32 1, %s1041_s21   ;;  %s32_s16 = sadd.s32 1, %s1037_s20 }
  0x5c   : > { %s29_s6 = ssub.s32 %s1041_s21, %s1213_s14  ;;  %p39_p9 = scmp.ne.s32.totalorder %s1037_s20, %s1033_s19 }
  0x5d   : > { %p30_p13 = scmp.eq.s32.totalorder %s29_s6, 0  ;;  %p40_p12 = scmp.eq.s32.totalorder %s1041_s21, 0 }
  0x5e   : > { %p775_p2 = scmp.lt.s32.totalorder %s1041_s21, 2  ;;  %p1621_p4 = scmp.eq.s32.totalorder %s1104_s22, 1 }
  0x5f   : > { %s1223_s17 = scalar_select %p30_p13, %s1037_s20, %s32_s16  }
  0x60   : > { %p41_p1 = por %p40_p12, %p39_p9  ;;  %p1227_p6 = por %p1621_p4, %p39_p9 }
  0x61   : > { %s217_s27 = sand.u32 1, %s1037_s20   ;;  %s730_s29 = sshll.u32 %s1041_s21, 12 }
  0x62   : > { %s1233_s8 = sshll.u32 %s217_s27, 8  ;;  %s1623_s0 = sld [smem:[#allocation17_spill]] }
  0x63   : > { %s221_s11 = scalar_lea.vmem [#allocation2], %s1233_s8  ;;  %p1243_p11 = pnand %p775_p2, %p41_p1 }
  0x64   : > { %s228_s12 = sshll.u32 %s221_s11, 4  ;;  %s1249_s13 = scalar_lea.sflag [#allocation3], %s217_s27  ;;  %s1247_s12 = int_to_ptr.vmem [resolvable:$true] %s228_s12 }
  0x65   : > { %p905_p0 = pneg %p1243_p11 }
  0x68   : > { %s1240_s10 = scalar_lea.hbm %s1623_s0, %s730_s29  ;;  %s908_s16 = scalar_lea.hbm %s1623_s0, 8192 }
  0x69   : > { %s903_s15 = scalar_lea.hbm %s1240_s10, 4096  ;;  %p909_p7 = scmp.lt.u32.totalorder %s1240_s10, %s1623_s0 }
  0x6a   : > { %p904_p8 = scmp.ne.s32.totalorder %s1240_s10, %s903_s15  ;;  %p910_p10 = scmp.lt.u32.totalorder %s908_s16, %s903_s15 }
  0x6b   : > { %p912_p9 = scmp.lt.u32.totalorder %s903_s15, %s1240_s10 }
  0x6c   : > { %p906_p3 = pnand %p905_p0, %p904_p8  ;;  %p911_p13 = por %p910_p10, %p909_p7 }
  0x6e   : > { %p907_p5 = pneg %p906_p3  ;;  %p913_p12 = por %p912_p9, %p911_p13 }
  0x70   : > { %p914_p2 = pnand %p913_p12, %p907_p5 }
  0x72   : > { %917 = shalt.err (!%p914_p2)
}
  0x73   : > { %s918_s27 = scalar_lea.vmem %s1247_s12, 4096  ;;  %s1046_s11 = smov [#allocation2]  }
  0x74   : > { %p919_p1 = scmp.ne.s32.totalorder %s1247_s12, %s918_s27  ;;  %s923_s28 = sshll.u32 %s1046_s11, 4  ;;  %s924_s28 = int_to_ptr.vmem [resolvable:$false] %s923_s28 }
  0x75   : > { %s925_s6 = scalar_lea.vmem %s924_s28, 8192  ;;  %p926_p3 = scmp.lt.s32.totalorder %s1247_s12, %s924_s28 }
  0x76   : > { %p921_p4 = pnand %p919_p1, %p905_p0  ;;  %p927_p7 = scmp.lt.s32.totalorder %s925_s6, %s918_s27 }
  0x78   : > { %p922_p8 = pneg %p921_p4  ;;  %p928_p10 = por %p927_p7, %p926_p3 }
  0x7a   : > { %p929_p13 = pnand %p928_p10, %p922_p8 }
  0x7c   : > { %932 = shalt.err (!%p929_p13)
}
  0x7d   : > { %s1047_s15 = smov 128   ;;  %s1048_s16 = smov 8  }
  0x7e   : > { %764 = dma.hbm_to_vmem [thread:$0]  (!%p1243_p11), %s1240_s10, 4096, %s1247_s12, %s1249_s13, %s1047_s15, %s1047_s15, %s1048_s16  }
  0x7f   : > { %s1285_s27 = scalar_lea.hbm %s1605_s1, %s730_s29  ;;  %s242_s11 = scalar_lea.vmem [#allocation5], %s1233_s8 }
  0x80   : > { %s249_s28 = sshll.u32 %s242_s11, 4  ;;  %s238_s6 = sand.u32 1, %s1041_s21   ;;  %s1289_s28 = int_to_ptr.vmem [resolvable:$true] %s249_s28 }
  0x81   : > { %s1291_s0 = scalar_lea.sflag [#allocation6], %s238_s6  ;;  %s933_s2 = scalar_lea.hbm %s1285_s27, 4096 }
  0x82   : > { %p934_p5 = scmp.ne.s32.totalorder %s1285_s27, %s933_s2  ;;  %s938_s12 = scalar_lea.hbm %s1605_s1, 8192 }
  0x83   : > { %p939_p2 = scmp.lt.u32.totalorder %s1285_s27, %s1605_s1  ;;  %p940_p1 = scmp.lt.u32.totalorder %s938_s12, %s933_s2 }
  0x84   : > { %p936_p9 = pnand %p934_p5, %p905_p0  ;;  %p942_p8 = scmp.lt.u32.totalorder %s933_s2, %s1285_s27 }
  0x85   : > { %p941_p4 = por %p940_p1, %p939_p2 }
  0x86   : > { %p937_p12 = pneg %p936_p9 }
  0x87   : > { %p943_p3 = por %p942_p8, %p941_p4 }
  0x89   : > { %p944_p7 = pnand %p943_p3, %p937_p12 }
  0x8b   : > { %947 = shalt.err (!%p944_p7)
}
  0x8c   : > { %s948_s8 = scalar_lea.vmem %s1289_s28, 4096  ;;  %s1049_s9 = smov [#allocation5]  }
  0x8d   : > { %p949_p10 = scmp.ne.s32.totalorder %s1289_s28, %s948_s8  ;;  %s953_s11 = sshll.u32 %s1049_s9, 4  ;;  %s954_s11 = int_to_ptr.vmem [resolvable:$false] %s953_s11 }
  0x8e   : > { %s955_s6 = scalar_lea.vmem %s954_s11, 8192  ;;  %p956_p9 = scmp.lt.s32.totalorder %s1289_s28, %s954_s11 }
  0x8f   : > { %p951_p13 = pnand %p949_p10, %p905_p0  ;;  %p957_p2 = scmp.lt.s32.totalorder %s955_s6, %s948_s8 }
  0x91   : > { %p952_p5 = pneg %p951_p13  ;;  %p958_p1 = por %p957_p2, %p956_p9 }
  0x93   : > { %p959_p4 = pnand %p958_p1, %p952_p5 }
  0x95   : > { %962 = shalt.err (!%p959_p4)
}
  0x96   : > { %767 = dma.hbm_to_vmem [thread:$0]  (!%p1243_p11), %s1285_s27, 4096, %s1289_s28, %s1291_s0, %s1047_s15, %s1047_s15, %s1048_s16  }
  0x97   : > { %p1625_p0 = scmp.ne.s32.totalorder %s1617_s26, 0 }
  0x98   : > { %s1323_s2 = sand.u32 (!%p1625_p0), 1, %s1033_s19   ;;  %p1626_p12 = scmp.ne.s32.totalorder (!%p1625_p0), %s1615_s24, 0 }
  0x99   : > { %261 = sbr.rel (%p1625_p0) target bundleno = 225 (0xe1), region = 40  ;;  %s1326_s10 = sshll.u32 (!%p1625_p0), %s1323_s2, 8 }
  0x9a   : > { %s264_s30 = scalar_lea.sflag (!%p1625_p0), [#allocation3], %s1323_s2  ;;  %s1330_s29 = scalar_lea.vmem (!%p1625_p0), [#allocation2], %s1326_s10 }
  0xa0   : > { %1008 = dma.done.wait (%p1626_p12), %s264_s30, 4096  }
  0xa1   : > { %1010 = vsyncadd (%p1626_p12), %s264_s30, 4294963200  ;;  %s272_s0 = sand.u32 1, %s1104_s22   ;;  %s1338_s15 = scalar_lea.vmem [#allocation5], %s1326_s10 }
  0xa2   : > { %s273_s26 = scalar_lea.sflag [#allocation6], %s272_s0 }
  0xa3   : > { %1012 = dma.done.wait (%p1626_p12), %s273_s26, 4096  }
  0xa4   : > { %1014 = vsyncadd (%p1626_p12), %s273_s26, 4294963200  ;;  %p1627_p11 = scmp.eq.s32.totalorder %s1104_s22, 0 }
  0xa6   : > { %1016 = dma.done.wait (%p1627_p11), [#allocation6], 16   ;;  %p1628_p8 = pmov %p1627_p11 }
  0xa8   : > { %1018 = vsyncadd (%p1628_p8), [#allocation6], 4294967280  ;;  %p1629_p3 = pmov %p1628_p8 }
  0xaa   : > { %1020 = dma.done.wait (%p1629_p3), [#allocation9], 32   ;;  %p1630_p7 = pmov %p1629_p3 }
  0xab   : > { %v320_v0 = vld [vmem:[%s1330_s29] sm:$0xff]  ;;  %v321_v6 = vld [vmem:[%s1330_s29 + $0x8] sm:$0xff]  ;;  %v322_v10 = vld [vmem:[%s1330_s29 + $0x10] sm:$0xff]  ;;  %s1396_s24 = scalar_lea.vmem [#allocation11], %s1326_s10  ;;  %s732_s16 = sshll.u32 %s1104_s22, 12 }
  0xac   : > { %1022 = vsyncadd (%p1630_p7), [#allocation9], 4294967264  ;;  %v1353_v1 = vld [vmem:[#allocation7] ss:$0 sm:$0xff]  ;;  %v1357_v4 = vld [vmem:[#allocation8] ss:$0 sm:$0xff]  ;;  %s1554_s13 = scalar_lea.hbm %s1609_s5, %s732_s16 }
  0xad   : > { %v391_v2 = vld [vmem:[%s1338_s15] sm:$0xff]  ;;  %v359_v3 = vmul.f32 %v1353_v1, %v320_v0  ;;  %v360_v8 = vmul.f32 %v1353_v1, %v321_v6  ;;  %v392_v9 = vld [vmem:[%s1338_s15 + $0x8] sm:$0xff]  ;;  %v393_v11 = vld [vmem:[%s1338_s15 + $0x10] sm:$0xff]  ;;  %v361_v13 = vmul.f32 %v1353_v1, %v322_v10  ;;  %s579_s27 = sshll.u32 %s1396_s24, 4  ;;  %s566_s22 = scalar_lea.sflag [#allocation4], %s1323_s2  ;;  %s1556_s27 = int_to_ptr.vmem [resolvable:$true] %s579_s27 }
  0xae   : > { %v1359_v5 = vld [vmem:[#allocation10] ss:$0 sm:$0xff]  ;;  %v430_v7 = vmul.f32 %v1357_v4, %v391_v2  ;;  %v431_v12 = vmul.f32 %v1357_v4, %v392_v9  ;;  %v432_v14 = vmul.f32 %v1357_v4, %v393_v11  ;;  %v323_v15 = vld [vmem:[%s1330_s29 + $0x18] sm:$0xff]  ;;  %v325_v23 = vld [vmem:[%s1330_s29 + $0x28] sm:$0xff]  ;;  %s963_s7 = scalar_lea.vmem %s1556_s27, 4096  ;;  %s1050_s8 = smov [#allocation11]  }
  0xaf   : > { %v394_v16 = vld [vmem:[%s1338_s15 + $0x18] sm:$0xff]  ;;  %v324_v17 = vld [vmem:[%s1330_s29 + $0x20] sm:$0xff]  ;;  %v362_v19 = vmul.f32 %v1353_v1, %v323_v15  ;;  %v396_v24 = vld [vmem:[%s1338_s15 + $0x28] sm:$0xff]  ;;  %v364_v28 = vmul.f32 %v1353_v1, %v325_v23  ;;  %p964_p10 = scmp.ne.s32.totalorder %s1556_s27, %s963_s7  ;;  %s967_s9 = sshll.u32 %s1050_s8, 4  ;;  %s968_s9 = int_to_ptr.vmem [resolvable:$false] %s967_s9 }
  0xb0   : > { %v462_v18 = vadd.f32 %v430_v7, %v359_v3  ;;  %v433_v20 = vmul.f32 %v1357_v4, %v394_v16  ;;  %v363_v21 = vmul.f32 %v1353_v1, %v324_v17  ;;  %v395_v22 = vld [vmem:[%s1338_s15 + $0x20] sm:$0xff]  ;;  %v463_v25 = vadd.f32 %v431_v12, %v360_v8  ;;  %v326_v29 = vld [vmem:[%s1330_s29 + $0x30] sm:$0xff]  ;;  %v327_v31 = vld [vmem:[%s1330_s29 + $0x38] sm:$0xff]  ;;  %s969_s11 = scalar_lea.vmem %s968_s9, 8192  ;;  %p970_p9 = scmp.lt.s32.totalorder %s1556_s27, %s968_s9 }
  0xb1   : > { %v464_v26 = vadd.f32 %v432_v14, %v361_v13  ;;  %v434_v27 = vmul.f32 %v1357_v4, %v395_v22  ;;  %v397_v30 = vld [vmem:[%s1338_s15 + $0x30] sm:$0xff]  ;;  %v435_v34 = vmul.f32 %v1357_v4, %v396_v24  ;;  %v365_v35 = vmul.f32 %v1353_v1, %v326_v29  ;;  %v398_v36 = vld [vmem:[%s1338_s15 + $0x38] sm:$0xff]  ;;  %v328_v37 = vld [vmem:[%s1330_s29 + $0x40] sm:$0xff]  ;;  %p965_p13 = pnand %p964_p10, %p1227_p6  ;;  %p971_p2 = scmp.lt.s32.totalorder %s969_s11, %s963_s7 }
  0xb2   : > { %v501_v32 = vadd.f32 %v1359_v5, %v462_v18  ;;  %v465_v33 = vadd.f32 %v433_v20, %v362_v19  ;;  %v399_v38 = vld [vmem:[%s1338_s15 + $0x40] sm:$0xff]  ;;  %v502_v39 = vadd.f32 %v1359_v5, %v463_v25  ;;  %v436_v42 = vmul.f32 %v1357_v4, %v397_v30  ;;  %v329_v43 = vld [vmem:[%s1330_s29 + $0x48] sm:$0xff]  ;;  %v330_v49 = vld [vmem:[%s1330_s29 + $0x50] sm:$0xff] }
  0xb3   : > { %v503_v40 = vadd.f32 %v1359_v5, %v464_v26  ;;  %v466_v41 = vadd.f32 %v434_v27, %v363_v21  ;;  %v400_v44 = vld [vmem:[%s1338_s15 + $0x48] sm:$0xff]  ;;  %v467_v46 = vadd.f32 %v435_v34, %v364_v28  ;;  %v366_v47 = vmul.f32 %v1353_v1, %v327_v31  ;;  %v401_v50 = vld [vmem:[%s1338_s15 + $0x50] sm:$0xff]  ;;  %v331_v55 = vld [vmem:[%s1330_s29 + $0x58] sm:$0xff]  ;;  %p966_p5 = pneg %p965_p13  ;;  %p972_p1 = por %p971_p2, %p970_p9 }
  0xb4   : > { %533 = vst [vmem:[%s1396_s24] sm:$0xff] %v501_v32  ;;  %v504_v45 = vadd.f32 %v1359_v5, %v465_v33  ;;  %v437_v48 = vmul.f32 %v1357_v4, %v398_v36  ;;  %534 = vst [vmem:[%s1396_s24 + $0x8] sm:$0xff] %v502_v39  ;;  %v468_v52 = vadd.f32 %v436_v42, %v365_v35  ;;  %v402_v56 = vld [vmem:[%s1338_s15 + $0x58] sm:$0xff]  ;;  %v332_v61 = vld [vmem:[%s1330_s29 + $0x60] sm:$0xff] }
  0xb5   : > { %535 = vst [vmem:[%s1396_s24 + $0x10] sm:$0xff] %v503_v40  ;;  %v505_v51 = vadd.f32 %v1359_v5, %v466_v41  ;;  %v367_v53 = vmul.f32 %v1353_v1, %v328_v37  ;;  %v438_v54 = vmul.f32 %v1357_v4, %v399_v38  ;;  %v506_v57 = vadd.f32 %v1359_v5, %v467_v46  ;;  %v403_v62 = vld [vmem:[%s1338_s15 + $0x60] sm:$0xff]  ;;  %v333_v6 = vld [vmem:[%s1330_s29 + $0x68] sm:$0xff]  ;;  %v334_v12 = vld [vmem:[%s1330_s29 + $0x70] sm:$0xff]  ;;  %p973_p4 = pnand %p972_p1, %p966_p5 }
  0xb6   : > { %536 = vst [vmem:[%s1396_s24 + $0x18] sm:$0xff] %v504_v45  ;;  %v469_v58 = vadd.f32 %v437_v48, %v366_v47  ;;  %v368_v59 = vmul.f32 %v1353_v1, %v329_v43  ;;  %v439_v60 = vmul.f32 %v1357_v4, %v400_v44  ;;  %v507_v63 = vadd.f32 %v1359_v5, %v468_v52  ;;  %v404_v7 = vld [vmem:[%s1338_s15 + $0x68] sm:$0xff]  ;;  %v405_v13 = vld [vmem:[%s1338_s15 + $0x70] sm:$0xff]  ;;  %v335_v18 = vld [vmem:[%s1330_s29 + $0x78] sm:$0xff] }
  0xb7   : > { %537 = vst [vmem:[%s1396_s24 + $0x20] sm:$0xff] %v505_v51  ;;  %v470_v0 = vadd.f32 %v438_v54, %v367_v53  ;;  %v369_v2 = vmul.f32 %v1353_v1, %v330_v49  ;;  %v440_v3 = vmul.f32 %v1357_v4, %v401_v50  ;;  %538 = vst [vmem:[%s1396_s24 + $0x28] sm:$0xff] %v506_v57  ;;  %v406_v19 = vld [vmem:[%s1338_s15 + $0x78] sm:$0xff]  ;;  %v336_v24 = vld [vmem:[%s1330_s29 + $0x80] sm:$0xff] }
  0xb8   : > { %v508_v8 = vadd.f32 %v1359_v5, %v469_v58  ;;  %v471_v9 = vadd.f32 %v439_v60, %v368_v59  ;;  %v370_v10 = vmul.f32 %v1353_v1, %v331_v55  ;;  %v441_v11 = vmul.f32 %v1357_v4, %v402_v56  ;;  %539 = vst [vmem:[%s1396_s24 + $0x30] sm:$0xff] %v507_v63  ;;  %v407_v25 = vld [vmem:[%s1338_s15 + $0x80] sm:$0xff]  ;;  %v337_v30 = vld [vmem:[%s1330_s29 + $0x88] sm:$0xff]  ;;  %v338_v36 = vld [vmem:[%s1330_s29 + $0x90] sm:$0xff] }
  0xb9   : > { %v509_v14 = vadd.f32 %v1359_v5, %v470_v0  ;;  %v472_v15 = vadd.f32 %v440_v3, %v369_v2  ;;  %v371_v16 = vmul.f32 %v1353_v1, %v332_v61  ;;  %v442_v17 = vmul.f32 %v1357_v4, %v403_v62  ;;  %v408_v31 = vld [vmem:[%s1338_s15 + $0x88] sm:$0xff]  ;;  %v409_v37 = vld [vmem:[%s1338_s15 + $0x90] sm:$0xff]  ;;  %v339_v42 = vld [vmem:[%s1330_s29 + $0x98] sm:$0xff] }
  0xba   : > { %540 = vst [vmem:[%s1396_s24 + $0x38] sm:$0xff] %v508_v8  ;;  %v510_v20 = vadd.f32 %v1359_v5, %v471_v9  ;;  %v473_v21 = vadd.f32 %v441_v11, %v370_v10  ;;  %v372_v22 = vmul.f32 %v1353_v1, %v333_v6  ;;  %v443_v23 = vmul.f32 %v1357_v4, %v404_v7  ;;  %v410_v43 = vld [vmem:[%s1338_s15 + $0x98] sm:$0xff]  ;;  %v340_v48 = vld [vmem:[%s1330_s29 + $0xa0] sm:$0xff]  ;;  %v341_v54 = vld [vmem:[%s1330_s29 + $0xa8] sm:$0xff] }
  0xbb   : > { %541 = vst [vmem:[%s1396_s24 + $0x40] sm:$0xff] %v509_v14  ;;  %v511_v26 = vadd.f32 %v1359_v5, %v472_v15  ;;  %v474_v27 = vadd.f32 %v442_v17, %v371_v16  ;;  %v373_v28 = vmul.f32 %v1353_v1, %v334_v12  ;;  %v444_v29 = vmul.f32 %v1357_v4, %v405_v13  ;;  %v411_v49 = vld [vmem:[%s1338_s15 + $0xa0] sm:$0xff]  ;;  %v412_v55 = vld [vmem:[%s1338_s15 + $0xa8] sm:$0xff]  ;;  %v342_v60 = vld [vmem:[%s1330_s29 + $0xb0] sm:$0xff] }
  0xbc   : > { %542 = vst [vmem:[%s1396_s24 + $0x48] sm:$0xff] %v510_v20  ;;  %v512_v32 = vadd.f32 %v1359_v5, %v473_v21  ;;  %v475_v33 = vadd.f32 %v443_v23, %v372_v22  ;;  %v374_v34 = vmul.f32 %v1353_v1, %v335_v18  ;;  %v445_v35 = vmul.f32 %v1357_v4, %v406_v19  ;;  %v413_v61 = vld [vmem:[%s1338_s15 + $0xb0] sm:$0xff]  ;;  %v343_v3 = vld [vmem:[%s1330_s29 + $0xb8] sm:$0xff]  ;;  %v344_v11 = vld [vmem:[%s1330_s29 + $0xc0] sm:$0xff] }
  0xbd   : > { %543 = vst [vmem:[%s1396_s24 + $0x50] sm:$0xff] %v511_v26  ;;  %v513_v38 = vadd.f32 %v1359_v5, %v474_v27  ;;  %v476_v39 = vadd.f32 %v444_v29, %v373_v28  ;;  %v375_v40 = vmul.f32 %v1353_v1, %v336_v24  ;;  %v446_v41 = vmul.f32 %v1357_v4, %v407_v25  ;;  %v414_v6 = vld [vmem:[%s1338_s15 + $0xb8] sm:$0xff]  ;;  %v415_v12 = vld [vmem:[%s1338_s15 + $0xc0] sm:$0xff]  ;;  %v345_v17 = vld [vmem:[%s1330_s29 + $0xc8] sm:$0xff] }
  0xbe   : > { %544 = vst [vmem:[%s1396_s24 + $0x58] sm:$0xff] %v512_v32  ;;  %v514_v44 = vadd.f32 %v1359_v5, %v475_v33  ;;  %v477_v45 = vadd.f32 %v445_v35, %v374_v34  ;;  %v376_v46 = vmul.f32 %v1353_v1, %v337_v30  ;;  %v447_v47 = vmul.f32 %v1357_v4, %v408_v31  ;;  %v416_v18 = vld [vmem:[%s1338_s15 + $0xc8] sm:$0xff]  ;;  %v346_v23 = vld [vmem:[%s1330_s29 + $0xd0] sm:$0xff]  ;;  %v347_v29 = vld [vmem:[%s1330_s29 + $0xd8] sm:$0xff] }
  0xbf   : > { %545 = vst [vmem:[%s1396_s24 + $0x60] sm:$0xff] %v513_v38  ;;  %v515_v50 = vadd.f32 %v1359_v5, %v476_v39  ;;  %v478_v51 = vadd.f32 %v446_v41, %v375_v40  ;;  %v377_v52 = vmul.f32 %v1353_v1, %v338_v36  ;;  %v448_v53 = vmul.f32 %v1357_v4, %v409_v37  ;;  %v417_v24 = vld [vmem:[%s1338_s15 + $0xd0] sm:$0xff]  ;;  %v418_v30 = vld [vmem:[%s1338_s15 + $0xd8] sm:$0xff]  ;;  %v348_v35 = vld [vmem:[%s1330_s29 + $0xe0] sm:$0xff] }
  0xc0   : > { %546 = vst [vmem:[%s1396_s24 + $0x68] sm:$0xff] %v514_v44  ;;  %v516_v56 = vadd.f32 %v1359_v5, %v477_v45  ;;  %v479_v57 = vadd.f32 %v447_v47, %v376_v46  ;;  %v378_v58 = vmul.f32 %v1353_v1, %v339_v42  ;;  %v449_v59 = vmul.f32 %v1357_v4, %v410_v43  ;;  %v419_v36 = vld [vmem:[%s1338_s15 + $0xe0] sm:$0xff]  ;;  %v349_v41 = vld [vmem:[%s1330_s29 + $0xe8] sm:$0xff]  ;;  %v350_v47 = vld [vmem:[%s1330_s29 + $0xf0] sm:$0xff] }
  0xc1   : > { %547 = vst [vmem:[%s1396_s24 + $0x70] sm:$0xff] %v515_v50  ;;  %v517_v62 = vadd.f32 %v1359_v5, %v478_v51  ;;  %v480_v63 = vadd.f32 %v448_v53, %v377_v52  ;;  %v379_v0 = vmul.f32 %v1353_v1, %v340_v48  ;;  %v450_v2 = vmul.f32 %v1357_v4, %v411_v49  ;;  %v420_v42 = vld [vmem:[%s1338_s15 + $0xe8] sm:$0xff]  ;;  %v421_v48 = vld [vmem:[%s1338_s15 + $0xf0] sm:$0xff]  ;;  %v351_v53 = vld [vmem:[%s1330_s29 + $0xf8] sm:$0xff] }
  0xc2   : > { %548 = vst [vmem:[%s1396_s24 + $0x78] sm:$0xff] %v516_v56  ;;  %v518_v7 = vadd.f32 %v1359_v5, %v479_v57  ;;  %v481_v8 = vadd.f32 %v449_v59, %v378_v58  ;;  %v380_v9 = vmul.f32 %v1353_v1, %v341_v54  ;;  %v451_v10 = vmul.f32 %v1357_v4, %v412_v55  ;;  %v422_v54 = vld [vmem:[%s1338_s15 + $0xf8] sm:$0xff] }
  0xc3   : > { %549 = vst [vmem:[%s1396_s24 + $0x80] sm:$0xff] %v517_v62  ;;  %v519_v13 = vadd.f32 %v1359_v5, %v480_v63  ;;  %v482_v14 = vadd.f32 %v450_v2, %v379_v0  ;;  %v381_v15 = vmul.f32 %v1353_v1, %v342_v60  ;;  %v452_v16 = vmul.f32 %v1357_v4, %v413_v61 }
  0xc4   : > { %550 = vst [vmem:[%s1396_s24 + $0x88] sm:$0xff] %v518_v7  ;;  %v520_v19 = vadd.f32 %v1359_v5, %v481_v8  ;;  %v483_v20 = vadd.f32 %v451_v10, %v380_v9  ;;  %v382_v21 = vmul.f32 %v1353_v1, %v343_v3  ;;  %v453_v22 = vmul.f32 %v1357_v4, %v414_v6 }
  0xc5   : > { %551 = vst [vmem:[%s1396_s24 + $0x90] sm:$0xff] %v519_v13  ;;  %v521_v25 = vadd.f32 %v1359_v5, %v482_v14  ;;  %v484_v26 = vadd.f32 %v452_v16, %v381_v15  ;;  %v383_v27 = vmul.f32 %v1353_v1, %v344_v11  ;;  %v454_v28 = vmul.f32 %v1357_v4, %v415_v12 }
  0xc6   : > { %552 = vst [vmem:[%s1396_s24 + $0x98] sm:$0xff] %v520_v19  ;;  %v522_v31 = vadd.f32 %v1359_v5, %v483_v20  ;;  %v485_v32 = vadd.f32 %v453_v22, %v382_v21  ;;  %v384_v33 = vmul.f32 %v1353_v1, %v345_v17  ;;  %v455_v34 = vmul.f32 %v1357_v4, %v416_v18 }
  0xc7   : > { %553 = vst [vmem:[%s1396_s24 + $0xa0] sm:$0xff] %v521_v25  ;;  %v523_v37 = vadd.f32 %v1359_v5, %v484_v26  ;;  %v486_v38 = vadd.f32 %v454_v28, %v383_v27  ;;  %v385_v39 = vmul.f32 %v1353_v1, %v346_v23  ;;  %v456_v40 = vmul.f32 %v1357_v4, %v417_v24 }
  0xc8   : > { %554 = vst [vmem:[%s1396_s24 + $0xa8] sm:$0xff] %v522_v31  ;;  %v524_v43 = vadd.f32 %v1359_v5, %v485_v32  ;;  %v487_v44 = vadd.f32 %v455_v34, %v384_v33  ;;  %v386_v45 = vmul.f32 %v1353_v1, %v347_v29  ;;  %v457_v46 = vmul.f32 %v1357_v4, %v418_v30 }
  0xc9   : > { %555 = vst [vmem:[%s1396_s24 + $0xb0] sm:$0xff] %v523_v37  ;;  %v525_v49 = vadd.f32 %v1359_v5, %v486_v38  ;;  %v488_v50 = vadd.f32 %v456_v40, %v385_v39  ;;  %v387_v51 = vmul.f32 %v1353_v1, %v348_v35  ;;  %v458_v52 = vmul.f32 %v1357_v4, %v419_v36 }
  0xca   : > { %556 = vst [vmem:[%s1396_s24 + $0xb8] sm:$0xff] %v524_v43  ;;  %v526_v55 = vadd.f32 %v1359_v5, %v487_v44  ;;  %v489_v56 = vadd.f32 %v457_v46, %v386_v45  ;;  %v388_v57 = vmul.f32 %v1353_v1, %v349_v41  ;;  %v459_v58 = vmul.f32 %v1357_v4, %v420_v42 }
  0xcb   : > { %557 = vst [vmem:[%s1396_s24 + $0xc0] sm:$0xff] %v525_v49  ;;  %v527_v59 = vadd.f32 %v1359_v5, %v488_v50  ;;  %v490_v60 = vadd.f32 %v458_v52, %v387_v51  ;;  %v389_v61 = vmul.f32 %v1353_v1, %v350_v47  ;;  %v460_v62 = vmul.f32 %v1357_v4, %v421_v48 }
  0xcc   : > { %558 = vst [vmem:[%s1396_s24 + $0xc8] sm:$0xff] %v526_v55  ;;  %v528_v63 = vadd.f32 %v1359_v5, %v489_v56  ;;  %v491_v0 = vadd.f32 %v459_v58, %v388_v57  ;;  %v390_v2 = vmul.f32 %v1353_v1, %v351_v53  ;;  %v461_v3 = vmul.f32 %v1357_v4, %v422_v54 }
  0xcd   : > { %559 = vst [vmem:[%s1396_s24 + $0xd0] sm:$0xff] %v527_v59  ;;  %v529_v6 = vadd.f32 %v1359_v5, %v490_v60  ;;  %v492_v7 = vadd.f32 %v460_v62, %v389_v61 }
  0xce   : > { %560 = vst [vmem:[%s1396_s24 + $0xd8] sm:$0xff] %v528_v63  ;;  %v530_v8 = vadd.f32 %v1359_v5, %v491_v0  ;;  %v493_v9 = vadd.f32 %v461_v3, %v390_v2 }
  0xcf   : > { %561 = vst [vmem:[%s1396_s24 + $0xe0] sm:$0xff] %v529_v6  ;;  %v531_v10 = vadd.f32 %v1359_v5, %v492_v7 }
  0xd0   : > { %562 = vst [vmem:[%s1396_s24 + $0xe8] sm:$0xff] %v530_v8  ;;  %v532_v1 = vadd.f32 %v1359_v5, %v493_v9 }
  0xd1   : > { %563 = vst [vmem:[%s1396_s24 + $0xf0] sm:$0xff] %v531_v10 }
  0xd2   : > { %564 = vst [vmem:[%s1396_s24 + $0xf8] sm:$0xff] %v532_v1 }
  0xd3   : > { %976 = shalt.err (!%p973_p4)
}
  0xd4   : > { %s977_s6 = scalar_lea.hbm %s1554_s13, 4096  ;;  %s981_s29 = scalar_lea.hbm %s1609_s5, 8192 }
  0xd5   : > { %p978_p0 = scmp.ne.s32.totalorder %s1554_s13, %s977_s6  ;;  %p982_p8 = scmp.lt.u32.totalorder %s1554_s13, %s1609_s5 }
  0xd6   : > { %p983_p3 = scmp.lt.u32.totalorder %s981_s29, %s977_s6  ;;  %p985_p10 = scmp.lt.u32.totalorder %s977_s6, %s1554_s13 }
  0xd7   : > { %p979_p12 = pnand %p978_p0, %p1227_p6 }
  0xd8   : > { %p984_p7 = por %p983_p3, %p982_p8 }
  0xd9   : > { %p980_p11 = pneg %p979_p12 }
  0xda   : > { %p986_p13 = por %p985_p10, %p984_p7 }
  0xdc   : > { %p987_p5 = pnand %p986_p13, %p980_p11 }
  0xde   : > { %990 = shalt.err (!%p987_p5)
}
  0xdf   : > { %s1051_s15 = smov 128   ;;  %s1052_s24 = smov 8  }
  0xe0   : > { %749 = dma.vmem_to_hbm [thread:$0]  (%p1227_p6), %s1556_s27, 4096, %s1554_s13, %s566_s22, %s1051_s15, %s1051_s15, %s1052_s24  }
  0xe1 PF: > { %s594_s16 = sand.u32 1, %s1029_s18   ;;  %p1631_p9 = scmp.ne.s32.totalorder %s1616_s25, 0 }
  0xe2   : > { %p1632_p2 = scmp.ge.s32.totalorder %s1041_s21, 2  ;;  %s595_s28 = scalar_lea.sflag [#allocation4], %s594_s16 }
  0xe4   : > { %p769_p1 = pnand %p1632_p2, %p1631_p9 }
  0xe6   : > { %1024 = dma.done.wait (!%p769_p1), %s595_s28, 4096  }
  0xe7   : > { %1026 = vsyncadd (!%p769_p1), %s595_s28, 4294963200  ;;  %p22_p4 = scmp.ge.s32.totalorder %s1213_s14, 4   ;;  %s1633_s18 = smov %s1033_s19 }
  0xe8   : > { %s1634_s19 = smov %s1037_s20  ;;  %s1635_s20 = smov %s1223_s17 }
  0xe9   : > { %s1636_s21 = smov %s1213_s14  ;;  %24 = sbr.rel (!%p22_p4) target bundleno = 11 (0xb), region = 110 }
  0xf0   :  { %600 = vsyncpa [#allocation3], 1 }
  0xf1   :  { %602 = vsyncpa [#allocation3 + $0x1], 1 }
  0xf2   :  { %603 = vsyncpa [#allocation6], 1 }
  0xf3   :  { %605 = vsyncpa [#allocation6 + $0x1], 1 }
  0xf4   :  { %606 = vsyncpa [#allocation9], 1 }
  0xf5   :  { %607 = vsyncpa [#allocation4], 1 }
  0xf6   :  { %609 = vsyncpa [#allocation4 + $0x1], 1 }

// kernel: basic_block_forward.8
= control target key start
LH: loop header
LB: loop body
LE: loop exit
PB: predicated region body
PF: predicated region fallthrough
CT: control target
= control target key end

     0   :  { %9 = vsyncpa [#allocation4], 0  ;;  %s5491_s0 = inlined_call_operand.hbm [shape: bf16[2,288,384], index: 0, kind: input, shape index: {}]   ;;  %s5492_s1 = inlined_call_operand.hbm [shape: bf16[3,384,128], index: 1, kind: input, shape index: {}]   ;;  %s5493_s2 = inlined_call_operand.hbm [shape: f32[2,256,128], index: 2, kind: output, shape index: {0}]   ;;  %s5494_s3 = inlined_call_operand.hbm [shape: f32[2,2,128], index: 3, kind: output, shape index: {1}]  }
   0x1   :  { %11 = vsyncpa [#allocation4 + $0x1], 0 }
   0x2   :  { %12 = vsyncpa [#allocation7], 0 }
   0x3   :  { %13 = vsyncpa [#allocation5], 0 }
   0x4   :  { %15 = vsyncpa [#allocation5 + $0x1], 0 }
   0x5   :  { %16 = vsyncpa [#allocation10], 0 }
   0x6   :  { %18 = vsyncpa [#allocation10 + $0x1], 0  ;;  %s4662_s12 = smov 0   ;;  %s4664_s13 = smov 0  }
   0x7   :  { %s4666_s14 = smov 0   ;;  %s4668_s15 = smov 0  }
   0x8 LB: > { %s4683_s16 = sadd.s32 4294967295, %s4630_s15   ;;  %s3264_s17 = sadd.s32 4294967294, %s4630_s15   ;;  %s4630_s15 = sphi %s4668_s15, %s5518_s15   ;;  %s4626_s14 = sphi %s4666_s14, %s5517_s14   ;;  %s4622_s13 = sphi %s4664_s13, %s5516_s13   ;;  %s4618_s12 = sphi %s4662_s12, %s5515_s12  }
   0x9   : > { %p44_p0 = scmp.ne.s32.totalorder %s4622_s13, %s4618_s12  ;;  %p5495_p1 = scmp.eq.s32.totalorder %s4683_s16, 0 }
   0xa   : > { %p95_p3 = scmp.eq.s32.totalorder %s3264_s17, 1  ;;  %p3265_p5 = scmp.ge.s32.totalorder %s4630_s15, 1 }
   0xb   : > { %p4692_p4 = por %p5495_p1, %p44_p0  ;;  %p128_p7 = scmp.lt.s32.totalorder %s4630_s15, 3 }
   0xc   : > { %p4697_p6 = por %p95_p3, %p44_p0  ;;  %s4632_s21 = smov [#allocation6]  }
   0xd   : > { %s5498_s18 = scalar_select %p4692_p4, 1, 0 }
   0xe   : > { %s5499_s19 = scalar_select %p4697_p6, 1, 0 }
   0xf   : > { %p4702_p8 = pnand %p3265_p5, %p128_p7  ;;  %s140_s22 = sshll.u32 %s4632_s21, 4  ;;  %s4706_s22 = int_to_ptr.vmem [resolvable:$true] %s140_s22 }
  0x10   : > { %s4718_s24 = sadd.s32 1, %s4630_s15   ;;  %s31_s25 = sadd.s32 1, %s4626_s14 }
  0x11   : > { %s5500_s20 = scalar_select %p4702_p8, 1, 0 }
  0x12   : > { %p4238_p9 = pneg %p4702_p8  ;;  %s28_s26 = ssub.s32 %s4630_s15, %s4718_s24 }
  0x13   : > { %s4470_s29 = scalar_lea.hbm %s5492_s1, 9216 }
  0x14   : > { %p4713_p11 = pnand %p4238_p9, %p5495_p1  ;;  %p4471_p12 = scmp.ne.s32.totalorder %s5492_s1, %s4470_s29 }
  0x15   : > { %p4477_p5 = scmp.lt.u32.totalorder %s4470_s29, %s5492_s1 }
  0x16   : > { %p4472_p13 = pneg %p4713_p11 }
  0x18   : > { %p4473_p0 = pnand %p4472_p13, %p4471_p12 }
  0x1a   : > { %p4474_p3 = pneg %p4473_p0 }
  0x1c   : > { %p4479_p7 = pnand %p4477_p5, %p4474_p3 }
  0x1e   : > { %4482 = shalt.err (!%p4479_p7)
}
  0x1f   : > { %s4483_s7 = scalar_lea.vmem %s4706_s22, 9216  ;;  %p4491_p2 = scmp.lt.s32.totalorder %s4706_s22, %s4706_s22 }
  0x20   : > { %p4484_p9 = scmp.ne.s32.totalorder %s4706_s22, %s4483_s7  ;;  %p4492_p6 = scmp.lt.s32.totalorder %s4483_s7, %s4483_s7 }
  0x22   : > { %p4486_p10 = pnand %p4484_p9, %p4472_p13  ;;  %p4493_p4 = por %p4492_p6, %p4491_p2 }
  0x24   : > { %p4487_p1 = pneg %p4486_p10 }
  0x26   : > { %p4494_p8 = pnand %p4493_p4, %p4487_p1 }
  0x28   : > { %4497 = shalt.err (!%p4494_p8)
}
  0x29   : > { %s4633_s8 = smov 64   ;;  %s4634_s9 = smov 4  }
  0x2a   : > { %4241 = dma.hbm_to_vmem [thread:$0]  (!%p4713_p11), %s5492_s1, 9216, %s4706_s22, [#allocation7], %s4633_s8, %s4633_s8, %s4634_s9  }
  0x2b   : > { %p29_p2 = scmp.eq.s32.totalorder %s28_s26, 0  ;;  %p38_p1 = scmp.ne.s32.totalorder %s4626_s14, %s4622_s13 }
  0x2c   : > { %p39_p4 = scmp.eq.s32.totalorder %s4630_s15, 0  ;;  %p4254_p6 = scmp.lt.s32.totalorder %s4630_s15, 2 }
  0x2d   : > { %s4749_s17 = scalar_select %p29_p2, %s4626_s14, %s31_s25  }
  0x2e   : > { %p40_p8 = por %p39_p4, %p38_p1  ;;  %p5502_p10 = scmp.eq.s32.totalorder %s4683_s16, 1 }
  0x2f   : > { %s154_s27 = sand.u32 1, %s4626_s14   ;;  %s4226_s28 = smul.u32 6912, %s4630_s15 }
  0x30   : > { %p4753_p12 = por %p5502_p10, %p38_p1  ;;  %s4225_s29 = smul.u32 432, %s154_s27 }
  0x31   : > { %s4762_s4 = scalar_lea.hbm %s5491_s0, %s4226_s28  ;;  %p4764_p11 = pnand %p4254_p6, %p40_p8 }
  0x32   : > { %s158_s25 = scalar_lea.vmem [#allocation3], %s4225_s29  ;;  %s4770_s5 = scalar_lea.sflag [#allocation4], %s154_s27 }
  0x33   : > { %s165_s26 = sshll.u32 %s158_s25, 4  ;;  %s4498_s6 = scalar_lea.hbm %s4762_s4, 6912  ;;  %s4768_s26 = int_to_ptr.vmem [resolvable:$true] %s165_s26 }
  0x34   : > { %p4499_p13 = scmp.ne.s32.totalorder %s4762_s4, %s4498_s6  ;;  %p4500_p0 = pneg %p4764_p11 }
  0x35   : > { %s4503_s9 = scalar_lea.hbm %s5491_s0, 13824  ;;  %p4504_p7 = scmp.lt.u32.totalorder %s4762_s4, %s5491_s0 }
  0x36   : > { %p4501_p3 = pnand %p4500_p0, %p4499_p13  ;;  %p4505_p9 = scmp.lt.u32.totalorder %s4503_s9, %s4498_s6 }
  0x37   : > { %p4507_p1 = scmp.lt.u32.totalorder %s4498_s6, %s4762_s4 }
  0x38   : > { %p4502_p5 = pneg %p4501_p3  ;;  %p4506_p2 = por %p4505_p9, %p4504_p7 }
  0x3a   : > { %p4508_p4 = por %p4507_p1, %p4506_p2 }
  0x3c   : > { %p4509_p6 = pnand %p4508_p4, %p4502_p5 }
  0x3e   : > { %4512 = shalt.err (!%p4509_p6)
}
  0x3f   : > { %s4513_s27 = scalar_lea.vmem %s4768_s26, 6912  ;;  %s4635_s28 = smov [#allocation3]  }
  0x40   : > { %p4514_p8 = scmp.ne.s32.totalorder %s4768_s26, %s4513_s27  ;;  %s4518_s29 = sshll.u32 %s4635_s28, 4  ;;  %s4519_s29 = int_to_ptr.vmem [resolvable:$false] %s4518_s29 }
  0x41   : > { %s4520_s23 = scalar_lea.vmem %s4519_s29, 13824  ;;  %p4521_p3 = scmp.lt.s32.totalorder %s4768_s26, %s4519_s29 }
  0x42   : > { %p4516_p10 = pnand %p4514_p8, %p4500_p0  ;;  %p4522_p7 = scmp.lt.s32.totalorder %s4520_s23, %s4513_s27 }
  0x44   : > { %p4517_p13 = pneg %p4516_p10  ;;  %p4523_p9 = por %p4522_p7, %p4521_p3 }
  0x46   : > { %p4524_p2 = pnand %p4523_p9, %p4517_p13 }
  0x48   : > { %4527 = shalt.err (!%p4524_p2)
}
  0x49   : > { %s4636_s30 = smov 192   ;;  %s4637_s25 = smov 12  }
  0x4a   : > { %4245 = dma.hbm_to_vmem [thread:$0]  (!%p4764_p11), %s4762_s4, 6912, %s4768_s26, %s4770_s5, %s4636_s30, %s4636_s30, %s4637_s25  }
  0x4b   : > { %p5505_p0 = scmp.ne.s32.totalorder %s5500_s20, 0 }
  0x4d   : > { %177 = sbr.rel (%p5505_p0) target bundleno = 670 (0x29e), region = 28 }
  0x54   : > { %s4801_s6 = sand.u32 1, %s4622_s13   ;;  %p5506_p5 = scmp.ne.s32.totalorder %s5498_s18, 0 }
  0x55   : > { %s4227_s7 = smul.u32 432, %s4801_s6  ;;  %s180_s8 = scalar_lea.sflag [#allocation4], %s4801_s6 }
  0x57   : > { %s4805_s9 = scalar_lea.vmem [#allocation3], %s4227_s7 }
  0x58   : > { %4601 = dma.done.wait (%p5506_p5), %s180_s8, 6912  }
  0x59   : > { %4603 = vsyncadd (%p5506_p5), %s180_s8, 4294960384  ;;  %p5507_p11 = scmp.eq.s32.totalorder %s4683_s16, 0 }
  0x5b   : > { %4605 = dma.done.wait (%p5507_p11), [#allocation7], 9216   ;;  %p5508_p1 = pmov %p5507_p11 }
  0x5c   : > { %v4296_v0 = vld [vmem:[#allocation6 + $0x40] sm:$0xff]   ;;  %v4299_v3 = vld [vmem:[#allocation6 + $0x48] sm:$0xff]   ;;  %v4302_v6 = vld [vmem:[#allocation6 + $0x50] sm:$0xff]   ;;  %s3271_s18 = sshll.u32 %s4801_s6, 8  ;;  %s3496_s4 = sshll.u32 %s4683_s16, 12 }
  0x5d   : > { %4607 = vsyncadd (%p5508_p1), [#allocation7], 4294958080  ;;  %v4815_v1 = vld [vmem:[#allocation6 + $0x80] sm:$0xff]   ;;  %3497 = vmatprep.subr.bf16.mxu0 %v4296_v0  ;;  %v4819_v4 = vld [vmem:[#allocation6 + $0x88] sm:$0xff]   ;;  %s5328_s20 = scalar_lea.vmem [#allocation8], %s3271_s18  ;;  %s5412_s10 = scalar_lea.hbm %s5493_s2, %s3496_s4 }
  0x5e   : > { %v4298_v2 = vld [vmem:[#allocation6] sm:$0xff]   ;;  %4049 = vmatprep.subr.bf16.mxu1 %v4815_v1  ;;  %v4301_v5 = vld [vmem:[#allocation6 + $0x8] sm:$0xff]   ;;  %v4822_v7 = vld [vmem:[#allocation6 + $0x90] sm:$0xff]   ;;  %s3136_s22 = sshll.u32 %s5328_s20, 4  ;;  %s3118_s11 = scalar_lea.sflag [#allocation5], %s4801_s6  ;;  %s5414_s22 = int_to_ptr.vmem [resolvable:$true] %s3136_s22 }
  0x5f   : > { %3498 = vmatpush3.bf16.msra.mxu0 %v4298_v2  ;;  %4057 = vmatpush3.bf16.msra.mxu1 %v4815_v1  ;;  %v4304_v8 = vld [vmem:[#allocation6 + $0x10] sm:$0xff]   ;;  %v4305_v9 = vld [vmem:[#allocation6 + $0x58] sm:$0xff]   ;;  %v4308_v12 = vld [vmem:[#allocation6 + $0x60] sm:$0xff]   ;;  %s4528_s27 = scalar_lea.vmem %s5414_s22, 4096  ;;  %s4638_s28 = smov [#allocation8]  }
  0x60   : > { %3499 = vmatprep.subr.bf16.mxu0 %v4299_v3  ;;  %4050 = vmatprep.subr.bf16.mxu1 %v4819_v4  ;;  %v4826_v10 = vld [vmem:[#allocation6 + $0x98] sm:$0xff]   ;;  %v4830_v13 = vld [vmem:[#allocation6 + $0xa0] sm:$0xff]   ;;  %v4311_v15 = vld [vmem:[#allocation6 + $0x68] sm:$0xff]   ;;  %p4529_p4 = scmp.ne.s32.totalorder %s5414_s22, %s4528_s27  ;;  %s4532_s29 = sshll.u32 %s4638_s28, 4  ;;  %s4533_s29 = int_to_ptr.vmem [resolvable:$false] %s4532_s29 }
  0x61   : > { %v4307_v11 = vld [vmem:[#allocation6 + $0x18] sm:$0xff]   ;;  %v4310_v14 = vld [vmem:[#allocation6 + $0x20] sm:$0xff]   ;;  %v4834_v16 = vld [vmem:[#allocation6 + $0xa8] sm:$0xff]   ;;  %s4534_s23 = scalar_lea.vmem %s4533_s29, 8192  ;;  %p4535_p10 = scmp.lt.s32.totalorder %s5414_s22, %s4533_s29 }
  0x62   : > { %v4313_v17 = vld [vmem:[#allocation6 + $0x28] sm:$0xff]   ;;  %v4314_v18 = vld [vmem:[#allocation6 + $0x70] sm:$0xff]   ;;  %v4317_v21 = vld [vmem:[#allocation6 + $0x78] sm:$0xff]   ;;  %p4530_p6 = pnand %p4529_p4, %p4753_p12  ;;  %p4536_p13 = scmp.lt.s32.totalorder %s4534_s23, %s4528_s27 }
  0x63   : > { %3500 = vmatpush3.bf16.msra.mxu0 %v4301_v5  ;;  %4058 = vmatpush3.bf16.msra.mxu1 %v4819_v4  ;;  %v4838_v19 = vld [vmem:[#allocation6 + $0xb0] sm:$0xff]   ;;  %v4841_v22 = vld [vmem:[#allocation6 + $0xb8] sm:$0xff]   ;;  %v4325_v26 = vld [vmem:[#allocation6 + $0x100] sm:$0xff]  }
  0x64   : > { %3501 = vmatprep.subr.bf16.mxu0 %v4302_v6  ;;  %4051 = vmatprep.subr.bf16.mxu1 %v4822_v7  ;;  %v4316_v20 = vld [vmem:[#allocation6 + $0x30] sm:$0xff]   ;;  %v4319_v25 = vld [vmem:[#allocation6 + $0x38] sm:$0xff]   ;;  %v4326_v29 = vld [vmem:[#allocation6 + $0xc0] sm:$0xff]   ;;  %p4531_p8 = pneg %p4530_p6  ;;  %p4537_p3 = por %p4536_p13, %p4535_p10 }
  0x65   : > { %v4322_v23 = vld [vmem:[%s4805_s9 + $0x4] ss:$12 sps:$4 sm:$0xff]   ;;  %v4323_v24 = vld [vmem:[%s4805_s9 + $0xc8] ss:$12 sps:$4 sm:$0xff]   ;;  %v4320_v27 = vld [vmem:[%s4805_s9] ss:$12 sps:$4 sm:$0xff]  }
  0x66   : > { %760 = vmatprep.mubr.bf16.mxu0 %v4322_v23  ;;  %3937 = vmatprep.mubr.bf16.mxu1 %v4323_v24  ;;  %v4324_v28 = vld [vmem:[%s4805_s9 + $0xe0] ss:$12 sps:$4 sm:$0xff]   ;;  %v4853_v31 = vld [vmem:[%s4805_s9 + $0x1c] ss:$12 sps:$4 sm:$0xff]   ;;  %v4331_v32 = vld [vmem:[%s4805_s9 + $0xf8] ss:$12 sps:$4 sm:$0xff]   ;;  %p4538_p7 = pnand %p4537_p3, %p4531_p8 }
  0x67   : > { %3502 = vmatpush3.bf16.msra.mxu0 %v4304_v8  ;;  %4059 = vmatpush3.bf16.msra.mxu1 %v4822_v7  ;;  %v4327_v30 = vld [vmem:[#allocation6 + $0x108] sm:$0xff]   ;;  %v4334_v35 = vld [vmem:[#allocation6 + $0x110] sm:$0xff]   ;;  %v4336_v38 = vld [vmem:[#allocation6 + $0x118] sm:$0xff]  }
  0x68   : > { %3503 = vmatprep.subr.bf16.mxu0 %v4305_v9  ;;  %4052 = vmatprep.subr.bf16.mxu1 %v4826_v10  ;;  %v4328_v33 = vld [vmem:[#allocation6 + $0xc8] sm:$0xff]   ;;  %v4335_v37 = vld [vmem:[#allocation6 + $0xd0] sm:$0xff]   ;;  %v4337_v41 = vld [vmem:[#allocation6 + $0xd8] sm:$0xff]  }
  0x69   : > { %v4859_v34 = vld [vmem:[%s4805_s9 + $0x18] ss:$12 sps:$4 sm:$0xff]   ;;  %v4333_v36 = vld [vmem:[%s4805_s9 + $0x110] ss:$12 sps:$4 sm:$0xff]   ;;  %v4864_v39 = vld [vmem:[%s4805_s9 + $0x34] ss:$12 sps:$4 sm:$0xff]  }
  0x6a   : > { %v4340_v40 = vld [vmem:[%s4805_s9 + $0x128] ss:$12 sps:$4 sm:$0xff]   ;;  %v4872_v42 = vld [vmem:[%s4805_s9 + $0x30] ss:$12 sps:$4 sm:$0xff]   ;;  %v4342_v43 = vld [vmem:[%s4805_s9 + $0x140] ss:$12 sps:$4 sm:$0xff]  }
  0x6b   : > { %3504 = vmatpush3.bf16.msra.mxu0 %v4307_v11  ;;  %4060 = vmatpush3.bf16.msra.mxu1 %v4826_v10  ;;  %v4343_v44 = vld [vmem:[#allocation6 + $0x120] sm:$0xff]   ;;  %v4345_v46 = vld [vmem:[#allocation6 + $0x128] sm:$0xff]   ;;  %v4352_v50 = vld [vmem:[#allocation6 + $0x130] sm:$0xff]  }
  0x6c   : > { %3505 = vmatprep.subr.bf16.mxu0 %v4308_v12  ;;  %4053 = vmatprep.subr.bf16.mxu1 %v4830_v13  ;;  %v4344_v45 = vld [vmem:[#allocation6 + $0xe0] sm:$0xff]   ;;  %v4878_v47 = vld [vmem:[%s4805_s9 + $0x4c] ss:$12 sps:$4 sm:$0xff]   ;;  %v4353_v53 = vld [vmem:[#allocation6 + $0xf0] sm:$0xff]  }
  0x6d   : > { %v4349_v48 = vld [vmem:[%s4805_s9 + $0x158] ss:$12 sps:$4 sm:$0xff]   ;;  %v4885_v51 = vld [vmem:[%s4805_s9 + $0x48] ss:$12 sps:$4 sm:$0xff]   ;;  %v4351_v52 = vld [vmem:[%s4805_s9 + $0x170] ss:$12 sps:$4 sm:$0xff]  }
  0x6e   : > { %v4346_v49 = vld [vmem:[#allocation6 + $0xe8] sm:$0xff]   ;;  %v4891_v54 = vld [vmem:[%s4805_s9 + $0x64] ss:$12 sps:$4 sm:$0xff]   ;;  %v4354_v55 = vld [vmem:[#allocation6 + $0x138] sm:$0xff]  }
  0x6f   : > { %3506 = vmatpush3.bf16.msra.mxu0 %v4310_v14  ;;  %4061 = vmatpush3.bf16.msra.mxu1 %v4830_v13  ;;  %v4355_v56 = vld [vmem:[#allocation6 + $0xf8] sm:$0xff]   ;;  %v4359_v57 = vld [vmem:[#allocation6 + $0x140] sm:$0xff]   ;;  %v4366_v60 = vld [vmem:[#allocation6 + $0x148] sm:$0xff]  }
  0x70   : > { %3507 = vmatprep.subr.bf16.mxu0 %v4311_v15  ;;  %4054 = vmatprep.subr.bf16.mxu1 %v4834_v16  ;;  %v4899_v58 = vld [vmem:[%s4805_s9 + $0x60] ss:$12 sps:$4 sm:$0xff]   ;;  %v4903_v59 = vld [vmem:[%s4805_s9 + $0x7c] ss:$12 sps:$4 sm:$0xff]   ;;  %v4912_v62 = vld [vmem:[%s4805_s9 + $0x78] ss:$12 sps:$4 sm:$0xff]  }
  0x71   : > { %v4373_v61 = vld [vmem:[#allocation6 + $0x150] sm:$0xff]   ;;  %v4380_v0 = vld [vmem:[#allocation6 + $0x158] sm:$0xff]   ;;  %v4387_v2 = vld [vmem:[#allocation6 + $0x160] sm:$0xff]  }
  0x72   : > { %v4916_v63 = vld [vmem:[%s4805_s9 + $0x94] ss:$12 sps:$4 sm:$0xff]   ;;  %v4394_v5 = vld [vmem:[#allocation6 + $0x168] sm:$0xff]   ;;  %v4936_v8 = vld [vmem:[%s4805_s9 + $0xc4] ss:$12 sps:$4 sm:$0xff]  }
  0x73   : > { %3508 = vmatpush3.bf16.msra.mxu0 %v4313_v17  ;;  %4062 = vmatpush3.bf16.msra.mxu1 %v4834_v16  ;;  %v4401_v3 = vld [vmem:[#allocation6 + $0x1c0] sm:$0xff]   ;;  %v4400_v6 = vld [vmem:[#allocation6 + $0x170] sm:$0xff]   ;;  %v4413_v9 = vld [vmem:[#allocation6 + $0x178] sm:$0xff]  }
  0x74   : > { %3509 = vmatprep.subr.bf16.mxu0 %v4314_v18  ;;  %4055 = vmatprep.subr.bf16.mxu1 %v4838_v19  ;;  %v4946_v11 = vld [vmem:[%s4805_s9 + $0xdc] ss:$12 sps:$4 sm:$0xff]   ;;  %v4953_v12 = vld [vmem:[%s4805_s9 + $0xd8] ss:$12 sps:$4 sm:$0xff]  }
  0x75   : > { %v4958_v14 = vld [vmem:[#allocation6 + $0x200] sm:$0xff]   ;;  %v5009_v24 = vld [vmem:[%s4805_s9 + $0x16c] ss:$12 sps:$4 sm:$0xff]  }
  0x76   : > { %v4966_v15 = vld [vmem:[%s4805_s9 + $0xf0] ss:$12 sps:$4 sm:$0xff]   ;;  %v4976_v17 = vld [vmem:[%s4805_s9 + $0x108] ss:$12 sps:$4 sm:$0xff]  }
  0x77   : > { %3510 = vmatpush3.bf16.msra.mxu0 %v4316_v20  ;;  %4063 = vmatpush3.bf16.msra.mxu1 %v4838_v19  ;;  %v4979_v18 = vld [vmem:[%s4805_s9 + $0x124] ss:$12 sps:$4 sm:$0xff]   ;;  %v4989_v20 = vld [vmem:[%s4805_s9 + $0x13c] ss:$12 sps:$4 sm:$0xff]  }
  0x78   : > { %3511 = vmatprep.subr.bf16.mxu0 %v4317_v21  ;;  %4056 = vmatprep.subr.bf16.mxu1 %v4841_v22  ;;  %v4996_v21 = vld [vmem:[%s4805_s9 + $0x138] ss:$12 sps:$4 sm:$0xff]   ;;  %v5006_v23 = vld [vmem:[%s4805_s9 + $0x150] ss:$12 sps:$4 sm:$0xff]  }
  0x7b   : > { %3512 = vmatpush3.bf16.msra.mxu0 %v4319_v25  ;;  %4064 = vmatpush3.bf16.msra.mxu1 %v4841_v22  ;;  %v5016_v25 = vld [vmem:[%s4805_s9 + $0x168] ss:$12 sps:$4 sm:$0xff]  }
  0x7c   : > { %3905 = vmatprep.subr.bf16.mxu0 %v4815_v1  ;;  %3633 = vmatprep.subr.bf16.mxu1 %v4325_v26  ;;  %v4398_v26 = vld [vmem:[%s4805_s9 + $0x8] ss:$12 sps:$4 sm:$0xff]  }
  0x7e   : > { %761 = vmatmul.mubr.bf16.vlgmr.msra.gmra.mrb[0].mxu0 %v4320_v27  ;;  %3938 = vmatmul.mubr.bf16.vlgmr.msra.gmra.mrb[0].mxu1 %v4324_v28  ;;  %v4399_v27 = vld [vmem:[%s4805_s9 + $0x20] ss:$12 sps:$4 sm:$0xff]  }
  0x7f   : > { %3906 = vmatpush3.bf16.msra.mxu0 %v4815_v1  ;;  %3634 = vmatpush3.bf16.msra.mxu1 %v4326_v29  ;;  %v4923_v1 = vld [vmem:[%s4805_s9 + $0x90] ss:$12 sps:$4 sm:$0xff]   ;;  %v4405_v29 = vld [vmem:[%s4805_s9 + $0x38] ss:$12 sps:$4 sm:$0xff]  }
  0x80   : > { %3635 = vmatprep.subr.bf16.mxu1 %v4327_v30  ;;  %768 = vmatprep.mubr.bf16.mxu0 %v4853_v31  ;;  %v4402_v28 = vld [vmem:[#allocation6 + $0x180] sm:$0xff]   ;;  %v4403_v30 = vld [vmem:[#allocation6 + $0x1c8] sm:$0xff]  }
  0x81   : > { %3941 = vmatprep.mubr.bf16.mxu1 %v4331_v32  ;;  %3907 = vmatprep.subr.bf16.mxu0 %v4819_v4  ;;  %v4407_v32 = vld [vmem:[#allocation6 + $0x1d0] sm:$0xff]  }
  0x83   : > { %3636 = vmatpush3.bf16.msra.mxu1 %v4328_v33  ;;  %3908 = vmatpush3.bf16.msra.mxu0 %v4819_v4  ;;  %v4926_v4 = vld [vmem:[%s4805_s9 + $0xac] ss:$12 sps:$4 sm:$0xff]   ;;  %v4406_v33 = vld [vmem:[%s4805_s9 + $0x50] ss:$12 sps:$4 sm:$0xff]  }
  0x84   : > { %3637 = vmatprep.subr.bf16.mxu1 %v4334_v35  ;;  %3909 = vmatprep.subr.bf16.mxu0 %v4822_v7  ;;  %v4411_v35 = vld [vmem:[%s4805_s9 + $0x68] ss:$12 sps:$4 sm:$0xff]  }
  0x86   : > { %769 = vmatmul.mubr.bf16.gmra.mrb[4].mxu0 %v4859_v34  ;;  %3942 = vmatmul.mubr.bf16.gmra.mrb[4].mxu1 %v4333_v36  ;;  %v4409_v36 = vld [vmem:[#allocation6 + $0x1d8] sm:$0xff]  }
  0x87   : > { %3638 = vmatpush3.bf16.msra.mxu1 %v4335_v37  ;;  %776 = vmatprep.mubr.bf16.mxu0 %v4864_v39  ;;  %v4410_v37 = vld [vmem:[#allocation6 + $0x198] sm:$0xff]  }
  0x88   : > { %3639 = vmatprep.subr.bf16.mxu1 %v4336_v38  ;;  %3945 = vmatprep.mubr.bf16.mxu1 %v4340_v40  ;;  %v4414_v38 = vld [vmem:[#allocation6 + $0x1e0] sm:$0xff]  }
  0x89   : > { %3910 = vmatpush3.bf16.msra.mxu0 %v4822_v7  ;;  %v4933_v7 = vld [vmem:[%s4805_s9 + $0xa8] ss:$12 sps:$4 sm:$0xff]   ;;  %v4412_v40 = vld [vmem:[%s4805_s9 + $0x80] ss:$12 sps:$4 sm:$0xff]  }
  0x8a   : > { %3911 = vmatprep.subr.bf16.mxu0 %v4826_v10 }
  0x8b   : > { %3640 = vmatpush3.bf16.msra.mxu1 %v4337_v41  ;;  %v4415_v41 = vld [vmem:[#allocation6 + $0x1a0] sm:$0xff]  }
  0x8c   : > { %3641 = vmatprep.subr.bf16.mxu1 %v4343_v44  ;;  %v4416_v44 = vld [vmem:[#allocation6 + $0x1e8] sm:$0xff]  }
  0x8d   : > { %3912 = vmatpush3.bf16.msra.mxu0 %v4826_v10  ;;  %v4943_v10 = vld [vmem:[%s4805_s9 + $0xc0] ss:$12 sps:$4 sm:$0xff]  }
  0x8e   : > { %777 = vmatmul.mubr.bf16.gmra.mrb[8].mxu0 %v4872_v42  ;;  %3946 = vmatmul.mubr.bf16.gmra.mrb[8].mxu1 %v4342_v43  ;;  %v4418_v43 = vld [vmem:[%s4805_s9 + $0x98] ss:$12 sps:$4 sm:$0xff]  }
  0x8f   : > { %3642 = vmatpush3.bf16.msra.mxu1 %v4344_v45  ;;  %784 = vmatprep.mubr.bf16.mxu0 %v4878_v47  ;;  %v5033_v45 = vld [vmem:[%s4805_s9 + $0x184] ss:$12 sps:$4 sm:$0xff]  }
  0x90   : > { %3643 = vmatprep.subr.bf16.mxu1 %v4345_v46  ;;  %3949 = vmatprep.mubr.bf16.mxu1 %v4349_v48  ;;  %v4417_v46 = vld [vmem:[#allocation6 + $0x1a8] sm:$0xff]   ;;  %v4423_v48 = vld [vmem:[#allocation6 + $0x1f0] sm:$0xff]  }
  0x91   : > { %3913 = vmatprep.subr.bf16.mxu0 %v4830_v13 }
  0x92   : > { %3914 = vmatpush3.bf16.msra.mxu0 %v4830_v13  ;;  %v4956_v13 = vld [vmem:[%s4805_s9 + $0xf4] ss:$12 sps:$4 sm:$0xff]  }
  0x93   : > { %3644 = vmatpush3.bf16.msra.mxu1 %v4346_v49  ;;  %3915 = vmatprep.subr.bf16.mxu0 %v4834_v16  ;;  %v4421_v49 = vld [vmem:[%s4805_s9 + $0xb0] ss:$12 sps:$4 sm:$0xff]  }
  0x94   : > { %3645 = vmatprep.subr.bf16.mxu1 %v4352_v50  ;;  %v5039_v50 = vld [vmem:[%s4805_s9 + $0x180] ss:$12 sps:$4 sm:$0xff]  }
  0x96   : > { %785 = vmatmul.mubr.bf16.gmra.mrb[12].mxu0 %v4885_v51  ;;  %3950 = vmatmul.mubr.bf16.gmra.mrb[12].mxu1 %v4351_v52  ;;  %v4424_v52 = vld [vmem:[#allocation6 + $0x1b0] sm:$0xff]  }
  0x97   : > { %3646 = vmatpush3.bf16.msra.mxu1 %v4353_v53  ;;  %792 = vmatprep.mubr.bf16.mxu0 %v4891_v54  ;;  %v4427_v53 = vld [vmem:[%s4805_s9 + $0x20] ss:$12 sps:$4 sm:$0xff]  }
  0x98   : > { %3647 = vmatprep.subr.bf16.mxu1 %v4354_v55  ;;  %1659 = vmatprep.mubr.bf16.mxu1 %v4853_v31  ;;  %v4404_v31 = vld [vmem:[#allocation6 + $0x188] sm:$0xff]   ;;  %v4425_v55 = vld [vmem:[#allocation6 + $0x1f8] sm:$0xff]  }
  0x99   : > { %3916 = vmatpush3.bf16.msra.mxu0 %v4834_v16  ;;  %v4969_v16 = vld [vmem:[%s4805_s9 + $0x10c] ss:$12 sps:$4 sm:$0xff]  }
  0x9a   : > { %3917 = vmatprep.subr.bf16.mxu0 %v4838_v19 }
  0x9b   : > { %3648 = vmatpush3.bf16.msra.mxu1 %v4355_v56  ;;  %v4426_v56 = vld [vmem:[#allocation6 + $0x1b8] sm:$0xff]  }
  0x9c   : > { %3953 = vmatprep.subr.bf16.mxu1 %v4359_v57 }
  0x9d   : > { %3918 = vmatpush3.bf16.msra.mxu0 %v4838_v19  ;;  %v4986_v19 = vld [vmem:[%s4805_s9 + $0x120] ss:$12 sps:$4 sm:$0xff]  }
  0x9e   : > { %793 = vmatmul.mubr.bf16.gmra.mrb[16].mxu0 %v4899_v58  ;;  %1660 = vmatmul.mubr.bf16.vlgmr.msra.gmra.mrb[16].mxu1 %v4859_v34  ;;  %v4408_v34 = vld [vmem:[#allocation6 + $0x190] sm:$0xff]  }
  0x9f   : > { %3954 = vmatpush3.bf16.msra.mxu1 %v4359_v57  ;;  %800 = vmatprep.mubr.bf16.mxu0 %v4903_v59  ;;  %v4428_v57 = vld [vmem:[%s4805_s9 + $0x38] ss:$12 sps:$4 sm:$0xff]  }
  0xa0   : > { %1667 = vmatprep.mubr.bf16.mxu1 %v4864_v39  ;;  %3955 = vmatprep.subr.bf16.mxu1 %v4366_v60 }
  0xa1   : > { %3919 = vmatprep.subr.bf16.mxu0 %v4841_v22 }
  0xa2   : > { %3920 = vmatpush3.bf16.msra.mxu0 %v4841_v22  ;;  %v4999_v22 = vld [vmem:[%s4805_s9 + $0x154] ss:$12 sps:$4 sm:$0xff]  }
  0xa3   : > { %3956 = vmatpush3.bf16.msra.mxu1 %v4366_v60  ;;  %3769 = vmatprep.subr.bf16.mxu0 %v4401_v3  ;;  %v4430_v60 = vld [vmem:[%s4805_s9 + $0x50] ss:$12 sps:$4 sm:$0xff]   ;;  %v4433_v3 = vld [vmem:[%s4805_s9 + $0x80] ss:$12 sps:$4 sm:$0xff]  }
  0xa4   : > { %3957 = vmatprep.subr.bf16.mxu1 %v4373_v61 }
  0xa6   : > { %801 = vmatmul.mubr.bf16.gmra.mrb[20].mxu0 %v4912_v62  ;;  %1668 = vmatmul.mubr.bf16.gmra.mrb[20].mxu1 %v4872_v42 }
  0xa7   : > { %808 = vmatprep.mubr.bf16.mxu0 %v4916_v63  ;;  %1675 = vmatprep.mubr.bf16.mxu1 %v4878_v47 }
  0xa8   : > { %3958 = vmatpush3.bf16.msra.mxu1 %v4373_v61  ;;  %v4432_v61 = vld [vmem:[#allocation6 + $0x208] sm:$0xff]  }
  0xa9   : > { %3959 = vmatprep.subr.bf16.mxu1 %v4380_v0 }
  0xac   : > { %3960 = vmatpush3.bf16.msra.mxu1 %v4380_v0  ;;  %v4435_v0 = vld [vmem:[#allocation6 + $0x210] sm:$0xff]  }
  0xad   : > { %3961 = vmatprep.subr.bf16.mxu1 %v4387_v2 }
  0xae   : > { %809 = vmatmul.mubr.bf16.gmra.mrb[24].mxu0 %v4923_v1  ;;  %1676 = vmatmul.mubr.bf16.gmra.mrb[24].mxu1 %v4885_v51 }
  0xaf   : > { %816 = vmatprep.mubr.bf16.mxu0 %v4926_v4  ;;  %1683 = vmatprep.mubr.bf16.mxu1 %v4891_v54 }
  0xb0   : > { %3962 = vmatpush3.bf16.msra.mxu1 %v4387_v2  ;;  %v4431_v2 = vld [vmem:[%s4805_s9 + $0x68] ss:$12 sps:$4 sm:$0xff]  }
  0xb1   : > { %3963 = vmatprep.subr.bf16.mxu1 %v4394_v5 }
  0xb4   : > { %3964 = vmatpush3.bf16.msra.mxu1 %v4394_v5  ;;  %v4436_v5 = vld [vmem:[%s4805_s9 + $0xb0] ss:$12 sps:$4 sm:$0xff]  }
  0xb5   : > { %3965 = vmatprep.subr.bf16.mxu1 %v4400_v6 }
  0xb6   : > { %817 = vmatmul.mubr.bf16.gmra.mrb[28].mxu0 %v4933_v7  ;;  %1684 = vmatmul.mubr.bf16.gmra.mrb[28].mxu1 %v4899_v58 }
  0xb7   : > { %824 = vmatprep.mubr.bf16.mxu0 %v4936_v8  ;;  %1691 = vmatprep.mubr.bf16.mxu1 %v4903_v59 }
  0xb8   : > { %3966 = vmatpush3.bf16.msra.mxu1 %v4400_v6  ;;  %v4444_v6 = vld [vmem:[#allocation6 + $0x228] sm:$0xff]  }
  0xb9   : > { %3967 = vmatprep.subr.bf16.mxu1 %v4413_v9 }
  0xbc   : > { %3968 = vmatpush3.bf16.msra.mxu1 %v4413_v9  ;;  %v4439_v9 = vld [vmem:[%s4805_s9 + $0xe0] ss:$12 sps:$4 sm:$0xff]  }
  0xbd   : > { %4001 = vmatprep.subr.bf16.mxu1 %v4958_v14 }
  0xbe   : > { %825 = vmatmul.mubr.bf16.gmra.mrb[32].mxu0 %v4943_v10  ;;  %1692 = vmatmul.mubr.bf16.gmra.mrb[32].mxu1 %v4912_v62 }
  0xbf   : > { %832 = vmatprep.mubr.bf16.mxu0 %v4946_v11  ;;  %1699 = vmatprep.mubr.bf16.mxu1 %v4916_v63 }
  0xc6   : > { %833 = vmatmul.mubr.bf16.gmra.mrb[36].mxu0 %v4953_v12  ;;  %1700 = vmatmul.mubr.bf16.gmra.mrb[36].mxu1 %v4923_v1 }
  0xc7   : > { %840 = vmatprep.mubr.bf16.mxu0 %v4956_v13  ;;  %1707 = vmatprep.mubr.bf16.mxu1 %v4926_v4 }
  0xce   : > { %841 = vmatmul.mubr.bf16.gmra.mrb[40].mxu0 %v4966_v15  ;;  %1708 = vmatmul.mubr.bf16.gmra.mrb[40].mxu1 %v4933_v7 }
  0xcf   : > { %848 = vmatprep.mubr.bf16.mxu0 %v4969_v16  ;;  %1715 = vmatprep.mubr.bf16.mxu1 %v4936_v8 }
  0xd6   : > { %849 = vmatmul.mubr.bf16.gmra.mrb[44].mxu0 %v4976_v17  ;;  %1716 = vmatmul.mubr.bf16.gmra.mrb[44].mxu1 %v4943_v10 }
  0xd7   : > { %856 = vmatprep.mubr.bf16.mxu0 %v4979_v18  ;;  %1723 = vmatprep.mubr.bf16.mxu1 %v4946_v11 }
  0xde   : > { %857 = vmatmul.mubr.bf16.gmra.mrb[48].mxu0 %v4986_v19  ;;  %1724 = vmatmul.mubr.bf16.gmra.mrb[48].mxu1 %v4953_v12 }
  0xdf   : > { %864 = vmatprep.mubr.bf16.mxu0 %v4989_v20  ;;  %1731 = vmatprep.mubr.bf16.mxu1 %v4956_v13 }
  0xe6   : > { %865 = vmatmul.mubr.bf16.gmra.mrb[52].mxu0 %v4996_v21  ;;  %1732 = vmatmul.mubr.bf16.gmra.mrb[52].mxu1 %v4966_v15 }
  0xe7   : > { %872 = vmatprep.mubr.bf16.mxu0 %v4999_v22  ;;  %1739 = vmatprep.mubr.bf16.mxu1 %v4969_v16 }
  0xee   : > { %873 = vmatmul.mubr.bf16.gmra.mrb[56].mxu0 %v5006_v23  ;;  %1740 = vmatmul.mubr.bf16.gmra.mrb[56].mxu1 %v4976_v17 }
  0xef   : > { %880 = vmatprep.mubr.bf16.mxu0 %v5009_v24  ;;  %1747 = vmatprep.mubr.bf16.mxu1 %v4979_v18 }
  0xf6   : > { %881 = vmatmul.mubr.bf16.gmra.mrb[60].mxu0 %v5016_v25  ;;  %1748 = vmatmul.mubr.bf16.gmra.mrb[60].mxu1 %v4986_v19 }
  0xf7   : > { %3921 = vmatprep.mubr.bf16.mxu0 %v4398_v26  ;;  %1755 = vmatprep.mubr.bf16.mxu1 %v4989_v20  ;;  %v4443_v26 = vld [vmem:[%s4805_s9 + $0x128] ss:$12 sps:$4 sm:$0xff]  }
  0xfe   : > { %3922 = vmatmul.mubr.bf16.vlgmr.msra.gmra.mrb[64].mxu0 %v4399_v27  ;;  %1756 = vmatmul.mubr.bf16.gmra.mrb[64].mxu1 %v4996_v21  ;;  %v4445_v27 = vld [vmem:[%s4805_s9 + $0x140] ss:$12 sps:$4 sm:$0xff]  }
  0xff   : > { %3770 = vmatpush3.bf16.msra.mxu0 %v4402_v28  ;;  %3925 = vmatprep.mubr.bf16.mxu0 %v4405_v29  ;;  %v4449_v28 = vld [vmem:[%s4805_s9 + $0x188] ss:$12 sps:$4 sm:$0xff]  }
 0x100   : > { %3771 = vmatprep.subr.bf16.mxu0 %v4403_v30  ;;  %1763 = vmatprep.mubr.bf16.mxu1 %v4999_v22 }
 0x103   : > { %3772 = vmatpush3.bf16.msra.mxu0 %v4404_v31 }
 0x104   : > { %3773 = vmatprep.subr.bf16.mxu0 %v4407_v32 }
 0x106   : > { %3926 = vmatmul.mubr.bf16.gmra.mrb[68].mxu0 %v4406_v33  ;;  %1764 = vmatmul.mubr.bf16.gmra.mrb[68].mxu1 %v5006_v23 }
 0x107   : > { %3774 = vmatpush3.bf16.msra.mxu0 %v4408_v34  ;;  %3929 = vmatprep.mubr.bf16.mxu0 %v4411_v35  ;;  %v4453_v35 = vld [vmem:[%s4805_s9 + $0x68] ss:$12 sps:$4 sm:$0xff]  }
 0x108   : > { %3775 = vmatprep.subr.bf16.mxu0 %v4409_v36  ;;  %1771 = vmatprep.mubr.bf16.mxu1 %v5009_v24 }
 0x10b   : > { %3776 = vmatpush3.bf16.msra.mxu0 %v4410_v37 }
 0x10c   : > { %3777 = vmatprep.subr.bf16.mxu0 %v4414_v38  ;;  %v4454_v38 = vld [vmem:[%s4805_s9 + $0x80] ss:$12 sps:$4 sm:$0xff]  }
 0x10e   : > { %3930 = vmatmul.mubr.bf16.gmra.mrb[72].mxu0 %v4412_v40  ;;  %1772 = vmatmul.mubr.bf16.gmra.mrb[72].mxu1 %v5016_v25 }
 0x10f   : > { %3778 = vmatpush3.bf16.msra.mxu0 %v4415_v41  ;;  %3933 = vmatprep.mubr.bf16.mxu0 %v4418_v43  ;;  %v4455_v43 = vld [vmem:[%s4805_s9 + $0x98] ss:$12 sps:$4 sm:$0xff]  }
 0x110   : > { %3779 = vmatprep.subr.bf16.mxu0 %v4416_v44  ;;  %1779 = vmatprep.mubr.bf16.mxu1 %v5033_v45 }
 0x113   : > { %3780 = vmatpush3.bf16.msra.mxu0 %v4417_v46 }
 0x114   : > { %3781 = vmatprep.subr.bf16.mxu0 %v4423_v48  ;;  %v4456_v48 = vld [vmem:[%s4805_s9 + $0xb0] ss:$12 sps:$4 sm:$0xff]  }
 0x116   : > { %3934 = vmatmul.mubr.bf16.gmra.mrb[76].mxu0 %v4421_v49  ;;  %1780 = vmatmul.mubr.bf16.gmra.mrb[76].mxu1 %v5039_v50 }
 0x117   : > { %3782 = vmatpush3.bf16.msra.mxu0 %v4424_v52  ;;  %3969 = vmatprep.mubr.bf16.mxu1 %v4427_v53  ;;  %v4457_v53 = vld [vmem:[%s4805_s9 + $0xc8] ss:$12 sps:$4 sm:$0xff]  }
 0x118   : > { %3783 = vmatprep.subr.bf16.mxu0 %v4425_v55  ;;  %2590 = vmatprep.mubr.bf16.mxu0 %v4864_v39  ;;  %v4438_v39 = vld [vmem:[#allocation6 + $0x218] sm:$0xff]  }
 0x11b   : > { %3784 = vmatpush3.bf16.msra.mxu0 %v4426_v56 }
 0x11e   : > { %3970 = vmatmul.mubr.bf16.vlgmr.msra.gmra.mrb[80].mxu1 %v4428_v57  ;;  %2591 = vmatmul.mubr.bf16.vlgmr.msra.gmra.mrb[80].mxu0 %v4872_v42  ;;  %v4441_v42 = vld [vmem:[#allocation6 + $0x220] sm:$0xff]  }
 0x11f   : > { %4002 = vmatpush3.bf16.msra.mxu1 %v4958_v14  ;;  %3973 = vmatprep.mubr.bf16.mxu1 %v4430_v60  ;;  %v4450_v14 = vld [vmem:[#allocation6 + $0x238] sm:$0xff]  }
 0x120   : > { %2598 = vmatprep.mubr.bf16.mxu0 %v4878_v47  ;;  %4003 = vmatprep.subr.bf16.mxu1 %v4432_v61  ;;  %v4434_v47 = vld [vmem:[%s4805_s9 + $0x98] ss:$12 sps:$4 sm:$0xff]  }
 0x123   : > { %4004 = vmatpush3.bf16.msra.mxu1 %v4432_v61  ;;  %v4458_v61 = vld [vmem:[%s4805_s9 + $0xe0] ss:$12 sps:$4 sm:$0xff]  }
 0x124   : > { %4005 = vmatprep.subr.bf16.mxu1 %v4435_v0 }
 0x126   : > { %3974 = vmatmul.mubr.bf16.gmra.mrb[84].mxu1 %v4431_v2  ;;  %2599 = vmatmul.mubr.bf16.gmra.mrb[84].mxu0 %v4885_v51  ;;  %v4447_v51 = vld [vmem:[#allocation6 + $0x230] sm:$0xff]  }
 0x127   : > { %3977 = vmatprep.mubr.bf16.mxu1 %v4433_v3  ;;  %2606 = vmatprep.mubr.bf16.mxu0 %v4891_v54  ;;  %v4437_v54 = vld [vmem:[%s4805_s9 + $0xc8] ss:$12 sps:$4 sm:$0xff]  }
 0x128   : > { %4006 = vmatpush3.bf16.msra.mxu1 %v4435_v0 }
 0x129   : > { %4007 = vmatprep.subr.bf16.mxu1 %v4438_v39 }
 0x12c   : > { %4008 = vmatpush3.bf16.msra.mxu1 %v4438_v39 }
 0x12d   : > { %4009 = vmatprep.subr.bf16.mxu1 %v4441_v42 }
 0x12e   : > { %3978 = vmatmul.mubr.bf16.gmra.mrb[88].mxu1 %v4434_v47  ;;  %2607 = vmatmul.mubr.bf16.gmra.mrb[88].mxu0 %v4899_v58  ;;  %v4440_v58 = vld [vmem:[%s4805_s9 + $0xf8] ss:$12 sps:$4 sm:$0xff]  }
 0x12f   : > { %3981 = vmatprep.mubr.bf16.mxu1 %v4436_v5  ;;  %2614 = vmatprep.mubr.bf16.mxu0 %v4903_v59  ;;  %v4442_v59 = vld [vmem:[%s4805_s9 + $0x110] ss:$12 sps:$4 sm:$0xff]  }
 0x130   : > { %4010 = vmatpush3.bf16.msra.mxu1 %v4441_v42  ;;  %v4459_v42 = vld [vmem:[%s4805_s9 + $0xf8] ss:$12 sps:$4 sm:$0xff]  }
 0x131   : > { %4011 = vmatprep.subr.bf16.mxu1 %v4444_v6 }
 0x134   : > { %4012 = vmatpush3.bf16.msra.mxu1 %v4444_v6 }
 0x135   : > { %4013 = vmatprep.subr.bf16.mxu1 %v4447_v51 }
 0x136   : > { %3982 = vmatmul.mubr.bf16.gmra.mrb[92].mxu1 %v4437_v54  ;;  %2615 = vmatmul.mubr.bf16.gmra.mrb[92].mxu0 %v4912_v62  ;;  %v4446_v62 = vld [vmem:[%s4805_s9 + $0x158] ss:$12 sps:$4 sm:$0xff]  }
 0x137   : > { %3985 = vmatprep.mubr.bf16.mxu1 %v4439_v9  ;;  %2622 = vmatprep.mubr.bf16.mxu0 %v4916_v63  ;;  %v4448_v63 = vld [vmem:[%s4805_s9 + $0x170] ss:$12 sps:$4 sm:$0xff]  }
 0x138   : > { %4014 = vmatpush3.bf16.msra.mxu1 %v4447_v51 }
 0x139   : > { %4015 = vmatprep.subr.bf16.mxu1 %v4450_v14 }
 0x13c   : > { %4016 = vmatpush3.bf16.msra.mxu1 %v4450_v14  ;;  %v4460_v14 = vld [vmem:[%s4805_s9 + $0x110] ss:$12 sps:$4 sm:$0xff]  }
 0x13e   : > { %3986 = vmatmul.mubr.bf16.gmra.mrb[0].mxu1 %v4440_v58  ;;  %2623 = vmatmul.mubr.bf16.gmra.mrb[96].mxu0 %v4923_v1 }
 0x13f   : > { %3989 = vmatprep.mubr.bf16.mxu1 %v4442_v59  ;;  %2630 = vmatprep.mubr.bf16.mxu0 %v4926_v4 }
 0x146   : > { %3990 = vmatmul.mubr.bf16.gmra.mrb[4].mxu1 %v4443_v26  ;;  %2631 = vmatmul.mubr.bf16.gmra.mrb[100].mxu0 %v4933_v7  ;;  %v4451_v7 = vld [vmem:[%s4805_s9 + $0x38] ss:$12 sps:$4 sm:$0xff]  }
 0x147   : > { %3993 = vmatprep.mubr.bf16.mxu1 %v4445_v27  ;;  %2638 = vmatprep.mubr.bf16.mxu0 %v4936_v8 }
 0x14e   : > { %3994 = vmatmul.mubr.bf16.gmra.mrb[8].mxu1 %v4446_v62  ;;  %2639 = vmatmul.mubr.bf16.gmra.mrb[104].mxu0 %v4943_v10  ;;  %v4461_v62 = vld [vmem:[%s4805_s9 + $0x128] ss:$12 sps:$4 sm:$0xff]  }
 0x14f   : > { %3997 = vmatprep.mubr.bf16.mxu1 %v4448_v63  ;;  %2646 = vmatprep.mubr.bf16.mxu0 %v4946_v11  ;;  %v4452_v11 = vld [vmem:[%s4805_s9 + $0x50] ss:$12 sps:$4 sm:$0xff]  }
 0x151   : > { %v3513_v1 = vpop.f32.mrb[0].mxu0 }
 0x152   : > { %v3514_v4 = vpop.f32.mrb[1].mxu0 }
 0x153   : > { %v5074_v29 = vadd.f32 %v3514_v4, %v3513_v1  ;;  %v3516_v30 = vpop.f32.mrb[2].mxu0 }
 0x154   : > { %v3517_v31 = vpop.f32.mrb[3].mxu0 }
 0x155   : > { %v5077_v32 = vadd.f32 %v3517_v31, %v3516_v30  ;;  %v4462_v31 = vld [vmem:[%s4805_s9 + $0x140] ss:$12 sps:$4 sm:$0xff]  }
 0x156   : > { %3998 = vmatmul.mubr.bf16.gmra.mrb[12].mxu1 %v4449_v28  ;;  %2647 = vmatmul.mubr.bf16.gmra.mrb[108].mxu0 %v4953_v12 }
 0x157   : > { %2654 = vmatprep.mubr.bf16.mxu0 %v4956_v13  ;;  %4017 = vmatprep.mubr.bf16.mxu1 %v4451_v7 }
 0x159   : > { %v3519_v8 = vpop.f32.mrb[4].mxu0 }
 0x15a   : > { %v3520_v10 = vpop.f32.mrb[5].mxu0 }
 0x15b   : > { %v5082_v33 = vadd.f32 %v3520_v10, %v3519_v8  ;;  %v3522_v34 = vpop.f32.mrb[6].mxu0 }
 0x15c   : > { %v3523_v36 = vpop.f32.mrb[7].mxu0 }
 0x15d   : > { %v5085_v37 = vadd.f32 %v3523_v36, %v3522_v34 }
 0x15e   : > { %2655 = vmatmul.mubr.bf16.gmra.mrb[112].mxu0 %v4966_v15  ;;  %4018 = vmatmul.mubr.bf16.vlgmr.msra.gmra.mrb[80].mxu1 %v4452_v11 }
 0x15f   : > { %2662 = vmatprep.mubr.bf16.mxu0 %v4969_v16  ;;  %4021 = vmatprep.mubr.bf16.mxu1 %v4453_v35  ;;  %v4463_v35 = vld [vmem:[%s4805_s9 + $0x158] ss:$12 sps:$4 sm:$0xff]  }
 0x161   : > { %v3525_v12 = vpop.f32.mrb[8].mxu0 }
 0x162   : > { %v3526_v13 = vpop.f32.mrb[9].mxu0 }
 0x163   : > { %v5090_v40 = vadd.f32 %v3526_v13, %v3525_v12  ;;  %v3528_v41 = vpop.f32.mrb[10].mxu0 }
 0x164   : > { %v3529_v44 = vpop.f32.mrb[11].mxu0 }
 0x165   : > { %v5093_v46 = vadd.f32 %v3529_v44, %v3528_v41  ;;  %v4464_v44 = vld [vmem:[%s4805_s9 + $0x170] ss:$12 sps:$4 sm:$0xff]  }
 0x166   : > { %2663 = vmatmul.mubr.bf16.gmra.mrb[116].mxu0 %v4976_v17  ;;  %4022 = vmatmul.mubr.bf16.gmra.mrb[84].mxu1 %v4454_v38 }
 0x167   : > { %2670 = vmatprep.mubr.bf16.mxu0 %v4979_v18  ;;  %4025 = vmatprep.mubr.bf16.mxu1 %v4455_v43 }
 0x169   : > { %v3531_v15 = vpop.f32.mrb[12].mxu0 }
 0x16a   : > { %v3532_v16 = vpop.f32.mrb[13].mxu0 }
 0x16b   : > { %v5098_v49 = vadd.f32 %v3532_v16, %v3531_v15  ;;  %v3534_v52 = vpop.f32.mrb[14].mxu0 }
 0x16c   : > { %v3535_v55 = vpop.f32.mrb[15].mxu0 }
 0x16d   : > { %v5101_v56 = vadd.f32 %v3535_v55, %v3534_v52  ;;  %v4467_v55 = vld [vmem:[%s4805_s9 + $0x188] ss:$12 sps:$4 sm:$0xff]  }
 0x16e   : > { %2671 = vmatmul.mubr.bf16.gmra.mrb[120].mxu0 %v4986_v19  ;;  %4026 = vmatmul.mubr.bf16.gmra.mrb[88].mxu1 %v4456_v48 }
 0x16f   : > { %2678 = vmatprep.mubr.bf16.mxu0 %v4989_v20  ;;  %4029 = vmatprep.mubr.bf16.mxu1 %v4457_v53  ;;  %v4465_v53 = vld [vmem:[%s4805_s9 + $0x19c] ss:$12 sps:$4 sm:$0xff]  }
 0x171   : > { %v3537_v17 = vpop.f32.mrb[16].mxu0  ;;  %v3649_v18 = vpop.f32.mrb[16].mxu1 }
 0x172   : > { %v3538_v57 = vpop.f32.mrb[17].mxu0  ;;  %v3650_v60 = vpop.f32.mrb[17].mxu1 }
 0x173   : > { %v5106_v0 = vadd.f32 %v3538_v57, %v3537_v17  ;;  %v5108_v2 = vadd.f32 %v3650_v60, %v3649_v18  ;;  %v3540_v3 = vpop.f32.mrb[18].mxu0  ;;  %v3652_v39 = vpop.f32.mrb[18].mxu1 }
 0x174   : > { %v3541_v47 = vpop.f32.mrb[19].mxu0  ;;  %v3653_v5 = vpop.f32.mrb[19].mxu1 }
 0x175   : > { %v5111_v19 = vadd.f32 %v3541_v47, %v3540_v3  ;;  %v5113_v20 = vadd.f32 %v3653_v5, %v3652_v39  ;;  %v4468_v39 = vld [vmem:[%s4805_s9 + $0x198] ss:$12 sps:$4 sm:$0xff]  }
 0x176   : > { %2679 = vmatmul.mubr.bf16.gmra.mrb[124].mxu0 %v4996_v21  ;;  %4030 = vmatmul.mubr.bf16.gmra.mrb[92].mxu1 %v4458_v61 }
 0x177   : > { %2686 = vmatprep.mubr.bf16.mxu0 %v4999_v22  ;;  %4033 = vmatprep.mubr.bf16.mxu1 %v4459_v42  ;;  %v4469_v42 = vld [vmem:[%s4805_s9 + $0x1a0] ss:$12 sps:$4 sm:$0xff]  }
 0x179   : > { %v3543_v6 = vpop.f32.mrb[20].mxu0  ;;  %v3655_v51 = vpop.f32.mrb[20].mxu1 }
 0x17a   : > { %v3544_v54 = vpop.f32.mrb[21].mxu0  ;;  %v3656_v9 = vpop.f32.mrb[21].mxu1 }
 0x17b   : > { %v5118_v58 = vadd.f32 %v3544_v54, %v3543_v6  ;;  %v5120_v59 = vadd.f32 %v3656_v9, %v3655_v51  ;;  %v3546_v26 = vpop.f32.mrb[22].mxu0  ;;  %v3658_v27 = vpop.f32.mrb[22].mxu1 }
 0x17c   : > { %v3547_v63 = vpop.f32.mrb[23].mxu0  ;;  %v3659_v1 = vpop.f32.mrb[23].mxu1 }
 0x17d   : > { %v5123_v21 = vadd.f32 %v3547_v63, %v3546_v26  ;;  %v5125_v22 = vadd.f32 %v3659_v1, %v3658_v27 }
 0x17e   : > { %2687 = vmatmul.mubr.bf16.gmra.mrb[128].mxu0 %v5006_v23  ;;  %4034 = vmatmul.mubr.bf16.gmra.mrb[0].mxu1 %v4460_v14 }
 0x17f   : > { %2694 = vmatprep.mubr.bf16.mxu0 %v5009_v24  ;;  %4037 = vmatprep.mubr.bf16.mxu1 %v4461_v62 }
 0x181   : > { %v3549_v4 = vpop.f32.mrb[24].mxu0  ;;  %v3661_v28 = vpop.f32.mrb[24].mxu1 }
 0x182   : > { %v3550_v30 = vpop.f32.mrb[25].mxu0  ;;  %v3662_v7 = vpop.f32.mrb[25].mxu1 }
 0x183   : > { %v5130_v8 = vadd.f32 %v3550_v30, %v3549_v4  ;;  %v5132_v10 = vadd.f32 %v3662_v7, %v3661_v28  ;;  %v3552_v11 = vpop.f32.mrb[26].mxu0  ;;  %v3664_v34 = vpop.f32.mrb[26].mxu1 }
 0x184   : > { %v3553_v36 = vpop.f32.mrb[27].mxu0  ;;  %v3665_v12 = vpop.f32.mrb[27].mxu1 }
 0x185   : > { %v5135_v23 = vadd.f32 %v3553_v36, %v3552_v11  ;;  %v5137_v24 = vadd.f32 %v3665_v12, %v3664_v34 }
 0x186   : > { %2695 = vmatmul.mubr.bf16.gmra.mrb[132].mxu0 %v5016_v25  ;;  %4038 = vmatmul.mubr.bf16.gmra.mrb[4].mxu1 %v4462_v31 }
 0x187   : > { %2702 = vmatprep.mubr.bf16.mxu0 %v5033_v45  ;;  %4041 = vmatprep.mubr.bf16.mxu1 %v4463_v35 }
 0x189   : > { %v3555_v13 = vpop.f32.mrb[28].mxu0  ;;  %v3667_v38 = vpop.f32.mrb[28].mxu1 }
 0x18a   : > { %v3556_v41 = vpop.f32.mrb[29].mxu0  ;;  %v3668_v43 = vpop.f32.mrb[29].mxu1 }
 0x18b   : > { %v5142_v15 = vadd.f32 %v3556_v41, %v3555_v13  ;;  %v5144_v16 = vadd.f32 %v3668_v43, %v3667_v38  ;;  %v3558_v48 = vpop.f32.mrb[30].mxu0  ;;  %v3670_v52 = vpop.f32.mrb[30].mxu1 }
 0x18c   : > { %v3559_v25 = vpop.f32.mrb[31].mxu0  ;;  %v3671_v17 = vpop.f32.mrb[31].mxu1 }
 0x18d   : > { %v5148_v18 = vadd.f32 %v3559_v25, %v3558_v48  ;;  %v5150_v45 = vadd.f32 %v3671_v17, %v3670_v52 }
 0x18e   : > { %2703 = vmatmul.mubr.bf16.gmra.mrb[136].mxu0 %v5039_v50  ;;  %4042 = vmatmul.mubr.bf16.gmra.mrb[8].mxu1 %v4464_v44 }
 0x18f   : > { %2710 = vmatprep.mubr.bf16.mxu0 %v4465_v53  ;;  %4045 = vmatprep.mubr.bf16.mxu1 %v4467_v55 }
 0x191   : > { %v3561_v57 = vpop.f32.mrb[32].mxu0  ;;  %v3673_v60 = vpop.f32.mrb[32].mxu1 }
 0x192   : > { %v3562_v61 = vpop.f32.mrb[33].mxu0  ;;  %v3674_v3 = vpop.f32.mrb[33].mxu1 }
 0x193   : > { %v3563_v47 = vadd.f32 %v3562_v61, %v3561_v57  ;;  %v5155_v5 = vadd.f32 %v3674_v3, %v3673_v60  ;;  %v3564_v6 = vpop.f32.mrb[34].mxu0  ;;  %v3676_v51 = vpop.f32.mrb[34].mxu1 }
 0x194   : > { %v3565_v54 = vpop.f32.mrb[35].mxu0  ;;  %v3677_v9 = vpop.f32.mrb[35].mxu1 }
 0x195   : > { %v3566_v14 = vadd.f32 %v3565_v54, %v3564_v6  ;;  %v5157_v26 = vadd.f32 %v3677_v9, %v3676_v51 }
 0x196   : > { %2711 = vmatmul.mubr.bf16.gmra.mrb[140].mxu0 %v4468_v39  ;;  %4046 = vmatmul.mubr.bf16.gmra.mrb[12].mxu1 %v4469_v42 }
 0x199   : > { %v3567_v50 = vpop.f32.mrb[36].mxu0  ;;  %v3679_v27 = vpop.f32.mrb[36].mxu1 }
 0x19a   : > { %v3568_v62 = vpop.f32.mrb[37].mxu0  ;;  %v3680_v63 = vpop.f32.mrb[37].mxu1 }
 0x19b   : > { %v3569_v1 = vadd.f32 %v3568_v62, %v3567_v50  ;;  %v5159_v4 = vadd.f32 %v3680_v63, %v3679_v27  ;;  %v3570_v28 = vpop.f32.mrb[38].mxu0  ;;  %v3682_v30 = vpop.f32.mrb[38].mxu1 }
 0x19c   : > { %v3571_v7 = vpop.f32.mrb[39].mxu0  ;;  %v3683_v31 = vpop.f32.mrb[39].mxu1 }
 0x19d   : > { %v3572_v11 = vadd.f32 %v3571_v7, %v3570_v28  ;;  %v5161_v34 = vadd.f32 %v3683_v31, %v3682_v30 }
 0x1a1   : > { %v3573_v35 = vpop.f32.mrb[40].mxu0  ;;  %v3685_v36 = vpop.f32.mrb[40].mxu1 }
 0x1a2   : > { %v3574_v12 = vpop.f32.mrb[41].mxu0  ;;  %v3686_v13 = vpop.f32.mrb[41].mxu1 }
 0x1a3   : > { %v3575_v38 = vadd.f32 %v3574_v12, %v3573_v35  ;;  %v5163_v41 = vadd.f32 %v3686_v13, %v3685_v36  ;;  %v3576_v43 = vpop.f32.mrb[42].mxu0  ;;  %v3688_v44 = vpop.f32.mrb[42].mxu1 }
 0x1a4   : > { %v3577_v48 = vpop.f32.mrb[43].mxu0  ;;  %v3689_v52 = vpop.f32.mrb[43].mxu1 }
 0x1a5   : > { %v3578_v53 = vadd.f32 %v3577_v48, %v3576_v43  ;;  %v5165_v55 = vadd.f32 %v3689_v52, %v3688_v44 }
 0x1a9   : > { %v3579_v25 = vpop.f32.mrb[44].mxu0  ;;  %v3691_v17 = vpop.f32.mrb[44].mxu1 }
 0x1aa   : > { %v3580_v57 = vpop.f32.mrb[45].mxu0  ;;  %v3692_v60 = vpop.f32.mrb[45].mxu1 }
 0x1ab   : > { %v3581_v61 = vadd.f32 %v3580_v57, %v3579_v25  ;;  %v5167_v3 = vadd.f32 %v3692_v60, %v3691_v17  ;;  %v3582_v39 = vpop.f32.mrb[46].mxu0  ;;  %v3694_v42 = vpop.f32.mrb[46].mxu1 }
 0x1ac   : > { %v3583_v6 = vpop.f32.mrb[47].mxu0  ;;  %v3695_v51 = vpop.f32.mrb[47].mxu1 }
 0x1ad   : > { %v3584_v54 = vadd.f32 %v3583_v6, %v3582_v39  ;;  %v5169_v9 = vadd.f32 %v3695_v51, %v3694_v42 }
 0x1b1   : > { %v3585_v50 = vpop.f32.mrb[48].mxu0  ;;  %v3697_v27 = vpop.f32.mrb[48].mxu1 }
 0x1b2   : > { %v3586_v62 = vpop.f32.mrb[49].mxu0  ;;  %v3698_v63 = vpop.f32.mrb[49].mxu1 }
 0x1b3   : > { %v5171_v28 = vadd.f32 %v3586_v62, %v3585_v50  ;;  %v3699_v30 = vadd.f32 %v3698_v63, %v3697_v27  ;;  %v3588_v7 = vpop.f32.mrb[50].mxu0  ;;  %v3700_v31 = vpop.f32.mrb[50].mxu1 }
 0x1b4   : > { %v3589_v35 = vpop.f32.mrb[51].mxu0  ;;  %v3701_v36 = vpop.f32.mrb[51].mxu1 }
 0x1b5   : > { %v5173_v12 = vadd.f32 %v3699_v30, %v3563_v47  ;;  %v5175_v13 = vadd.f32 %v3589_v35, %v3588_v7  ;;  %v3702_v43 = vadd.f32 %v3701_v36, %v3700_v31 }
 0x1b7   : > { %v5177_v44 = vadd.f32 %v3702_v43, %v3566_v14 }
 0x1b9   : > { %v3591_v48 = vpop.f32.mrb[52].mxu0  ;;  %v3703_v52 = vpop.f32.mrb[52].mxu1 }
 0x1ba   : > { %v3592_v25 = vpop.f32.mrb[53].mxu0  ;;  %v3704_v17 = vpop.f32.mrb[53].mxu1 }
 0x1bb   : > { %v5179_v57 = vadd.f32 %v3592_v25, %v3591_v48  ;;  %v3705_v60 = vadd.f32 %v3704_v17, %v3703_v52  ;;  %v3594_v39 = vpop.f32.mrb[54].mxu0  ;;  %v3706_v42 = vpop.f32.mrb[54].mxu1 }
 0x1bc   : > { %v3595_v6 = vpop.f32.mrb[55].mxu0  ;;  %v3707_v51 = vpop.f32.mrb[55].mxu1 }
 0x1bd   : > { %v5181_v50 = vadd.f32 %v3705_v60, %v3569_v1  ;;  %v5183_v47 = vadd.f32 %v3595_v6, %v3594_v39  ;;  %v3708_v27 = vadd.f32 %v3707_v51, %v3706_v42 }
 0x1bf   : > { %v5185_v62 = vadd.f32 %v3708_v27, %v3572_v11 }
 0x1c1   : > { %5509 = vst [vmem:[#allocation15_spill] sm:$0xff] %v5185_v62  ;;  %v3597_v14 = vpop.f32.mrb[56].mxu0  ;;  %v3709_v63 = vpop.f32.mrb[56].mxu1 }
 0x1c2   : > { %v3598_v30 = vpop.f32.mrb[57].mxu0  ;;  %v3710_v7 = vpop.f32.mrb[57].mxu1 }
 0x1c3   : > { %v5187_v31 = vadd.f32 %v3598_v30, %v3597_v14  ;;  %v3711_v35 = vadd.f32 %v3710_v7, %v3709_v63  ;;  %v3600_v36 = vpop.f32.mrb[58].mxu0  ;;  %v3712_v43 = vpop.f32.mrb[58].mxu1 }
 0x1c4   : > { %v3601_v48 = vpop.f32.mrb[59].mxu0  ;;  %v3713_v52 = vpop.f32.mrb[59].mxu1 }
 0x1c5   : > { %v5189_v25 = vadd.f32 %v3711_v35, %v3575_v38  ;;  %v5191_v1 = vadd.f32 %v3601_v48, %v3600_v36  ;;  %v3714_v17 = vadd.f32 %v3713_v52, %v3712_v43 }
 0x1c7   : > { %v5193_v60 = vadd.f32 %v3714_v17, %v3578_v53 }
 0x1c9   : > { %5510 = vst [vmem:[#allocation16_spill] sm:$0xff] %v5193_v60  ;;  %v3603_v11 = vpop.f32.mrb[60].mxu0  ;;  %v3715_v39 = vpop.f32.mrb[60].mxu1 }
 0x1ca   : > { %v3604_v42 = vpop.f32.mrb[61].mxu0  ;;  %v3716_v6 = vpop.f32.mrb[61].mxu1 }
 0x1cb   : > { %v5195_v51 = vadd.f32 %v3604_v42, %v3603_v11  ;;  %v3717_v27 = vadd.f32 %v3716_v6, %v3715_v39  ;;  %v3606_v14 = vpop.f32.mrb[62].mxu0  ;;  %v3718_v63 = vpop.f32.mrb[62].mxu1 }
 0x1cc   : > { %v3607_v30 = vpop.f32.mrb[63].mxu0  ;;  %v3719_v7 = vpop.f32.mrb[63].mxu1 }
 0x1cd   : > { %v5197_v62 = vadd.f32 %v3717_v27, %v3581_v61  ;;  %v5199_v38 = vadd.f32 %v3607_v30, %v3606_v14  ;;  %v3720_v35 = vadd.f32 %v3719_v7, %v3718_v63 }
 0x1cf   : > { %v5201_v36 = vadd.f32 %v3720_v35, %v3584_v54 }
 0x1d1   : > { %v3923_v53 = vpop.f32.mrb[64].mxu0  ;;  %v3721_v43 = vpop.f32.mrb[64].mxu1 }
 0x1d2   : > { %v932_v48 = vadd.f32 %v3923_v53, %v5082_v33  ;;  %v923_v52 = vpop.f32.mrb[65].mxu0  ;;  %v3722_v17 = vpop.f32.mrb[65].mxu1 }
 0x1d3   : > { %v924_v11 = vadd.f32 %v5074_v29, %v923_v52  ;;  %v3723_v39 = vadd.f32 %v3722_v17, %v3721_v43  ;;  %v3924_v42 = vpop.f32.mrb[66].mxu0  ;;  %v3724_v6 = vpop.f32.mrb[66].mxu1 }
 0x1d4   : > { %v5206_v60 = vadd.f32 %v5120_v59, %v932_v48  ;;  %v935_v61 = vadd.f32 %v3924_v42, %v5085_v37  ;;  %v926_v27 = vpop.f32.mrb[67].mxu0  ;;  %v3725_v14 = vpop.f32.mrb[67].mxu1 }
 0x1d5   : > { %v5210_v54 = vadd.f32 %v5108_v2, %v924_v11  ;;  %v5213_v63 = vadd.f32 %v3723_v39, %v5171_v28  ;;  %v927_v33 = vadd.f32 %v5077_v32, %v926_v27  ;;  %v3726_v30 = vadd.f32 %v3725_v14, %v3724_v6 }
 0x1d6   : > { %v5217_v29 = vadd.f32 %v5125_v22, %v935_v61 }
 0x1d7   : > { %v5220_v7 = vadd.f32 %v5113_v20, %v927_v33  ;;  %v5223_v59 = vadd.f32 %v3726_v30, %v5175_v13 }
 0x1d9   : > { %v3927_v37 = vpop.f32.mrb[68].mxu0  ;;  %v3727_v35 = vpop.f32.mrb[68].mxu1 }
 0x1da   : > { %v948_v2 = vadd.f32 %v3927_v37, %v5098_v49  ;;  %v939_v53 = vpop.f32.mrb[69].mxu0  ;;  %v3728_v43 = vpop.f32.mrb[69].mxu1 }
 0x1db   : > { %v940_v28 = vadd.f32 %v5090_v40, %v939_v53  ;;  %v3729_v48 = vadd.f32 %v3728_v43, %v3727_v35  ;;  %v3928_v32 = vpop.f32.mrb[70].mxu0  ;;  %v3730_v52 = vpop.f32.mrb[70].mxu1 }
 0x1dc   : > { %v5228_v22 = vadd.f32 %v5144_v16, %v948_v2  ;;  %v951_v20 = vadd.f32 %v3928_v32, %v5101_v56  ;;  %v942_v17 = vpop.f32.mrb[71].mxu0  ;;  %v3731_v11 = vpop.f32.mrb[71].mxu1 }
 0x1dd   : > { %v5232_v13 = vadd.f32 %v5132_v10, %v940_v28  ;;  %v5235_v39 = vadd.f32 %v3729_v48, %v5179_v57  ;;  %v943_v49 = vadd.f32 %v5093_v46, %v942_v17  ;;  %v3732_v42 = vadd.f32 %v3731_v11, %v3730_v52 }
 0x1de   : > { %v5239_v40 = vadd.f32 %v5150_v45, %v951_v20 }
 0x1df   : > { %v5242_v6 = vadd.f32 %v5137_v24, %v943_v49  ;;  %v5245_v16 = vadd.f32 %v3732_v42, %v5183_v47 }
 0x1e1   : > { %v3931_v56 = vpop.f32.mrb[72].mxu0  ;;  %v3733_v61 = vpop.f32.mrb[72].mxu1 }
 0x1e2   : > { %v964_v10 = vadd.f32 %v3931_v56, %v5118_v58  ;;  %v955_v27 = vpop.f32.mrb[73].mxu0  ;;  %v3734_v14 = vpop.f32.mrb[73].mxu1 }
 0x1e3   : > { %v956_v57 = vadd.f32 %v5106_v0, %v955_v27  ;;  %v3735_v33 = vadd.f32 %v3734_v14, %v3733_v61  ;;  %v3932_v46 = vpop.f32.mrb[74].mxu0  ;;  %v3736_v30 = vpop.f32.mrb[74].mxu1 }
 0x1e4   : > { %v5250_v45 = vadd.f32 %v5159_v4, %v964_v10  ;;  %v967_v24 = vadd.f32 %v3932_v46, %v5123_v21  ;;  %v958_v37 = vpop.f32.mrb[75].mxu0  ;;  %v3737_v35 = vpop.f32.mrb[75].mxu1 }
 0x1e5   : > { %v5254_v47 = vadd.f32 %v5155_v5, %v956_v57  ;;  %v5257_v2 = vadd.f32 %v3735_v33, %v5187_v31  ;;  %v959_v58 = vadd.f32 %v5111_v19, %v958_v37  ;;  %v3738_v53 = vadd.f32 %v3737_v35, %v3736_v30 }
 0x1e6   : > { %v5261_v0 = vadd.f32 %v5161_v34, %v967_v24 }
 0x1e7   : > { %v4110_v43 = vadd.f32 %v5157_v26, %v959_v58  ;;  %v5265_v4 = vadd.f32 %v3738_v53, %v5191_v1 }
 0x1e9   : > { %v3935_v21 = vpop.f32.mrb[76].mxu0  ;;  %v3739_v28 = vpop.f32.mrb[76].mxu1 }
 0x1ea   : > { %v980_v48 = vadd.f32 %v3935_v21, %v5142_v15  ;;  %v971_v5 = vpop.f32.mrb[77].mxu0  ;;  %v3740_v32 = vpop.f32.mrb[77].mxu1 }
 0x1eb   : > { %v972_v31 = vadd.f32 %v5130_v8, %v971_v5  ;;  %v3741_v52 = vadd.f32 %v3740_v32, %v3739_v28  ;;  %v3936_v20 = vpop.f32.mrb[78].mxu0  ;;  %v3742_v19 = vpop.f32.mrb[78].mxu1 }
 0x1ec   : > { %v5270_v17 = vadd.f32 %v5167_v3, %v980_v48  ;;  %v983_v34 = vadd.f32 %v3936_v20, %v5148_v18  ;;  %v974_v26 = vpop.f32.mrb[79].mxu0  ;;  %v3743_v11 = vpop.f32.mrb[79].mxu1 }
 0x1ed   : > { %v4118_v1 = vadd.f32 %v5163_v41, %v972_v31  ;;  %v5275_v49 = vadd.f32 %v3741_v52, %v5195_v51  ;;  %v975_v15 = vadd.f32 %v5135_v23, %v974_v26  ;;  %v3744_v42 = vadd.f32 %v3743_v11, %v3742_v19 }
 0x1ee   : > { %v5279_v8 = vadd.f32 %v5169_v9, %v983_v34 }
 0x1ef   : > { %v4126_v56 = vadd.f32 %v5165_v55, %v975_v15  ;;  %v5283_v3 = vadd.f32 %v3744_v42, %v5199_v38 }
 0x1f1   : > { %v3785_v61 = vpop.f32.mrb[80].mxu0 }
 0x1f2   : > { %v3786_v18 = vpop.f32.mrb[81].mxu0 }
 0x1f3   : > { %v3787_v10 = vadd.f32 %v3786_v18, %v3785_v61  ;;  %v3788_v27 = vpop.f32.mrb[82].mxu0 }
 0x1f4   : > { %v3789_v14 = vpop.f32.mrb[83].mxu0 }
 0x1f5   : > { %v3790_v41 = vadd.f32 %v3789_v14, %v3788_v27  ;;  %v5286_v51 = vadd.f32 %v5210_v54, %v3787_v10 }
 0x1f7   : > { %v5289_v23 = vadd.f32 %v5220_v7, %v3790_v41 }
 0x1f9   : > { %v3791_v57 = vpop.f32.mrb[84].mxu0 }
 0x1fa   : > { %v3792_v9 = vpop.f32.mrb[85].mxu0 }
 0x1fb   : > { %v3793_v33 = vadd.f32 %v3792_v9, %v3791_v57  ;;  %v3794_v46 = vpop.f32.mrb[86].mxu0 }
 0x1fc   : > { %v3795_v55 = vpop.f32.mrb[87].mxu0 }
 0x1fd   : > { %v3796_v30 = vadd.f32 %v3795_v55, %v3794_v46  ;;  %v4067_v38 = vadd.f32 %v5206_v60, %v3793_v33 }
 0x1ff   : > { %v4075_v24 = vadd.f32 %v5217_v29, %v3796_v30 }
 0x201   : > { %v3797_v37 = vpop.f32.mrb[88].mxu0 }
 0x202   : > { %v3798_v35 = vpop.f32.mrb[89].mxu0 }
 0x203   : > { %v3799_v58 = vadd.f32 %v3798_v35, %v3797_v37  ;;  %v3800_v53 = vpop.f32.mrb[90].mxu0 }
 0x204   : > { %v3801_v21 = vpop.f32.mrb[91].mxu0 }
 0x205   : > { %v3802_v54 = vadd.f32 %v3801_v21, %v3800_v53  ;;  %v5294_v28 = vadd.f32 %v5232_v13, %v3799_v58 }
 0x207   : > { %v5297_v7 = vadd.f32 %v5242_v6, %v3802_v54 }
 0x209   : > { %v3803_v48 = vpop.f32.mrb[92].mxu0 }
 0x20a   : > { %v3804_v5 = vpop.f32.mrb[93].mxu0 }
 0x20b   : > { %v3805_v32 = vadd.f32 %v3804_v5, %v3803_v48  ;;  %v3806_v31 = vpop.f32.mrb[94].mxu0 }
 0x20c   : > { %v3807_v52 = vpop.f32.mrb[95].mxu0 }
 0x20d   : > { %v3808_v60 = vadd.f32 %v3807_v52, %v3806_v31  ;;  %v5300_v29 = vadd.f32 %v5228_v22, %v3805_v32 }
 0x20f   : > { %v5303_v20 = vadd.f32 %v5239_v40, %v3808_v60 }
 0x211   : > { %v3809_v19 = vpop.f32.mrb[96].mxu0 }
 0x212   : > { %v3810_v34 = vpop.f32.mrb[97].mxu0 }
 0x213   : > { %v3811_v26 = vadd.f32 %v3810_v34, %v3809_v19  ;;  %v3812_v13 = vpop.f32.mrb[98].mxu0 }
 0x214   : > { %v3813_v11 = vpop.f32.mrb[99].mxu0 }
 0x215   : > { %v3814_v15 = vadd.f32 %v3813_v11, %v3812_v13  ;;  %v5306_v6 = vadd.f32 %v5254_v47, %v3811_v26 }
 0x217   : > { %v5308_v42 = vadd.f32 %v4110_v43, %v3814_v15 }
 0x219   : > { %v3815_v61 = vpop.f32.mrb[100].mxu0 }
 0x21a   : > { %v3816_v18 = vpop.f32.mrb[101].mxu0 }
 0x21b   : > { %v3817_v10 = vadd.f32 %v3816_v18, %v3815_v61  ;;  %v3818_v27 = vpop.f32.mrb[102].mxu0 }
 0x21c   : > { %v3819_v22 = vpop.f32.mrb[103].mxu0 }
 0x21d   : > { %v3820_v14 = vadd.f32 %v3819_v22, %v3818_v27  ;;  %v5311_v40 = vadd.f32 %v5250_v45, %v3817_v10 }
 0x21f   : > { %v5314_v41 = vadd.f32 %v5261_v0, %v3820_v14 }
 0x221   : > { %v3821_v57 = vpop.f32.mrb[104].mxu0 }
 0x222   : > { %v3822_v9 = vpop.f32.mrb[105].mxu0 }
 0x223   : > { %v3823_v33 = vadd.f32 %v3822_v9, %v3821_v57  ;;  %v3824_v47 = vpop.f32.mrb[106].mxu0 }
 0x224   : > { %v3825_v46 = vpop.f32.mrb[107].mxu0 }
 0x225   : > { %v3826_v43 = vadd.f32 %v3825_v46, %v3824_v47  ;;  %v5316_v55 = vadd.f32 %v4118_v1, %v3823_v33 }
 0x227   : > { %v5318_v30 = vadd.f32 %v4126_v56, %v3826_v43 }
 0x229   : > { %v3827_v37 = vpop.f32.mrb[108].mxu0 }
 0x22a   : > { %v3828_v35 = vpop.f32.mrb[109].mxu0 }
 0x22b   : > { %v3829_v58 = vadd.f32 %v3828_v35, %v3827_v37  ;;  %v3830_v53 = vpop.f32.mrb[110].mxu0 }
 0x22c   : > { %v3831_v45 = vpop.f32.mrb[111].mxu0 }
 0x22d   : > { %v3832_v21 = vadd.f32 %v3831_v45, %v3830_v53  ;;  %v5321_v0 = vadd.f32 %v5270_v17, %v3829_v58 }
 0x22f   : > { %v5325_v54 = vadd.f32 %v5279_v8, %v3832_v21 }
 0x231   : > { %v3833_v48 = vpop.f32.mrb[112].mxu0  ;;  %v4019_v5 = vpop.f32.mrb[80].mxu1 }
 0x232   : > { %v4068_v32 = vadd.f32 %v4067_v38, %v4019_v5  ;;  %v3834_v1 = vpop.f32.mrb[113].mxu0  ;;  %v2753_v31 = vpop.f32.mrb[81].mxu1 }
 0x233   : > { %v3835_v56 = vadd.f32 %v3834_v1, %v3833_v48  ;;  %v4072_v52 = vadd.f32 %v5286_v51, %v2753_v31  ;;  %v3836_v60 = vpop.f32.mrb[114].mxu0  ;;  %v4020_v19 = vpop.f32.mrb[82].mxu1 }
 0x234   : > { %2978 = vst [vmem:[%s5328_s20 + $0x10] sm:$0xff] %v4068_v32  ;;  %v4076_v17 = vadd.f32 %v4075_v24, %v4020_v19  ;;  %v3837_v8 = vpop.f32.mrb[115].mxu0  ;;  %v2756_v34 = vpop.f32.mrb[83].mxu1  ;;  %v3047_v18 = vmul.f32 %v4068_v32, %v4068_v32 }
 0x235   : > { %2976 = vst [vmem:[%s5328_s20] sm:$0xff] %v4072_v52  ;;  %v3838_v26 = vadd.f32 %v3837_v8, %v3836_v60  ;;  %v4080_v38 = vadd.f32 %v5289_v23, %v2756_v34  ;;  %v5334_v13 = vadd.f32 %v5173_v12, %v3835_v56  ;;  %v3045_v51 = vmul.f32 %v4072_v52, %v4072_v52 }
 0x236   : > { %2979 = vst [vmem:[%s5328_s20 + $0x18] sm:$0xff] %v4076_v17  ;;  %v3048_v14 = vmul.f32 %v4076_v17, %v4076_v17 }
 0x237   : > { %2977 = vst [vmem:[%s5328_s20 + $0x8] sm:$0xff] %v4080_v38  ;;  %v3008_v11 = vadd.f32 %v4080_v38, %v4072_v52  ;;  %v3046_v15 = vmul.f32 %v4080_v38, %v4080_v38  ;;  %v5339_v61 = vadd.f32 %v5177_v44, %v3838_v26 }
 0x239   : > { %v3009_v24 = vadd.f32 %v4068_v32, %v3008_v11  ;;  %v3077_v10 = vadd.f32 %v3046_v15, %v3045_v51  ;;  %v3839_v27 = vpop.f32.mrb[116].mxu0  ;;  %v4023_v22 = vpop.f32.mrb[84].mxu1  ;;  %v5511_v32 = vld [vmem:[#allocation15_spill] sm:$0xff] }
 0x23a   : > { %v4084_v23 = vadd.f32 %v5300_v29, %v4023_v22  ;;  %v3840_v12 = vpop.f32.mrb[117].mxu0  ;;  %v2769_v57 = vpop.f32.mrb[85].mxu1 }
 0x23b   : > { %v3078_v9 = vadd.f32 %v3077_v10, %v3047_v18  ;;  %v3841_v33 = vadd.f32 %v3840_v12, %v3839_v27  ;;  %v4088_v47 = vadd.f32 %v5294_v28, %v2769_v57  ;;  %v3010_v46 = vadd.f32 %v4076_v17, %v3009_v24  ;;  %v3842_v44 = vpop.f32.mrb[118].mxu0  ;;  %v4024_v43 = vpop.f32.mrb[86].mxu1 }
 0x23c   : > { %2982 = vst [vmem:[%s5328_s20 + $0x30] sm:$0xff] %v4084_v23  ;;  %v4092_v37 = vadd.f32 %v5303_v20, %v4024_v43  ;;  %v3843_v35 = vpop.f32.mrb[119].mxu0  ;;  %v2772_v58 = vpop.f32.mrb[87].mxu1  ;;  %v3051_v60 = vmul.f32 %v4084_v23, %v4084_v23 }
 0x23d   : > { %2980 = vst [vmem:[%s5328_s20 + $0x20] sm:$0xff] %v4088_v47  ;;  %v3011_v53 = vadd.f32 %v4088_v47, %v3010_v46  ;;  %v3049_v45 = vmul.f32 %v4088_v47, %v4088_v47  ;;  %v3079_v29 = vadd.f32 %v3078_v9, %v3048_v14  ;;  %v3844_v21 = vadd.f32 %v3843_v35, %v3842_v44  ;;  %v5512_v9 = vld [vmem:[#allocation16_spill] sm:$0xff] }
 0x23e   : > { %2983 = vst [vmem:[%s5328_s20 + $0x38] sm:$0xff] %v4092_v37  ;;  %v4096_v48 = vadd.f32 %v5297_v7, %v2772_v58  ;;  %v5349_v5 = vadd.f32 %v5181_v50, %v3841_v33  ;;  %v3052_v11 = vmul.f32 %v4092_v37, %v4092_v37 }
 0x23f   : > { %v3080_v28 = vadd.f32 %v3079_v29, %v3049_v45  ;;  %v5352_v1 = vadd.f32 %v5511_v32, %v3844_v21 }
 0x240   : > { %2981 = vst [vmem:[%s5328_s20 + $0x28] sm:$0xff] %v4096_v48  ;;  %v3012_v31 = vadd.f32 %v4096_v48, %v3011_v53  ;;  %v3050_v20 = vmul.f32 %v4096_v48, %v4096_v48 }
 0x241   : > { %v3845_v56 = vpop.f32.mrb[120].mxu0  ;;  %v4027_v52 = vpop.f32.mrb[88].mxu1 }
 0x242   : > { %v3013_v19 = vadd.f32 %v4084_v23, %v3012_v31  ;;  %v3081_v17 = vadd.f32 %v3080_v28, %v3050_v20  ;;  %v4100_v8 = vadd.f32 %v5311_v40, %v4027_v52  ;;  %v3846_v7 = vpop.f32.mrb[121].mxu0  ;;  %v2785_v34 = vpop.f32.mrb[89].mxu1 }
 0x243   : > { %v3847_v50 = vadd.f32 %v3846_v7, %v3845_v56  ;;  %v4104_v26 = vadd.f32 %v5306_v6, %v2785_v34  ;;  %v3848_v38 = vpop.f32.mrb[122].mxu0  ;;  %v4028_v51 = vpop.f32.mrb[90].mxu1 }
 0x244   : > { %v3082_v15 = vadd.f32 %v3081_v17, %v3051_v60  ;;  %2986 = vst [vmem:[%s5328_s20 + $0x50] sm:$0xff] %v4100_v8  ;;  %v3014_v18 = vadd.f32 %v4092_v37, %v3013_v19  ;;  %v4108_v24 = vadd.f32 %v5314_v41, %v4028_v51  ;;  %v3849_v10 = vpop.f32.mrb[123].mxu0  ;;  %v2788_v27 = vpop.f32.mrb[91].mxu1  ;;  %v3055_v43 = vmul.f32 %v4100_v8, %v4100_v8 }
 0x245   : > { %2984 = vst [vmem:[%s5328_s20 + $0x40] sm:$0xff] %v4104_v26  ;;  %v3053_v22 = vmul.f32 %v4104_v26, %v4104_v26  ;;  %v3850_v40 = vadd.f32 %v3849_v10, %v3848_v38  ;;  %v4112_v14 = vadd.f32 %v5308_v42, %v2788_v27  ;;  %v5362_v23 = vadd.f32 %v5189_v25, %v3847_v50 }
 0x246   : > { %v3015_v6 = vadd.f32 %v4104_v26, %v3014_v18  ;;  %v3083_v12 = vadd.f32 %v3082_v15, %v3052_v11  ;;  %2987 = vst [vmem:[%s5328_s20 + $0x58] sm:$0xff] %v4108_v24  ;;  %v3056_v48 = vmul.f32 %v4108_v24, %v4108_v24 }
 0x247   : > { %2985 = vst [vmem:[%s5328_s20 + $0x48] sm:$0xff] %v4112_v14  ;;  %v3054_v57 = vmul.f32 %v4112_v14, %v4112_v14  ;;  %v5367_v33 = vadd.f32 %v5512_v9, %v3850_v40 }
 0x248   : > { %v3084_v47 = vadd.f32 %v3083_v12, %v3053_v22  ;;  %v3016_v41 = vadd.f32 %v4112_v14, %v3015_v6 }
 0x249   : > { %v3851_v46 = vpop.f32.mrb[124].mxu0  ;;  %v4031_v44 = vpop.f32.mrb[92].mxu1 }
 0x24a   : > { %v3017_v37 = vadd.f32 %v4100_v8, %v3016_v41  ;;  %v3085_v42 = vadd.f32 %v3084_v47, %v3054_v57  ;;  %v4116_v25 = vadd.f32 %v5321_v0, %v4031_v44  ;;  %v3852_v35 = vpop.f32.mrb[125].mxu0  ;;  %v2801_v58 = vpop.f32.mrb[93].mxu1 }
 0x24b   : > { %v3853_v53 = vadd.f32 %v3852_v35, %v3851_v46  ;;  %v4120_v45 = vadd.f32 %v5316_v55, %v2801_v58  ;;  %v3854_v29 = vpop.f32.mrb[126].mxu0  ;;  %v4032_v21 = vpop.f32.mrb[94].mxu1 }
 0x24c   : > { %v3086_v28 = vadd.f32 %v3085_v42, %v3055_v43  ;;  %2990 = vst [vmem:[%s5328_s20 + $0x70] sm:$0xff] %v4116_v25  ;;  %v3018_v32 = vadd.f32 %v4108_v24, %v3017_v37  ;;  %v4124_v31 = vadd.f32 %v5325_v54, %v4032_v21  ;;  %v3855_v20 = vpop.f32.mrb[127].mxu0  ;;  %v2804_v56 = vpop.f32.mrb[95].mxu1  ;;  %v3059_v38 = vmul.f32 %v4116_v25, %v4116_v25 }
 0x24d   : > { %2988 = vst [vmem:[%s5328_s20 + $0x60] sm:$0xff] %v4120_v45  ;;  %v3057_v52 = vmul.f32 %v4120_v45, %v4120_v45  ;;  %v3856_v0 = vadd.f32 %v3855_v20, %v3854_v29  ;;  %v4128_v60 = vadd.f32 %v5318_v30, %v2804_v56  ;;  %v4142_v19 = vadd.f32 %v5197_v62, %v3853_v53 }
 0x24e   : > { %v3019_v55 = vadd.f32 %v4120_v45, %v3018_v32  ;;  %v3087_v17 = vadd.f32 %v3086_v28, %v3056_v48  ;;  %2991 = vst [vmem:[%s5328_s20 + $0x78] sm:$0xff] %v4124_v31 }
 0x24f   : > { %2989 = vst [vmem:[%s5328_s20 + $0x68] sm:$0xff] %v4128_v60  ;;  %v3058_v8 = vmul.f32 %v4128_v60, %v4128_v60  ;;  %v4148_v7 = vadd.f32 %v5201_v36, %v3856_v0  ;;  %v3060_v36 = vmul.f32 %v4124_v31, %v4124_v31 }
 0x250   : > { %v3088_v34 = vadd.f32 %v3087_v17, %v3057_v52  ;;  %v3020_v50 = vadd.f32 %v4128_v60, %v3019_v55 }
 0x251   : > { %v3857_v54 = vpop.f32.mrb[128].mxu0  ;;  %v4035_v26 = vpop.f32.mrb[0].mxu1 }
 0x252   : > { %v3021_v51 = vadd.f32 %v4116_v25, %v3020_v50  ;;  %v3089_v11 = vadd.f32 %v3088_v34, %v3058_v8  ;;  %v4131_v30 = vadd.f32 %v5349_v5, %v4035_v26  ;;  %v3858_v15 = vpop.f32.mrb[129].mxu0  ;;  %v2817_v62 = vpop.f32.mrb[1].mxu1 }
 0x253   : > { %v3859_v18 = vadd.f32 %v3858_v15, %v3857_v54  ;;  %v4134_v24 = vadd.f32 %v5334_v13, %v2817_v62  ;;  %v3860_v10 = vpop.f32.mrb[130].mxu0  ;;  %v4036_v27 = vpop.f32.mrb[2].mxu1 }
 0x254   : > { %v3090_v22 = vadd.f32 %v3089_v11, %v3059_v38  ;;  %2994 = vst [vmem:[%s5328_s20 + $0x90] sm:$0xff] %v4131_v30  ;;  %v3022_v40 = vadd.f32 %v4124_v31, %v3021_v51  ;;  %v4137_v14 = vadd.f32 %v5352_v1, %v4036_v27  ;;  %v3861_v6 = vpop.f32.mrb[131].mxu0  ;;  %v2820_v12 = vpop.f32.mrb[3].mxu1  ;;  %v3063_v25 = vmul.f32 %v4131_v30, %v4131_v30 }
 0x255   : > { %2992 = vst [vmem:[%s5328_s20 + $0x80] sm:$0xff] %v4134_v24  ;;  %v3061_v57 = vmul.f32 %v4134_v24, %v4134_v24  ;;  %v3862_v5 = vadd.f32 %v3861_v6, %v3860_v10  ;;  %v4140_v9 = vadd.f32 %v5339_v61, %v2820_v12  ;;  %v4157_v47 = vadd.f32 %v5213_v63, %v3859_v18 }
 0x256   : > { %v3023_v13 = vadd.f32 %v4134_v24, %v3022_v40  ;;  %v3091_v41 = vadd.f32 %v3090_v22, %v3060_v36  ;;  %2995 = vst [vmem:[%s5328_s20 + $0x98] sm:$0xff] %v4137_v14 }
 0x257   : > { %2993 = vst [vmem:[%s5328_s20 + $0x88] sm:$0xff] %v4140_v9  ;;  %v3062_v46 = vmul.f32 %v4140_v9, %v4140_v9  ;;  %v4163_v44 = vadd.f32 %v5223_v59, %v3862_v5  ;;  %v3064_v59 = vmul.f32 %v4137_v14, %v4137_v14 }
 0x258   : > { %v3092_v43 = vadd.f32 %v3091_v41, %v3061_v57  ;;  %v3024_v37 = vadd.f32 %v4140_v9, %v3023_v13 }
 0x259   : > { %v3863_v1 = vpop.f32.mrb[132].mxu0  ;;  %v4039_v42 = vpop.f32.mrb[4].mxu1 }
 0x25a   : > { %v3025_v35 = vadd.f32 %v4131_v30, %v3024_v37  ;;  %v3093_v58 = vadd.f32 %v3092_v43, %v3062_v46  ;;  %v4143_v53 = vadd.f32 %v4142_v19, %v4039_v42  ;;  %v3864_v61 = vpop.f32.mrb[133].mxu0  ;;  %v2833_v45 = vpop.f32.mrb[5].mxu1 }
 0x25b   : > { %v3865_v63 = vadd.f32 %v3864_v61, %v3863_v1  ;;  %v4146_v29 = vadd.f32 %v5362_v23, %v2833_v45  ;;  %v3866_v21 = vpop.f32.mrb[134].mxu0  ;;  %v4040_v48 = vpop.f32.mrb[6].mxu1 }
 0x25c   : > { %v3094_v28 = vadd.f32 %v3093_v58, %v3063_v25  ;;  %2998 = vst [vmem:[%s5328_s20 + $0xb0] sm:$0xff] %v4143_v53  ;;  %v3026_v32 = vadd.f32 %v4137_v14, %v3025_v35  ;;  %v4149_v31 = vadd.f32 %v4148_v7, %v4040_v48  ;;  %v3867_v20 = vpop.f32.mrb[135].mxu0  ;;  %v2836_v56 = vpop.f32.mrb[7].mxu1  ;;  %v3067_v26 = vmul.f32 %v4143_v53, %v4143_v53 }
 0x25d   : > { %2996 = vst [vmem:[%s5328_s20 + $0xa0] sm:$0xff] %v4146_v29  ;;  %v3065_v52 = vmul.f32 %v4146_v29, %v4146_v29  ;;  %v3868_v0 = vadd.f32 %v3867_v20, %v3866_v21  ;;  %v4152_v60 = vadd.f32 %v5367_v33, %v2836_v56  ;;  %v4154_v19 = vadd.f32 %v5235_v39, %v3865_v63 }
 0x25e   : > { %v3027_v55 = vadd.f32 %v4146_v29, %v3026_v32  ;;  %v3095_v23 = vadd.f32 %v3094_v28, %v3064_v59  ;;  %2999 = vst [vmem:[%s5328_s20 + $0xb8] sm:$0xff] %v4149_v31  ;;  %v3068_v24 = vmul.f32 %v4149_v31, %v4149_v31 }
 0x25f   : > { %2997 = vst [vmem:[%s5328_s20 + $0xa8] sm:$0xff] %v4152_v60  ;;  %v3066_v17 = vmul.f32 %v4152_v60, %v4152_v60  ;;  %v4160_v8 = vadd.f32 %v5245_v16, %v3868_v0 }
 0x260   : > { %v3096_v34 = vadd.f32 %v3095_v23, %v3065_v52  ;;  %v3028_v50 = vadd.f32 %v4152_v60, %v3027_v55 }
 0x261   : > { %v3869_v7 = vpop.f32.mrb[136].mxu0  ;;  %v4043_v54 = vpop.f32.mrb[8].mxu1 }
 0x262   : > { %v3029_v38 = vadd.f32 %v4143_v53, %v3028_v50  ;;  %v3097_v51 = vadd.f32 %v3096_v34, %v3066_v17  ;;  %v4155_v11 = vadd.f32 %v4154_v19, %v4043_v54  ;;  %v3870_v33 = vpop.f32.mrb[137].mxu0  ;;  %v2849_v30 = vpop.f32.mrb[9].mxu1 }
 0x263   : > { %v3871_v39 = vadd.f32 %v3870_v33, %v3869_v7  ;;  %v4158_v15 = vadd.f32 %v4157_v47, %v2849_v30  ;;  %v3872_v62 = vpop.f32.mrb[138].mxu0  ;;  %v4044_v18 = vpop.f32.mrb[10].mxu1 }
 0x264   : > { %v3098_v16 = vadd.f32 %v3097_v51, %v3067_v26  ;;  %3002 = vst [vmem:[%s5328_s20 + $0xd0] sm:$0xff] %v4155_v11  ;;  %v3030_v10 = vadd.f32 %v4149_v31, %v3029_v38  ;;  %v4161_v27 = vadd.f32 %v4160_v8, %v4044_v18  ;;  %v3873_v36 = vpop.f32.mrb[139].mxu0  ;;  %v2852_v22 = vpop.f32.mrb[11].mxu1  ;;  %v3071_v37 = vmul.f32 %v4155_v11, %v4155_v11 }
 0x265   : > { %3000 = vst [vmem:[%s5328_s20 + $0xc0] sm:$0xff] %v4158_v15  ;;  %v3069_v40 = vmul.f32 %v4158_v15, %v4158_v15  ;;  %v3874_v14 = vadd.f32 %v3873_v36, %v3872_v62  ;;  %v4164_v6 = vadd.f32 %v4163_v44, %v2852_v22  ;;  %v4169_v12 = vadd.f32 %v5257_v2, %v3871_v39 }
 0x266   : > { %v3031_v57 = vadd.f32 %v4158_v15, %v3030_v10  ;;  %v3099_v5 = vadd.f32 %v3098_v16, %v3068_v24  ;;  %3003 = vst [vmem:[%s5328_s20 + $0xd8] sm:$0xff] %v4161_v27  ;;  %v3072_v61 = vmul.f32 %v4161_v27, %v4161_v27 }
 0x267   : > { %3001 = vst [vmem:[%s5328_s20 + $0xc8] sm:$0xff] %v4164_v6  ;;  %v3070_v9 = vmul.f32 %v4164_v6, %v4164_v6  ;;  %v4175_v47 = vadd.f32 %v5265_v4, %v3874_v14 }
 0x268   : > { %v3100_v13 = vadd.f32 %v3099_v5, %v3069_v40  ;;  %v3032_v41 = vadd.f32 %v4164_v6, %v3031_v57 }
 0x269   : > { %v3875_v46 = vpop.f32.mrb[140].mxu0  ;;  %v4047_v43 = vpop.f32.mrb[12].mxu1 }
 0x26a   : > { %v3033_v1 = vadd.f32 %v4155_v11, %v3032_v41  ;;  %v3101_v42 = vadd.f32 %v3100_v13, %v3070_v9  ;;  %v3876_v25 = vpop.f32.mrb[141].mxu0  ;;  %v2865_v44 = vpop.f32.mrb[13].mxu1 }
 0x26b   : > { %v3877_v2 = vadd.f32 %v3876_v25, %v3875_v46  ;;  %v4170_v35 = vadd.f32 %v4169_v12, %v2865_v44  ;;  %v3878_v58 = vpop.f32.mrb[142].mxu0  ;;  %v4048_v53 = vpop.f32.mrb[14].mxu1 }
 0x26c   : > { %v3102_v45 = vadd.f32 %v3101_v42, %v3071_v37  ;;  %v3034_v4 = vadd.f32 %v4161_v27, %v3033_v1  ;;  %v3879_v63 = vpop.f32.mrb[143].mxu0  ;;  %v2868_v29 = vpop.f32.mrb[15].mxu1 }
 0x26d   : > { %v4166_v21 = vadd.f32 %v5275_v49, %v3877_v2  ;;  %3004 = vst [vmem:[%s5328_s20 + $0xe0] sm:$0xff] %v4170_v35  ;;  %v3073_v48 = vmul.f32 %v4170_v35, %v4170_v35  ;;  %v3880_v59 = vadd.f32 %v3879_v63, %v3878_v58  ;;  %v4176_v28 = vadd.f32 %v4175_v47, %v2868_v29 }
 0x26e   : > { %v3035_v32 = vadd.f32 %v4170_v35, %v3034_v4  ;;  %v3103_v31 = vadd.f32 %v3102_v45, %v3072_v61 }
 0x26f   : > { %v4167_v20 = vadd.f32 %v4166_v21, %v4047_v43  ;;  %v4172_v56 = vadd.f32 %v5283_v3, %v3880_v59  ;;  %3005 = vst [vmem:[%s5328_s20 + $0xe8] sm:$0xff] %v4176_v28  ;;  %v3074_v52 = vmul.f32 %v4176_v28, %v4176_v28 }
 0x270   : > { %v3104_v0 = vadd.f32 %v3103_v31, %v3073_v48  ;;  %v3036_v60 = vadd.f32 %v4176_v28, %v3035_v32 }
 0x271   : > { %3006 = vst [vmem:[%s5328_s20 + $0xf0] sm:$0xff] %v4167_v20  ;;  %v3075_v49 = vmul.f32 %v4167_v20, %v4167_v20  ;;  %v4173_v19 = vadd.f32 %v4172_v56, %v4048_v53 }
 0x272   : > { %v3037_v3 = vadd.f32 %v4167_v20, %v3036_v60  ;;  %v3105_v55 = vadd.f32 %v3104_v0, %v3074_v52 }
 0x273   : > { %3007 = vst [vmem:[%s5328_s20 + $0xf8] sm:$0xff] %v4173_v19  ;;  %v3076_v23 = vmul.f32 %v4173_v19, %v4173_v19 }
 0x274   : > { %v3038_v17 = vadd.f32 %v4173_v19, %v3037_v3  ;;  %v3106_v8 = vadd.f32 %v3105_v55, %v3075_v49 }
 0x275   : > { %4541 = shalt.err (!%p4538_p7)
}
 0x276   : > { %s4542_s30 = scalar_lea.hbm %s5412_s10, 4096  ;;  %s4546_s8 = scalar_lea.hbm %s5493_s2, 8192 }
 0x277   : > { %p4543_p9 = scmp.ne.s32.totalorder %s5412_s10, %s4542_s30  ;;  %p4547_p5 = scmp.lt.u32.totalorder %s5412_s10, %s5493_s2 }
 0x278   : > { %p4548_p11 = scmp.lt.u32.totalorder %s4546_s8, %s4542_s30  ;;  %p4550_p4 = scmp.lt.u32.totalorder %s4542_s30, %s5412_s10 }
 0x279   : > { %p4544_p2 = pnand %p4543_p9, %p4753_p12 }
 0x27a   : > { %p4549_p1 = por %p4548_p11, %p4547_p5 }
 0x27b   : > { %p4545_p0 = pneg %p4544_p2 }
 0x27c   : > { %p4551_p6 = por %p4550_p4, %p4549_p1 }
 0x27e   : > { %p4552_p8 = pnand %p4551_p6, %p4545_p0 }
 0x280   : > { %4555 = shalt.err (!%p4552_p8)
}
 0x281   : > { %s4639_s20 = smov 128   ;;  %s4640_s4 = smov 8   ;;  %v3039_v34 = vrot.slane %v3038_v17, 4  ;;  %v3107_v50 = vadd.f32 %v3106_v8, %v3076_v23  ;;  %vm3114_vm0 = vcmask 1040384  }
 0x282   : > { %4234 = dma.vmem_to_hbm [thread:$0]  (%p4753_p12), %s5414_s22, 4096, %s5412_s10, %s3118_s11, %s4639_s20, %s4639_s20, %s4640_s4  }
 0x283   : > { %v3040_v7 = vadd.f32 %v3039_v34, %v3038_v17  ;;  %v3108_v54 = vrot.slane %v3107_v50, 4  ;;  %s3272_s26 = sshll.u32 %s4801_s6, 1  ;;  %s3493_s5 = sshll.u32 %s4683_s16, 5 }
 0x284   : > { %s214_s27 = scalar_lea.vmem [#allocation9], %s3272_s26  ;;  %s5447_s11 = scalar_lea.hbm %s5494_s3, %s3493_s5 }
 0x285   : > { %v3041_v26 = vrot.slane %v3040_v7, 2  ;;  %v3109_v38 = vadd.f32 %v3108_v54, %v3107_v50  ;;  %s3152_s28 = sshll.u32 %s214_s27, 4  ;;  %s3123_s29 = scalar_lea.sflag [#allocation10], %s4801_s6  ;;  %s5449_s28 = int_to_ptr.vmem [resolvable:$true] %s3152_s28 }
 0x286   : > { %s4556_s23 = scalar_lea.vmem %s5449_s28, 32  ;;  %s4641_s16 = smov [#allocation9]  }
 0x287   : > { %v3042_v51 = vadd.f32 %v3041_v26, %v3040_v7  ;;  %v3110_v11 = vrot.slane %v3109_v38, 2  ;;  %p4557_p10 = scmp.ne.s32.totalorder %s5449_s28, %s4556_s23  ;;  %s4560_s30 = sshll.u32 %s4641_s16, 4  ;;  %s4561_s30 = int_to_ptr.vmem [resolvable:$false] %s4560_s30 }
 0x288   : > { %s4562_s25 = scalar_lea.vmem %s4561_s30, 64  ;;  %p4563_p7 = scmp.lt.s32.totalorder %s5449_s28, %s4561_s30 }
 0x289   : > { %v3043_v33 = vrot.slane %v3042_v51, 1  ;;  %v3111_v30 = vadd.f32 %v3110_v11, %v3109_v38  ;;  %p4558_p13 = pnand %p4557_p10, %p4753_p12  ;;  %p4564_p9 = scmp.lt.s32.totalorder %s4562_s25, %s4556_s23 }
 0x28b   : > { %v3112_v39 = vrot.slane %v3111_v30, 1  ;;  %v3044_v15 = vadd.f32 %v3043_v33, %v3042_v51  ;;  %p4559_p3 = pneg %p4558_p13  ;;  %p4565_p2 = por %p4564_p9, %p4563_p7 }
 0x28d   : > { %v3113_v62 = vadd.f32 %v3112_v39, %v3111_v30  ;;  %p4566_p0 = pnand %p4565_p2, %p4559_p3 }
 0x28f   : > { %v3115_v18 = vsel %vm3114_vm0, %v3044_v15, %v3113_v62 }
 0x290   : > { %3116 = vst [vmem:[%s214_s27] sm:$0x3] %v3115_v18 }
 0x291   : > { %4569 = shalt.err (!%p4566_p0)
}
 0x292   : > { %s4570_s6 = scalar_lea.hbm %s5447_s11, 32  ;;  %s4574_s9 = scalar_lea.hbm %s5494_s3, 64 }
 0x293   : > { %p4571_p5 = scmp.ne.s32.totalorder %s5447_s11, %s4570_s6  ;;  %p4575_p4 = scmp.lt.u32.totalorder %s5447_s11, %s5494_s3 }
 0x294   : > { %p4576_p6 = scmp.lt.u32.totalorder %s4574_s9, %s4570_s6  ;;  %p4578_p10 = scmp.lt.u32.totalorder %s4570_s6, %s5447_s11 }
 0x295   : > { %p4572_p11 = pnand %p4571_p5, %p4753_p12 }
 0x296   : > { %p4577_p8 = por %p4576_p6, %p4575_p4 }
 0x297   : > { %p4573_p1 = pneg %p4572_p11 }
 0x298   : > { %p4579_p13 = por %p4578_p10, %p4577_p8 }
 0x29a   : > { %p4580_p3 = pnand %p4579_p13, %p4573_p1 }
 0x29c   : > { %4583 = shalt.err (!%p4580_p3)
}
 0x29d   : > { %4235 = dma.vmem_to_hbm [thread:$0]  (%p4753_p12), %s5449_s28, 32, %s5447_s11, %s3123_s29  }
 0x29e PF: > { %s3164_s4 = sand.u32 1, %s4618_s12   ;;  %p5513_p7 = scmp.ne.s32.totalorder %s5499_s19, 0 }
 0x29f   : > { %p5514_p9 = scmp.ge.s32.totalorder %s4630_s15, 2  ;;  %s3165_s26 = scalar_lea.sflag [#allocation5], %s3164_s4 }
 0x2a1   : > { %p4247_p2 = pnand %p5514_p9, %p5513_p7 }
 0x2a3   : > { %4609 = dma.done.wait (!%p4247_p2), %s3165_s26, 4096  }
 0x2a4   : > { %4611 = vsyncadd (!%p4247_p2), %s3165_s26, 4294963200  ;;  %s3174_s5 = scalar_lea.sflag [#allocation10], %s3164_s4 }
 0x2a5   : > { %4613 = dma.done.wait (!%p4247_p2), %s3174_s5, 32  }
 0x2a6   : > { %4615 = vsyncadd (!%p4247_p2), %s3174_s5, 4294967264  ;;  %p21_p12 = scmp.ge.s32.totalorder %s4718_s24, 4   ;;  %s5515_s12 = smov %s4622_s13 }
 0x2a7   : > { %s5516_s13 = smov %s4626_s14  ;;  %s5517_s14 = smov %s4749_s17 }
 0x2a8   : > { %s5518_s15 = smov %s4718_s24  ;;  %23 = sbr.rel (!%p21_p12) target bundleno = 8 (0x8), region = 96 }
 0x2af   :  { %3179 = vsyncpa [#allocation4], 1 }
 0x2b0   :  { %3181 = vsyncpa [#allocation4 + $0x1], 1 }
 0x2b1   :  { %3182 = vsyncpa [#allocation7], 1 }
 0x2b2   :  { %3183 = vsyncpa [#allocation5], 1 }
 0x2b3   :  { %3185 = vsyncpa [#allocation5 + $0x1], 1 }
 0x2b4   :  { %3186 = vsyncpa [#allocation10], 1 }
 0x2b5   :  { %3188 = vsyncpa [#allocation10 + $0x1], 1 }

</bundles_post_ra>
